<compile_context>
chip_gen: v5e
topology: v5e:2x2
jax: 0.10.0
libtpu: 0.0.40
codegen_flags: <defaults>
</compile_context>

<pallas_src>
import jax
import jax.numpy as jnp
from jax import lax
from jax.experimental import pallas as pl
from jax.experimental.pallas import tpu as pltpu

NUM_CLASSES = 6
H = W = 16             # input spatial size
PH = PW = 8            # spatial size after the 2x2 max-pool
C1, C2 = 16, 32        # conv channel counts
NPIX = H * W           # 256 input pixels per sample
NPOS = PH * PW         # 64 pooled spatial positions
L1 = NPOS * C1         # 1024 = feature width after conv1+pool
ROW = PW * C1          # 128  = one pooled row (8 cols x 16 ch) of conv1 output
BROW = PW * C2         # 256  = one row (8 cols x 32 ch) of conv2 output
FCPAD = 128            # FC output padded to a full lane group


# ----------------------------------------------------------------------------
# Parameter folding (weights only; in deployment this runs once per checkpoint).
# ----------------------------------------------------------------------------
def fold_params(params):
    c1w, c1b, c2w, c2b, fcw, fcb = params

    # --- conv1 (+ 2x2 max-pool sub-positions), dense fold -------------------
    # input lane i*16+j -> output lane g*1024 + (pi*8+pj)*16 + oc,
    # g = di*2+dj is the pool sub-position, output pixel = (2*pi+di, 2*pj+dj).
    ii = jnp.arange(NPIX) // W
    jj = jnp.arange(NPIX) % W
    lane = jnp.arange(4 * L1)
    g, rest = lane // L1, lane % L1
    p, oc = rest // C1, rest % C1
    oi = 2 * (p // PW) + g // 2
    oj = 2 * (p % PW) + g % 2
    kh = ii[:, None] - oi[None, :] + 1
    kw = jj[:, None] - oj[None, :] + 1
    valid = (kh >= 0) & (kh < 3) & (kw >= 0) & (kw < 3)
    taps = c1w[:, 0, :, :][oc[None, :], jnp.clip(kh, 0, 2), jnp.clip(kw, 0, 2)]
    w1full = jnp.where(valid, taps, 0.0).astype(jnp.bfloat16)           # (256, 4096)
    b1full = jnp.tile(c1b, NPOS).reshape(1, L1).astype(jnp.float32)     # (1, 1024)

    # --- conv2, banded fold --------------------------------------------------
    # weight row:  kh*128 + pj_in*16 + cin   (kh in {0,1,2})
    # weight col:  pj_out*32 + oc            ; kw = pj_in - pj_out + 1
    rlin = jnp.arange(3 * ROW)
    dr = rlin // ROW
    rem = rlin % ROW
    pj_in, cin = rem // C1, rem % C1
    col = jnp.arange(BROW)
    pj_out, oc2 = col // C2, col % C2
    kw2 = pj_in[:, None] - pj_out[None, :] + 1
    valid2 = (kw2 >= 0) & (kw2 < 3)
    taps2 = c2w[oc2[None, :], cin[:, None], dr[:, None], jnp.clip(kw2, 0, 2)]
    w2band = jnp.where(valid2, taps2, 0.0).astype(jnp.bfloat16)         # (384, 256)
    b2band = jnp.tile(c2b, PW).reshape(1, BROW).astype(jnp.float32)     # (1, 256)

    # --- AdaptiveAvgPool2d((1,1)) + Linear folded ----------------------------
    # logits = (sum over bands of relu(band)) @ tile(fcw.T/64, (8,1)) + fcb
    wfcband = jnp.tile(fcw.T / float(NPOS), (PW, 1))                    # (256, 6)
    wfcband = jnp.pad(wfcband, ((0, 0), (0, FCPAD - NUM_CLASSES)))
    wfcband = wfcband.astype(jnp.bfloat16)                              # (256, 128)
    bfcband = jnp.pad(fcb, (0, FCPAD - NUM_CLASSES)).reshape(1, FCPAD)
    bfcband = bfcband.astype(jnp.float32)                               # (1, 128)

    return w1full, b1full, w2band, b2band, wfcband, bfcband


# ----------------------------------------------------------------------------
# Fused kernel: conv1 + ReLU + maxpool + banded conv2 + ReLU + avgpool + fc
# ----------------------------------------------------------------------------
def _fused_kernel(x_ref, w1_ref, b1_ref, w2_ref, b2_ref, wfc_ref, bfc_ref, o_ref):
    x = x_ref[...]                                                 # (TB, 256) bf16
    tb = x.shape[0]

    # conv1 as 4 sub-position matmuls with a running max == 2x2 MaxPool
    # (valid because the bias is identical across sub-positions & ReLU monotone).
    acc = jnp.dot(x, w1_ref[:, 0:L1], preferred_element_type=jnp.float32)
    for g in range(1, 4):
        acc = jnp.maximum(
            acc, jnp.dot(x, w1_ref[:, g * L1:(g + 1) * L1],
                         preferred_element_type=jnp.float32))
    pooled = jnp.maximum(acc + b1_ref[...], 0.0).astype(jnp.bfloat16)  # (TB, 1024)

    # Banded conv2 + ReLU, accumulated straight into the avg-pool/FC input.
    h2sum = jnp.zeros((tb, BROW), jnp.float32)                     # (TB, 256)
    for po in range(PH):                                           # 8 output rows
        lo = max(po - 1, 0)
        hi = min(po + 1, PH - 1)
        band = pooled[:, lo * ROW:(hi + 1) * ROW]                  # (TB, 256|384)
        w_lo = (lo - po + 1) * ROW
        w_hi = w_lo + (hi - lo + 1) * ROW
        h2 = jnp.dot(band, w2_ref[w_lo:w_hi, :],
                     preferred_element_type=jnp.float32)           # (TB, 256)
        h2sum = h2sum + jnp.maximum(h2 + b2_ref[...], 0.0)

    # global average pool (1/64) is folded into wfc; FC in bf16, f32 accum.
    o_ref[...] = (jnp.dot(h2sum.astype(jnp.bfloat16), wfc_ref[...],
                          preferred_element_type=jnp.float32)
                  + bfc_ref[...])                                  # (TB, 128)


# ----------------------------------------------------------------------------
# Wrapper: full forward
# ----------------------------------------------------------------------------
def cnn_kws_forward(x, params, *, block_b=512):
    """x: (N, 1, 16, 16) float32 (NCHW) -> logits (N, NUM_CLASSES)."""
    n = x.shape[0]
    w1full, b1full, w2band, b2band, wfcband, bfcband = fold_params(params)

    # Batch tile: multiple of 16 (bf16 sublanes), capped at block_b, and shrunk
    # for small batches so the grid has >= 2 steps (2-TC sharding on v7x).
    half = max(16, (((n + 1) // 2 + 15) // 16) * 16)
    tb = max(16, (min(block_b, half) // 16) * 16)
    n_pad = ((n + tb - 1) // tb) * tb

    xf = x.reshape(n, NPIX).astype(jnp.bfloat16)                   # lane-dense pixels
    if n_pad != n:
        xf = jnp.concatenate(
            [xf, jnp.zeros((n_pad - n, NPIX), jnp.bfloat16)], axis=0)

    # Advisory cost hint for XLA's scheduler around the custom call.
    flops_per_sample = (4 * NPIX * L1 * 2                 # conv1 (4 sub-positions)
                        + (6 * 3 + 2 * 2) * ROW * BROW * 2  # banded conv2
                        + BROW * FCPAD * 2)                # FC
    weight_bytes = ((NPIX * 4 * L1 + 3 * ROW * BROW + BROW * FCPAD) * 2
                    + (L1 + BROW + FCPAD) * 4)
    cost = pl.CostEstimate(
        flops=flops_per_sample * n_pad,
        transcendentals=0,
        bytes_accessed=n_pad * (NPIX * 2 + FCPAD * 4) + weight_bytes)

    logits = pl.pallas_call(
        _fused_kernel,
        out_shape=jax.ShapeDtypeStruct((n_pad, FCPAD), jnp.float32),
        grid=(n_pad // tb,),
        in_specs=[
            pl.BlockSpec((tb, NPIX), lambda i: (i, 0)),            # pixels (streamed)
            pl.BlockSpec((NPIX, 4 * L1), lambda i: (0, 0)),        # w1 (resident)
            pl.BlockSpec((1, L1), lambda i: (0, 0)),               # b1
            pl.BlockSpec((3 * ROW, BROW), lambda i: (0, 0)),       # w2 band (resident)
            pl.BlockSpec((1, BROW), lambda i: (0, 0)),             # b2 band
            pl.BlockSpec((BROW, FCPAD), lambda i: (0, 0)),         # fc weight (+1/64)
            pl.BlockSpec((1, FCPAD), lambda i: (0, 0)),            # fc bias (padded)
        ],
        out_specs=pl.BlockSpec((tb, FCPAD), lambda i: (i, 0)),     # lane-dense logits
        compiler_params=pltpu.CompilerParams(
            dimension_semantics=("parallel",),
            vmem_limit_bytes=48 * 1024 * 1024),
        cost_estimate=cost,
    )(xf, w1full, b1full, w2band, b2band, wfcband, bfcband)

    return logits[:n, :NUM_CLASSES]


# ----------------------------------------------------------------------------
# Pure-JAX reference (for correctness check only)
# ----------------------------------------------------------------------------
def reference_forward(x, params):
    c1w, c1b, c2w, c2b, fcw, fcb = params
    dn = ('NCHW', 'OIHW', 'NCHW')
    y = lax.conv_general_dilated(x, c1w, (1, 1), ((1, 1), (1, 1)),
                                 dimension_numbers=dn)
    y = jnp.maximum(y + c1b[None, :, None, None], 0.0)
    N, C, Hh, Ww = y.shape
    y = y.reshape(N, C, Hh // 2, 2, Ww // 2, 2).max(axis=(3, 5))   # MaxPool2d(2)
    y = lax.conv_general_dilated(y, c2w, (1, 1), ((1, 1), (1, 1)),
                                 dimension_numbers=dn)
    y = jnp.maximum(y + c2b[None, :, None, None], 0.0)
    y = jnp.mean(y, axis=(2, 3))                                   # AdaptiveAvgPool2d
    return y @ fcw.T + fcb


def init_params(key):
    ks = jax.random.split(key, 6)
    c1w = jax.random.normal(ks[0], (16, 1, 3, 3), jnp.float32) * 0.1
    c1b = jax.random.normal(ks[1], (16,), jnp.float32) * 0.1
    c2w = jax.random.normal(ks[2], (32, 16, 3, 3), jnp.float32) * 0.1
    c2b = jax.random.normal(ks[3], (32,), jnp.float32) * 0.1
    fcw = jax.random.normal(ks[4], (NUM_CLASSES, 32), jnp.float32) * 0.1
    fcb = jax.random.normal(ks[5], (NUM_CLASSES,), jnp.float32) * 0.1
    return (c1w, c1b, c2w, c2b, fcw, fcb)


if __name__ == "__main__":
    key = jax.random.PRNGKey(0)
    pkey, xkey, xkey2 = jax.random.split(key, 3)
    params = init_params(pkey)

    # Primary check: small batch, module-native NCHW interface.
    x = jax.random.normal(xkey, (2, 1, 16, 16), jnp.float32)
    out = jax.block_until_ready(jax.jit(cnn_kws_forward)(x, params))
    ref = reference_forward(x, params)
    assert out.shape == (2, NUM_CLASSES)
    assert jnp.allclose(out, ref, atol=2e-2, rtol=2e-2), (out, ref)

    # Secondary check: exercises batch padding and a multi-step grid.
    x2 = jax.random.normal(xkey2, (40, 1, 16, 16), jnp.float32)
    out2 = jax.block_until_ready(
        jax.jit(lambda a, p: cnn_kws_forward(a, p, block_b=16))(x2, params))
    ref2 = reference_forward(x2, params)
    assert out2.shape == (40, NUM_CLASSES)
    assert jnp.allclose(out2, ref2, atol=2e-2, rtol=2e-2), (out2, ref2)

    # Tertiary check: default large tile path (multi-step grid at block_b=512).
    x3 = jax.random.normal(xkey2, (300, 1, 16, 16), jnp.float32)
    out3 = jax.block_until_ready(jax.jit(cnn_kws_forward)(x3, params))
    ref3 = reference_forward(x3, params)
    assert out3.shape == (300, NUM_CLASSES)
    assert jnp.allclose(out3, ref3, atol=2e-2, rtol=2e-2), (out3, ref3)

    print("KERNEL_OK")
</pallas_src>

<mosaic_0001>
module attributes {stable_mosaic.version = 11 : i64} {
  func.func @_fused_kernel(%arg0: i32, %arg1: memref<16x256xbf16, #tpu.memory_space<vmem>>, %arg2: memref<256x4096xbf16, #tpu.memory_space<vmem>>, %arg3: memref<1x1024xf32, #tpu.memory_space<vmem>>, %arg4: memref<384x256xbf16, #tpu.memory_space<vmem>>, %arg5: memref<1x256xf32, #tpu.memory_space<vmem>>, %arg6: memref<256x128xbf16, #tpu.memory_space<vmem>>, %arg7: memref<1x128xf32, #tpu.memory_space<vmem>>, %arg8: memref<16x128xf32, #tpu.memory_space<vmem>>) attributes {dimension_semantics = [#tpu.dimension_semantics<parallel>], iteration_bounds = array<i64: 1>, scalar_prefetch = 0 : i64, scratch_operands = 0 : i64, tpu.core_type = #tpu.core_type<tc>, window_params = [{transform_indices = @transform_0, window_bounds = array<i64: 16, 256>}, {pipeline_mode = #tpu.pipeline_mode<synchronous>, transform_indices = @transform_1, window_bounds = array<i64: 256, 4096>}, {pipeline_mode = #tpu.pipeline_mode<synchronous>, transform_indices = @transform_2, window_bounds = array<i64: 1, 1024>}, {pipeline_mode = #tpu.pipeline_mode<synchronous>, transform_indices = @transform_3, window_bounds = array<i64: 384, 256>}, {pipeline_mode = #tpu.pipeline_mode<synchronous>, transform_indices = @transform_4, window_bounds = array<i64: 1, 256>}, {pipeline_mode = #tpu.pipeline_mode<synchronous>, transform_indices = @transform_5, window_bounds = array<i64: 256, 128>}, {pipeline_mode = #tpu.pipeline_mode<synchronous>, transform_indices = @transform_6, window_bounds = array<i64: 1, 128>}, {transform_indices = @transform_7, window_bounds = array<i64: 16, 128>}]} {
    %c0 = arith.constant 0 : index
    %c0_0 = arith.constant 0 : index
    %0 = vector.load %arg1[%c0, %c0_0] : memref<16x256xbf16, #tpu.memory_space<vmem>>, vector<16x256xbf16>
    %c0_1 = arith.constant 0 : index
    %c0_2 = arith.constant 0 : index
    %1 = vector.load %arg2[%c0_1, %c0_2] : memref<256x4096xbf16, #tpu.memory_space<vmem>>, vector<256x1024xbf16>
    %cst = arith.constant dense<0.000000e+00> : vector<16x1024xf32>
    %2 = tpu.matmul %0, %1, %cst {dimension_numbers = #tpu.dot_dimension_numbers<[1], [0], [0], [1], [0, 0, 1, 1], [], []>} : vector<16x256xbf16>, vector<256x1024xbf16>, vector<16x1024xf32> -> vector<16x1024xf32>
    %c0_3 = arith.constant 0 : index
    %c1024 = arith.constant 1024 : index
    %3 = vector.load %arg2[%c0_3, %c1024] : memref<256x4096xbf16, #tpu.memory_space<vmem>>, vector<256x1024xbf16>
    %cst_4 = arith.constant dense<0.000000e+00> : vector<16x1024xf32>
    %4 = tpu.matmul %0, %3, %cst_4 {dimension_numbers = #tpu.dot_dimension_numbers<[1], [0], [0], [1], [0, 0, 1, 1], [], []>} : vector<16x256xbf16>, vector<256x1024xbf16>, vector<16x1024xf32> -> vector<16x1024xf32>
    %5 = arith.maximumf %2, %4 : vector<16x1024xf32>
    %c0_5 = arith.constant 0 : index
    %c2048 = arith.constant 2048 : index
    %6 = vector.load %arg2[%c0_5, %c2048] : memref<256x4096xbf16, #tpu.memory_space<vmem>>, vector<256x1024xbf16>
    %cst_6 = arith.constant dense<0.000000e+00> : vector<16x1024xf32>
    %7 = tpu.matmul %0, %6, %cst_6 {dimension_numbers = #tpu.dot_dimension_numbers<[1], [0], [0], [1], [0, 0, 1, 1], [], []>} : vector<16x256xbf16>, vector<256x1024xbf16>, vector<16x1024xf32> -> vector<16x1024xf32>
    %8 = arith.maximumf %5, %7 : vector<16x1024xf32>
    %c0_7 = arith.constant 0 : index
    %c3072 = arith.constant 3072 : index
    %9 = vector.load %arg2[%c0_7, %c3072] : memref<256x4096xbf16, #tpu.memory_space<vmem>>, vector<256x1024xbf16>
    %cst_8 = arith.constant dense<0.000000e+00> : vector<16x1024xf32>
    %10 = tpu.matmul %0, %9, %cst_8 {dimension_numbers = #tpu.dot_dimension_numbers<[1], [0], [0], [1], [0, 0, 1, 1], [], []>} : vector<16x256xbf16>, vector<256x1024xbf16>, vector<16x1024xf32> -> vector<16x1024xf32>
    %11 = arith.maximumf %8, %10 : vector<16x1024xf32>
    %c0_9 = arith.constant 0 : index
    %c0_10 = arith.constant 0 : index
    %12 = vector.load %arg3[%c0_9, %c0_10] : memref<1x1024xf32, #tpu.memory_space<vmem>>, vector<1x1024xf32>
    %13 = vector.broadcast %12 : vector<1x1024xf32> to vector<16x1024xf32>
    %14 = arith.addf %11, %13 : vector<16x1024xf32>
    %cst_11 = arith.constant 0.000000e+00 : f32
    %15 = vector.broadcast %cst_11 : f32 to vector<16x1024xf32>
    %16 = arith.maximumf %14, %15 : vector<16x1024xf32>
    %17 = arith.truncf %16 : vector<16x1024xf32> to vector<16x1024xbf16>
    %cst_12 = arith.constant 0.000000e+00 : f32
    %18 = vector.broadcast %cst_12 : f32 to vector<16x256xf32>
    %19 = vector.extract_strided_slice %17 {offsets = [0, 0], sizes = [16, 256], strides = [1, 1]} : vector<16x1024xbf16> to vector<16x256xbf16>
    %c128 = arith.constant 128 : index
    %c0_13 = arith.constant 0 : index
    %20 = vector.load %arg4[%c128, %c0_13] : memref<384x256xbf16, #tpu.memory_space<vmem>>, vector<256x256xbf16>
    %cst_14 = arith.constant dense<0.000000e+00> : vector<16x256xf32>
    %21 = tpu.matmul %19, %20, %cst_14 {dimension_numbers = #tpu.dot_dimension_numbers<[1], [0], [0], [1], [0, 0, 1, 1], [], []>} : vector<16x256xbf16>, vector<256x256xbf16>, vector<16x256xf32> -> vector<16x256xf32>
    %c0_15 = arith.constant 0 : index
    %c0_16 = arith.constant 0 : index
    %22 = vector.load %arg5[%c0_15, %c0_16] : memref<1x256xf32, #tpu.memory_space<vmem>>, vector<1x256xf32>
    %23 = vector.broadcast %22 : vector<1x256xf32> to vector<16x256xf32>
    %24 = arith.addf %21, %23 : vector<16x256xf32>
    %cst_17 = arith.constant 0.000000e+00 : f32
    %25 = vector.broadcast %cst_17 : f32 to vector<16x256xf32>
    %26 = arith.maximumf %24, %25 : vector<16x256xf32>
    %27 = arith.addf %18, %26 : vector<16x256xf32>
    %28 = vector.extract_strided_slice %17 {offsets = [0, 0], sizes = [16, 384], strides = [1, 1]} : vector<16x1024xbf16> to vector<16x384xbf16>
    %c0_18 = arith.constant 0 : index
    %c0_19 = arith.constant 0 : index
    %29 = vector.load %arg4[%c0_18, %c0_19] : memref<384x256xbf16, #tpu.memory_space<vmem>>, vector<384x256xbf16>
    %cst_20 = arith.constant dense<0.000000e+00> : vector<16x256xf32>
    %30 = tpu.matmul %28, %29, %cst_20 {dimension_numbers = #tpu.dot_dimension_numbers<[1], [0], [0], [1], [0, 0, 1, 1], [], []>} : vector<16x384xbf16>, vector<384x256xbf16>, vector<16x256xf32> -> vector<16x256xf32>
    %c0_21 = arith.constant 0 : index
    %c0_22 = arith.constant 0 : index
    %31 = vector.load %arg5[%c0_21, %c0_22] : memref<1x256xf32, #tpu.memory_space<vmem>>, vector<1x256xf32>
    %32 = vector.broadcast %31 : vector<1x256xf32> to vector<16x256xf32>
    %33 = arith.addf %30, %32 : vector<16x256xf32>
    %cst_23 = arith.constant 0.000000e+00 : f32
    %34 = vector.broadcast %cst_23 : f32 to vector<16x256xf32>
    %35 = arith.maximumf %33, %34 : vector<16x256xf32>
    %36 = arith.addf %27, %35 : vector<16x256xf32>
    %37 = vector.extract_strided_slice %17 {offsets = [0, 128], sizes = [16, 384], strides = [1, 1]} : vector<16x1024xbf16> to vector<16x384xbf16>
    %c0_24 = arith.constant 0 : index
    %c0_25 = arith.constant 0 : index
    %38 = vector.load %arg4[%c0_24, %c0_25] : memref<384x256xbf16, #tpu.memory_space<vmem>>, vector<384x256xbf16>
    %cst_26 = arith.constant dense<0.000000e+00> : vector<16x256xf32>
    %39 = tpu.matmul %37, %38, %cst_26 {dimension_numbers = #tpu.dot_dimension_numbers<[1], [0], [0], [1], [0, 0, 1, 1], [], []>} : vector<16x384xbf16>, vector<384x256xbf16>, vector<16x256xf32> -> vector<16x256xf32>
    %c0_27 = arith.constant 0 : index
    %c0_28 = arith.constant 0 : index
    %40 = vector.load %arg5[%c0_27, %c0_28] : memref<1x256xf32, #tpu.memory_space<vmem>>, vector<1x256xf32>
    %41 = vector.broadcast %40 : vector<1x256xf32> to vector<16x256xf32>
    %42 = arith.addf %39, %41 : vector<16x256xf32>
    %cst_29 = arith.constant 0.000000e+00 : f32
    %43 = vector.broadcast %cst_29 : f32 to vector<16x256xf32>
    %44 = arith.maximumf %42, %43 : vector<16x256xf32>
    %45 = arith.addf %36, %44 : vector<16x256xf32>
    %46 = vector.extract_strided_slice %17 {offsets = [0, 256], sizes = [16, 384], strides = [1, 1]} : vector<16x1024xbf16> to vector<16x384xbf16>
    %c0_30 = arith.constant 0 : index
    %c0_31 = arith.constant 0 : index
    %47 = vector.load %arg4[%c0_30, %c0_31] : memref<384x256xbf16, #tpu.memory_space<vmem>>, vector<384x256xbf16>
    %cst_32 = arith.constant dense<0.000000e+00> : vector<16x256xf32>
    %48 = tpu.matmul %46, %47, %cst_32 {dimension_numbers = #tpu.dot_dimension_numbers<[1], [0], [0], [1], [0, 0, 1, 1], [], []>} : vector<16x384xbf16>, vector<384x256xbf16>, vector<16x256xf32> -> vector<16x256xf32>
    %c0_33 = arith.constant 0 : index
    %c0_34 = arith.constant 0 : index
    %49 = vector.load %arg5[%c0_33, %c0_34] : memref<1x256xf32, #tpu.memory_space<vmem>>, vector<1x256xf32>
    %50 = vector.broadcast %49 : vector<1x256xf32> to vector<16x256xf32>
    %51 = arith.addf %48, %50 : vector<16x256xf32>
    %cst_35 = arith.constant 0.000000e+00 : f32
    %52 = vector.broadcast %cst_35 : f32 to vector<16x256xf32>
    %53 = arith.maximumf %51, %52 : vector<16x256xf32>
    %54 = arith.addf %45, %53 : vector<16x256xf32>
    %55 = vector.extract_strided_slice %17 {offsets = [0, 384], sizes = [16, 384], strides = [1, 1]} : vector<16x1024xbf16> to vector<16x384xbf16>
    %c0_36 = arith.constant 0 : index
    %c0_37 = arith.constant 0 : index
    %56 = vector.load %arg4[%c0_36, %c0_37] : memref<384x256xbf16, #tpu.memory_space<vmem>>, vector<384x256xbf16>
    %cst_38 = arith.constant dense<0.000000e+00> : vector<16x256xf32>
    %57 = tpu.matmul %55, %56, %cst_38 {dimension_numbers = #tpu.dot_dimension_numbers<[1], [0], [0], [1], [0, 0, 1, 1], [], []>} : vector<16x384xbf16>, vector<384x256xbf16>, vector<16x256xf32> -> vector<16x256xf32>
    %c0_39 = arith.constant 0 : index
    %c0_40 = arith.constant 0 : index
    %58 = vector.load %arg5[%c0_39, %c0_40] : memref<1x256xf32, #tpu.memory_space<vmem>>, vector<1x256xf32>
    %59 = vector.broadcast %58 : vector<1x256xf32> to vector<16x256xf32>
    %60 = arith.addf %57, %59 : vector<16x256xf32>
    %cst_41 = arith.constant 0.000000e+00 : f32
    %61 = vector.broadcast %cst_41 : f32 to vector<16x256xf32>
    %62 = arith.maximumf %60, %61 : vector<16x256xf32>
    %63 = arith.addf %54, %62 : vector<16x256xf32>
    %64 = vector.extract_strided_slice %17 {offsets = [0, 512], sizes = [16, 384], strides = [1, 1]} : vector<16x1024xbf16> to vector<16x384xbf16>
    %c0_42 = arith.constant 0 : index
    %c0_43 = arith.constant 0 : index
    %65 = vector.load %arg4[%c0_42, %c0_43] : memref<384x256xbf16, #tpu.memory_space<vmem>>, vector<384x256xbf16>
    %cst_44 = arith.constant dense<0.000000e+00> : vector<16x256xf32>
    %66 = tpu.matmul %64, %65, %cst_44 {dimension_numbers = #tpu.dot_dimension_numbers<[1], [0], [0], [1], [0, 0, 1, 1], [], []>} : vector<16x384xbf16>, vector<384x256xbf16>, vector<16x256xf32> -> vector<16x256xf32>
    %c0_45 = arith.constant 0 : index
    %c0_46 = arith.constant 0 : index
    %67 = vector.load %arg5[%c0_45, %c0_46] : memref<1x256xf32, #tpu.memory_space<vmem>>, vector<1x256xf32>
    %68 = vector.broadcast %67 : vector<1x256xf32> to vector<16x256xf32>
    %69 = arith.addf %66, %68 : vector<16x256xf32>
    %cst_47 = arith.constant 0.000000e+00 : f32
    %70 = vector.broadcast %cst_47 : f32 to vector<16x256xf32>
    %71 = arith.maximumf %69, %70 : vector<16x256xf32>
    %72 = arith.addf %63, %71 : vector<16x256xf32>
    %73 = vector.extract_strided_slice %17 {offsets = [0, 640], sizes = [16, 384], strides = [1, 1]} : vector<16x1024xbf16> to vector<16x384xbf16>
    %c0_48 = arith.constant 0 : index
    %c0_49 = arith.constant 0 : index
    %74 = vector.load %arg4[%c0_48, %c0_49] : memref<384x256xbf16, #tpu.memory_space<vmem>>, vector<384x256xbf16>
    %cst_50 = arith.constant dense<0.000000e+00> : vector<16x256xf32>
    %75 = tpu.matmul %73, %74, %cst_50 {dimension_numbers = #tpu.dot_dimension_numbers<[1], [0], [0], [1], [0, 0, 1, 1], [], []>} : vector<16x384xbf16>, vector<384x256xbf16>, vector<16x256xf32> -> vector<16x256xf32>
    %c0_51 = arith.constant 0 : index
    %c0_52 = arith.constant 0 : index
    %76 = vector.load %arg5[%c0_51, %c0_52] : memref<1x256xf32, #tpu.memory_space<vmem>>, vector<1x256xf32>
    %77 = vector.broadcast %76 : vector<1x256xf32> to vector<16x256xf32>
    %78 = arith.addf %75, %77 : vector<16x256xf32>
    %cst_53 = arith.constant 0.000000e+00 : f32
    %79 = vector.broadcast %cst_53 : f32 to vector<16x256xf32>
    %80 = arith.maximumf %78, %79 : vector<16x256xf32>
    %81 = arith.addf %72, %80 : vector<16x256xf32>
    %82 = vector.extract_strided_slice %17 {offsets = [0, 768], sizes = [16, 256], strides = [1, 1]} : vector<16x1024xbf16> to vector<16x256xbf16>
    %c0_54 = arith.constant 0 : index
    %c0_55 = arith.constant 0 : index
    %83 = vector.load %arg4[%c0_54, %c0_55] : memref<384x256xbf16, #tpu.memory_space<vmem>>, vector<256x256xbf16>
    %cst_56 = arith.constant dense<0.000000e+00> : vector<16x256xf32>
    %84 = tpu.matmul %82, %83, %cst_56 {dimension_numbers = #tpu.dot_dimension_numbers<[1], [0], [0], [1], [0, 0, 1, 1], [], []>} : vector<16x256xbf16>, vector<256x256xbf16>, vector<16x256xf32> -> vector<16x256xf32>
    %c0_57 = arith.constant 0 : index
    %c0_58 = arith.constant 0 : index
    %85 = vector.load %arg5[%c0_57, %c0_58] : memref<1x256xf32, #tpu.memory_space<vmem>>, vector<1x256xf32>
    %86 = vector.broadcast %85 : vector<1x256xf32> to vector<16x256xf32>
    %87 = arith.addf %84, %86 : vector<16x256xf32>
    %cst_59 = arith.constant 0.000000e+00 : f32
    %88 = vector.broadcast %cst_59 : f32 to vector<16x256xf32>
    %89 = arith.maximumf %87, %88 : vector<16x256xf32>
    %90 = arith.addf %81, %89 : vector<16x256xf32>
    %91 = arith.truncf %90 : vector<16x256xf32> to vector<16x256xbf16>
    %c0_60 = arith.constant 0 : index
    %c0_61 = arith.constant 0 : index
    %92 = vector.load %arg6[%c0_60, %c0_61] : memref<256x128xbf16, #tpu.memory_space<vmem>>, vector<256x128xbf16>
    %cst_62 = arith.constant dense<0.000000e+00> : vector<16x128xf32>
    %93 = tpu.matmul %91, %92, %cst_62 {dimension_numbers = #tpu.dot_dimension_numbers<[1], [0], [0], [1], [0, 0, 1, 1], [], []>} : vector<16x256xbf16>, vector<256x128xbf16>, vector<16x128xf32> -> vector<16x128xf32>
    %c0_63 = arith.constant 0 : index
    %c0_64 = arith.constant 0 : index
    %94 = vector.load %arg7[%c0_63, %c0_64] : memref<1x128xf32, #tpu.memory_space<vmem>>, vector<1x128xf32>
    %95 = vector.broadcast %94 : vector<1x128xf32> to vector<16x128xf32>
    %96 = arith.addf %93, %95 : vector<16x128xf32>
    %c0_65 = arith.constant 0 : index
    %c0_66 = arith.constant 0 : index
    %97 = vector.load %arg8[%c0_65, %c0_66] : memref<16x128xf32, #tpu.memory_space<vmem>>, vector<16x128xf32>
    tpu.vector_store %arg8[%c0_65, %c0_66], %96 {strides = array<i32>} : memref<16x128xf32, #tpu.memory_space<vmem>>, vector<16x128xf32>,
    return
  }
  func.func @transform_0(%arg0: i32) -> (i32, i32) {
    %c0_i32 = arith.constant 0 : i32
    %c0_i32_0 = arith.constant 0 : i32
    return %arg0, %c0_i32 : i32, i32
  }
  func.func @transform_1(%arg0: i32) -> (i32, i32) {
    %c0_i32 = arith.constant 0 : i32
    %c0_i32_0 = arith.constant 0 : i32
    %c0_i32_1 = arith.constant 0 : i32
    return %c0_i32, %c0_i32_0 : i32, i32
  }
  func.func @transform_2(%arg0: i32) -> (i32, i32) {
    %c0_i32 = arith.constant 0 : i32
    %c0_i32_0 = arith.constant 0 : i32
    %c0_i32_1 = arith.constant 0 : i32
    return %c0_i32, %c0_i32_0 : i32, i32
  }
  func.func @transform_3(%arg0: i32) -> (i32, i32) {
    %c0_i32 = arith.constant 0 : i32
    %c0_i32_0 = arith.constant 0 : i32
    %c0_i32_1 = arith.constant 0 : i32
    return %c0_i32, %c0_i32_0 : i32, i32
  }
  func.func @transform_4(%arg0: i32) -> (i32, i32) {
    %c0_i32 = arith.constant 0 : i32
    %c0_i32_0 = arith.constant 0 : i32
    %c0_i32_1 = arith.constant 0 : i32
    return %c0_i32, %c0_i32_0 : i32, i32
  }
  func.func @transform_5(%arg0: i32) -> (i32, i32) {
    %c0_i32 = arith.constant 0 : i32
    %c0_i32_0 = arith.constant 0 : i32
    %c0_i32_1 = arith.constant 0 : i32
    return %c0_i32, %c0_i32_0 : i32, i32
  }
  func.func @transform_6(%arg0: i32) -> (i32, i32) {
    %c0_i32 = arith.constant 0 : i32
    %c0_i32_0 = arith.constant 0 : i32
    %c0_i32_1 = arith.constant 0 : i32
    return %c0_i32, %c0_i32_0 : i32, i32
  }
  func.func @transform_7(%arg0: i32) -> (i32, i32) {
    %c0_i32 = arith.constant 0 : i32
    %c0_i32_0 = arith.constant 0 : i32
    return %arg0, %c0_i32 : i32, i32
  }
}

</mosaic_0001>

<bundles_post_ra>
// kernel: tile.18
= control target key start
LH: loop header
LB: loop body
LE: loop exit
PB: predicated region body
PF: predicated region fallthrough
CT: control target
= control target key end

     0   :  { %s64_s0 = inlined_call_operand.vmem [shape: f32[16], index: 0, kind: input, shape index: {}]   ;;  %s65_s1 = inlined_call_operand.vmem [shape: f32[64,16], index: 1, kind: output, shape index: {}]  }
   0x1   :  { %v4_v0 = vld [vmem:[%s64_s0] ss:$0 sm:$0xff] }
   0x2   :  { %5 = vst [vmem:[%s65_s1] sm:$0xff] %v4_v0 }
   0x3   :  { %20 = vst [vmem:[%s65_s1 + $0x8] sm:$0xff] %v4_v0 }
   0x4   :  { %21 = vst [vmem:[%s65_s1 + $0x10] sm:$0xff] %v4_v0 }
   0x5   :  { %22 = vst [vmem:[%s65_s1 + $0x18] sm:$0xff] %v4_v0 }
   0x6   :  { %23 = vst [vmem:[%s65_s1 + $0x20] sm:$0xff] %v4_v0 }
   0x7   :  { %24 = vst [vmem:[%s65_s1 + $0x28] sm:$0xff] %v4_v0 }
   0x8   :  { %25 = vst [vmem:[%s65_s1 + $0x30] sm:$0xff] %v4_v0 }
   0x9   :  { %26 = vst [vmem:[%s65_s1 + $0x38] sm:$0xff] %v4_v0 }

// kernel: tile.19
= control target key start
LH: loop header
LB: loop body
LE: loop exit
PB: predicated region body
PF: predicated region fallthrough
CT: control target
= control target key end

     0   :  { %vm4_vm0 = vcmask 1047556   ;;  %s162_s14 = smov 112   ;;  %s163_s15 = smov 80   ;;  %vm6_vm1 = vcmask 130048   ;;  %vm17_vm2 = vcmask 1048448   ;;  %vm28_vm3 = vcmask 917248   ;;  %s259_s0 = inlined_call_operand.vmem [shape: f32[64,16], index: 0, kind: input, shape index: {}]   ;;  %s260_s1 = inlined_call_operand.vmem [shape: f32[1,1024], index: 1, kind: output, shape index: {}]  }
   0x1   :  { %v134_v0 = vld [vmem:[%s259_s0 + $0x7] ss:$8 sm:$0xf]   ;;  %v138_v2 = vld [vmem:[%s259_s0 + $0x5] ss:$8 sm:$0xf]  }
   0x2   :  { %v135_v1 = vld [vmem:[%s259_s0 + $0x7] ss:$8 sm:$0xf0]   ;;  %v139_v4 = vld [vmem:[%s259_s0 + $0x5] ss:$8 sm:$0xf0]  }
   0x3   :  { %v14_v3 = vsel %vm4_vm0, %v135_v1, %v134_v0  ;;  %v36_v5 = vsel %vm4_vm0, %v139_v4, %v138_v2  ;;  %v136_v6 = vld [vmem:[%s259_s0 + $0x6] ss:$8 sm:$0xf]   ;;  %v140_v8 = vld [vmem:[%s259_s0 + $0x4] ss:$8 sm:$0xf]  }
   0x4   :  { %15 = vrot.lane.b32.xlu0 %v14_v3, %s162_s14  ;;  %37 = vrot.lane.b32.xlu1 %v36_v5, %s163_s15  ;;  %v137_v7 = vld [vmem:[%s259_s0 + $0x6] ss:$8 sm:$0xf0]   ;;  %v141_v9 = vld [vmem:[%s259_s0 + $0x4] ss:$8 sm:$0xf0]  }
   0x5   :  { %v142_v10 = vld [vmem:[%s259_s0 + $0x3] ss:$8 sm:$0xf]   ;;  %v25_v12 = vsel %vm4_vm0, %v137_v7, %v136_v6  ;;  %v47_v14 = vsel %vm4_vm0, %v141_v9, %v140_v8  ;;  %s164_s28 = smov 48   ;;  %s165_s29 = smov 96   ;;  %vm39_vm4 = vcmask 786048  }
   0x6   :  { %v143_v11 = vld [vmem:[%s259_s0 + $0x3] ss:$8 sm:$0xf0]   ;;  %v144_v15 = vld [vmem:[%s259_s0 + $0x2] ss:$8 sm:$0xf]  }
   0x7   :  { %v58_v13 = vsel %vm4_vm0, %v143_v11, %v142_v10  ;;  %v145_v16 = vld [vmem:[%s259_s0 + $0x2] ss:$8 sm:$0xf0]   ;;  %s166_s5 = smov 64   ;;  %s167_s10 = smov 32   ;;  %vm50_vm5 = vcmask 654848  }
   0x8   :  { %59 = vrot.lane.b32.xlu2 %v58_v13, %s164_s28  ;;  %v146_v17 = vld [vmem:[%s259_s0 + $0x1] ss:$8 sm:$0xf]   ;;  %v69_v19 = vsel %vm4_vm0, %v145_v16, %v144_v15  ;;  %s168_s11 = smov 16   ;;  %vm61_vm6 = vcmask 523648   ;;  %vm72_vm7 = vcmask 392448  }
   0x9   :  { %v147_v18 = vld [vmem:[%s259_s0 + $0x1] ss:$8 sm:$0xf0]   ;;  %v2_v21 = vld [vmem:[%s259_s0] ss:$8 sm:$0xf]  }
   0xa   :  { %v80_v20 = vsel %vm4_vm0, %v147_v18, %v146_v17  ;;  %v3_v22 = vld [vmem:[%s259_s0] ss:$8 sm:$0xf0]   ;;  %vm83_vm8 = vcmask 261248  }
   0xb   :  { %v5_v23 = vsel %vm4_vm0, %v3_v22, %v2_v21 }
   0xc   :  { %26 = vrot.lane.b32.xlu0 %v25_v12, %s165_s29  ;;  %48 = vrot.lane.b32.xlu1 %v47_v14, %s166_s5  ;;  %7 = vst.msk [vmem:[#allocation0] ss:$8 sm:$0xf] %vm6_vm1, %v5_v23  }
   0xd   :  { %8 = vst.msk [vmem:[#allocation0] ss:$8 sm:$0xf0] %vm6_vm1, %v5_v23  }
  0x10   :  { %70 = vrot.lane.b32.xlu2 %v69_v19, %s167_s10 }
  0x14   :  { %81 = vrot.lane.b32.xlu0 %v80_v20, %s168_s11 }
  0x62   :  { %v60_v24 = vpop.permute.xlu2 %59  }
  0x6a   :  { %v71_v25 = vpop.permute.xlu2 %70  }
  0x76   :  { %v16_v26 = vpop.permute.xlu0 %15   ;;  %v38_v27 = vpop.permute.xlu1 %37  }
  0x77   :  { %18 = vst.msk [vmem:[#allocation0] ss:$8 sm:$0xf] %vm17_vm2, %v16_v26  }
  0x78   :  { %19 = vst.msk [vmem:[#allocation0] ss:$8 sm:$0xf0] %vm17_vm2, %v16_v26  }
  0x7e   :  { %v27_v28 = vpop.permute.xlu0 %26   ;;  %v49_v29 = vpop.permute.xlu1 %48  }
  0x7f   :  { %29 = vst.msk [vmem:[#allocation0] ss:$8 sm:$0xf] %vm28_vm3, %v27_v28  }
  0x80   :  { %30 = vst.msk [vmem:[#allocation0] ss:$8 sm:$0xf0] %vm28_vm3, %v27_v28  }
  0x81   :  { %40 = vst.msk [vmem:[#allocation0] ss:$8 sm:$0xf] %vm39_vm4, %v38_v27  }
  0x82   :  { %41 = vst.msk [vmem:[#allocation0] ss:$8 sm:$0xf0] %vm39_vm4, %v38_v27  }
  0x83   :  { %51 = vst.msk [vmem:[#allocation0] ss:$8 sm:$0xf] %vm50_vm5, %v49_v29  }
  0x84   :  { %52 = vst.msk [vmem:[#allocation0] ss:$8 sm:$0xf0] %vm50_vm5, %v49_v29  }
  0x85   :  { %62 = vst.msk [vmem:[#allocation0] ss:$8 sm:$0xf] %vm61_vm6, %v60_v24  }
  0x86   :  { %63 = vst.msk [vmem:[#allocation0] ss:$8 sm:$0xf0] %vm61_vm6, %v60_v24   ;;  %v82_v30 = vpop.permute.xlu0 %81  }
  0x87   :  { %73 = vst.msk [vmem:[#allocation0] ss:$8 sm:$0xf] %vm72_vm7, %v71_v25  }
  0x88   :  { %74 = vst.msk [vmem:[#allocation0] ss:$8 sm:$0xf0] %vm72_vm7, %v71_v25  }
  0x89   :  { %84 = vst.msk [vmem:[#allocation0] ss:$8 sm:$0xf] %vm83_vm8, %v82_v30  }
  0x8a   :  { %85 = vst.msk [vmem:[#allocation0] ss:$8 sm:$0xf0] %vm83_vm8, %v82_v30  }
  0x90   :  { %v88_v31 = vld [vmem:[#allocation0] sm:$0x1]  ;;  %v93_v32 = vld [vmem:[#allocation0 + $0x8] sm:$0x1]  ;;  %v99_v33 = vld [vmem:[#allocation0 + $0x10] sm:$0x1] }
  0x91   :  { %91 = vst [vmem:[%s260_s1] sm:$0x1] %v88_v31  ;;  %v105_v34 = vld [vmem:[#allocation0 + $0x18] sm:$0x1]  ;;  %v111_v35 = vld [vmem:[#allocation0 + $0x20] sm:$0x1] }
  0x92   :  { %148 = vst [vmem:[%s260_s1 + $0x1] sm:$0x1] %v93_v32  ;;  %v117_v36 = vld [vmem:[#allocation0 + $0x28] sm:$0x1]  ;;  %v123_v37 = vld [vmem:[#allocation0 + $0x30] sm:$0x1] }
  0x93   :  { %149 = vst [vmem:[%s260_s1 + $0x2] sm:$0x1] %v99_v33  ;;  %v129_v38 = vld [vmem:[#allocation0 + $0x38] sm:$0x1] }
  0x94   :  { %150 = vst [vmem:[%s260_s1 + $0x3] sm:$0x1] %v105_v34 }
  0x95   :  { %151 = vst [vmem:[%s260_s1 + $0x4] sm:$0x1] %v111_v35 }
  0x96   :  { %152 = vst [vmem:[%s260_s1 + $0x5] sm:$0x1] %v117_v36 }
  0x97   :  { %153 = vst [vmem:[%s260_s1 + $0x6] sm:$0x1] %v123_v37 }
  0x98   :  { %154 = vst [vmem:[%s260_s1 + $0x7] sm:$0x1] %v129_v38 }

// kernel: tile.23
= control target key start
LH: loop header
LB: loop body
LE: loop exit
PB: predicated region body
PF: predicated region fallthrough
CT: control target
= control target key end

     0   :  { %s22_s0 = inlined_call_operand.vmem [shape: f32[32], index: 0, kind: input, shape index: {}]   ;;  %s23_s1 = inlined_call_operand.vmem [shape: f32[8,32], index: 1, kind: output, shape index: {}]  }
   0x1   :  { %v4_v0 = vld [vmem:[%s22_s0] ss:$0 sm:$0xff] }
   0x2   :  { %5 = vst [vmem:[%s23_s1] sm:$0xff] %v4_v0 }

// kernel: tile.24
= control target key start
LH: loop header
LB: loop body
LE: loop exit
PB: predicated region body
PF: predicated region fallthrough
CT: control target
= control target key end

     0   :  { %s7_s6 = smov 3  ;;  %s46_s9 = smov 96   ;;  %vm4_vm0 = vcmask 261120   ;;  %vm11_vm1 = vcmask 1048320   ;;  %vm18_vm2 = vcmask 785920   ;;  %vm25_vm3 = vcmask 523520   ;;  %s77_s0 = inlined_call_operand.vmem [shape: f32[8,32], index: 0, kind: input, shape index: {}]   ;;  %s78_s1 = inlined_call_operand.vmem [shape: f32[1,256], index: 1, kind: output, shape index: {}]  }
   0x1   :  { %v39_v0 = vld [vmem:[%s77_s0 + $0x3] ss:$4 sm:%s7_s6]   ;;  %s21_s10 = smov 3  ;;  %s14_s13 = smov 3 }
   0x2   :  { %9 = vrot.lane.b32.xlu0 %v39_v0, %s46_s9  ;;  %v41_v1 = vld [vmem:[%s77_s0 + $0x1] ss:$4 sm:%s21_s10]   ;;  %s47_s14 = smov 32   ;;  %s48_s17 = smov 64  }
   0x3   :  { %23 = vrot.lane.b32.xlu1 %v41_v1, %s47_s14  ;;  %v40_v2 = vld [vmem:[%s77_s0 + $0x2] ss:$4 sm:%s14_s13]   ;;  %s2_s18 = smov 3 }
   0x4   :  { %v3_v3 = vld [vmem:[%s77_s0] ss:$4 sm:%s2_s18]  }
   0x5   :  { %5 = vst.msk [vmem:[#allocation0] ss:$8 sm:$0x3] %vm4_vm0, %v3_v3  }
   0xa   :  { %16 = vrot.lane.b32.xlu0 %v40_v2, %s48_s17 }
  0x74   :  { %v10_v4 = vpop.permute.xlu0 %9  }
  0x75   :  { %12 = vst.msk [vmem:[#allocation0] ss:$8 sm:$0x3] %vm11_vm1, %v10_v4   ;;  %v24_v5 = vpop.permute.xlu1 %23  }
  0x7c   :  { %v17_v6 = vpop.permute.xlu0 %16  }
  0x7d   :  { %19 = vst.msk [vmem:[#allocation0] ss:$8 sm:$0x3] %vm18_vm2, %v17_v6  }
  0x7e   :  { %26 = vst.msk [vmem:[#allocation0] ss:$8 sm:$0x3] %vm25_vm3, %v24_v5  }
  0x85   :  { %v29_v7 = vld [vmem:[#allocation0] sm:$0x1]  ;;  %v34_v8 = vld [vmem:[#allocation0 + $0x8] sm:$0x1] }
  0x86   :  { %32 = vst [vmem:[%s78_s1] sm:$0x1] %v29_v7 }
  0x87   :  { %42 = vst [vmem:[%s78_s1 + $0x1] sm:$0x1] %v34_v8 }

// kernel: cnn_kws_forward.1
= control target key start
LH: loop header
LB: loop body
LE: loop exit
PB: predicated region body
PF: predicated region fallthrough
CT: control target
= control target key end

     0   :  { %s13155_s1 = inlined_call_operand.vmem [shape: bf16[256,4096], index: 1, kind: input, shape index: {}]   ;;  %s13156_s0 = inlined_call_operand.vmem [shape: bf16[16,256], index: 0, kind: input, shape index: {}]   ;;  %s13157_s3 = inlined_call_operand.vmem [shape: bf16[384,256], index: 3, kind: input, shape index: {}]   ;;  %s13158_s2 = inlined_call_operand.vmem [shape: f32[1,1024], index: 2, kind: input, shape index: {}]   ;;  %s13159_s4 = inlined_call_operand.vmem [shape: f32[1,256], index: 4, kind: input, shape index: {}]   ;;  %s13160_s6 = inlined_call_operand.vmem [shape: f32[1,128], index: 6, kind: input, shape index: {}]   ;;  %s13161_s5 = inlined_call_operand.vmem [shape: bf16[256,128], index: 5, kind: input, shape index: {}]   ;;  %s13162_s7 = inlined_call_operand.vmem [shape: f32[16,128], index: 7, kind: output, shape index: {}]  }
   0x1   :  { %v5720_v0 = vld [vmem:[%s13155_s1 + $0x700] sm:$0xf]  ;;  %v7984_v5 = vld [vmem:[%s13155_s1 + $0x704] sm:$0xf] }
   0x2   :  { %v7988_v1 = vld [vmem:[%s13155_s1 + $0x77c] sm:$0xf0]  ;;  %v5722_v6 = vld [vmem:[%s13155_s1 + $0x780] sm:$0xf0] }
   0x3   :  { %v5976_v2 = vld [vmem:[%s13155_s1 + $0xf00] sm:$0xf]  ;;  %v5721_v3 = vor.u32 %v7988_v1, %v5720_v0  ;;  %v5725_v8 = vor.u32 %v7984_v5, %v5722_v6  ;;  %v8048_v9 = vld [vmem:[%s13155_s1 + $0xf04] sm:$0xf] }
   0x4   :  { %v8052_v4 = vld [vmem:[%s13155_s1 + $0xf7c] sm:$0xf0]  ;;  %v5978_v10 = vld [vmem:[%s13155_s1 + $0xf80] sm:$0xf0] }
   0x5   :  { %v5977_v7 = vor.u32 %v8052_v4, %v5976_v2  ;;  %v5688_v11 = vld [vmem:[%s13155_s1 + $0x600] sm:$0xf]  ;;  %806 = vmatpush.bf16.msra.mxu0 %v5721_v3  ;;  %v5981_v12 = vor.u32 %v8048_v9, %v5978_v10  ;;  %834 = vmatpush.bf16.msra.mxu2 %v5725_v8  ;;  %v7976_v18 = vld [vmem:[%s13155_s1 + $0x604] sm:$0xf] }
   0x6   :  { %v7980_v13 = vld [vmem:[%s13155_s1 + $0x67c] sm:$0xf0]  ;;  %v5690_v19 = vld [vmem:[%s13155_s1 + $0x680] sm:$0xf0] }
   0x7   :  { %v5944_v14 = vld [vmem:[%s13155_s1 + $0xe00] sm:$0xf]  ;;  %820 = vmatpush.bf16.msra.mxu1 %v5977_v7  ;;  %v5689_v16 = vor.u32 %v7980_v13, %v5688_v11  ;;  %v8040_v20 = vld [vmem:[%s13155_s1 + $0xe04] sm:$0xf]  ;;  %848 = vmatpush.bf16.msra.mxu3 %v5981_v12  ;;  %v5693_v21 = vor.u32 %v7976_v18, %v5690_v19 }
   0x8   :  { %v8044_v15 = vld [vmem:[%s13155_s1 + $0xe7c] sm:$0xf0]  ;;  %v5946_v22 = vld [vmem:[%s13155_s1 + $0xe80] sm:$0xf0] }
   0x9   :  { %v5945_v17 = vor.u32 %v8044_v15, %v5944_v14  ;;  %v5656_v23 = vld [vmem:[%s13155_s1 + $0x500] sm:$0xf]  ;;  %v5949_v25 = vor.u32 %v8040_v20, %v5946_v22  ;;  %v7968_v28 = vld [vmem:[%s13155_s1 + $0x504] sm:$0xf]  ;;  %807 = vmatpush.bf16.msra.mxu0 %v5689_v16  ;;  %835 = vmatpush.bf16.msra.mxu2 %v5693_v21 }
   0xa   :  { %v7972_v24 = vld [vmem:[%s13155_s1 + $0x57c] sm:$0xf0]  ;;  %v5658_v30 = vld [vmem:[%s13155_s1 + $0x580] sm:$0xf0] }
   0xb   :  { %v5912_v26 = vld [vmem:[%s13155_s1 + $0xd00] sm:$0xf]  ;;  %v5657_v29 = vor.u32 %v7972_v24, %v5656_v23  ;;  %v8032_v31 = vld [vmem:[%s13155_s1 + $0xd04] sm:$0xf]  ;;  %821 = vmatpush.bf16.msra.mxu1 %v5945_v17  ;;  %v5661_v34 = vor.u32 %v7968_v28, %v5658_v30  ;;  %849 = vmatpush.bf16.msra.mxu3 %v5949_v25  ;;  %v5728_v28 = vld [vmem:[%s13155_s1 + $0x708] sm:$0xf] }
   0xc   :  { %v8036_v27 = vld [vmem:[%s13155_s1 + $0xd7c] sm:$0xf0]  ;;  %v5914_v32 = vld [vmem:[%s13155_s1 + $0xd80] sm:$0xf0]  ;;  %v5984_v30 = vld [vmem:[%s13155_s1 + $0xf08] sm:$0xf] }
   0xd   :  { %v5913_v33 = vor.u32 %v8036_v27, %v5912_v26  ;;  %v5624_v35 = vld [vmem:[%s13155_s1 + $0x400] sm:$0xf]  ;;  %v5917_v38 = vor.u32 %v8032_v31, %v5914_v32  ;;  %v7960_v40 = vld [vmem:[%s13155_s1 + $0x404] sm:$0xf]  ;;  %808 = vmatpush.bf16.msra.mxu0 %v5657_v29  ;;  %836 = vmatpush.bf16.msra.mxu2 %v5661_v34  ;;  %v7989_v29 = vld [vmem:[%s13155_s1 + $0x784] sm:$0xf0] }
   0xe   :  { %v7964_v36 = vld [vmem:[%s13155_s1 + $0x47c] sm:$0xf0]  ;;  %v5626_v41 = vld [vmem:[%s13155_s1 + $0x480] sm:$0xf0]  ;;  %v8053_v32 = vld [vmem:[%s13155_s1 + $0xf84] sm:$0xf0] }
   0xf   :  { %v5880_v37 = vld [vmem:[%s13155_s1 + $0xc00] sm:$0xf]  ;;  %v8024_v42 = vld [vmem:[%s13155_s1 + $0xc04] sm:$0xf]  ;;  %v5625_v44 = vor.u32 %v7964_v36, %v5624_v35  ;;  %822 = vmatpush.bf16.msra.mxu1 %v5913_v33  ;;  %v5629_v46 = vor.u32 %v7960_v40, %v5626_v41  ;;  %850 = vmatpush.bf16.msra.mxu3 %v5917_v38  ;;  %v7985_v33 = vld [vmem:[%s13155_s1 + $0x70c] sm:$0xf]  ;;  %v5729_v40 = vor.u32 %v7989_v29, %v5728_v28 }
  0x10   :  { %v8028_v39 = vld [vmem:[%s13155_s1 + $0xc7c] sm:$0xf0]  ;;  %v5882_v43 = vld [vmem:[%s13155_s1 + $0xc80] sm:$0xf0]  ;;  %v5730_v34 = vld [vmem:[%s13155_s1 + $0x788] sm:$0xf0]  ;;  %v5985_v41 = vor.u32 %v8053_v32, %v5984_v30 }
  0x11   :  { %v5881_v45 = vor.u32 %v8028_v39, %v5880_v37  ;;  %v5592_v47 = vld [vmem:[%s13155_s1 + $0x300] sm:$0xf]  ;;  %v5885_v50 = vor.u32 %v8024_v42, %v5882_v43  ;;  %v7952_v52 = vld [vmem:[%s13155_s1 + $0x304] sm:$0xf]  ;;  %809 = vmatpush.bf16.msra.mxu0 %v5625_v44  ;;  %837 = vmatpush.bf16.msra.mxu2 %v5629_v46  ;;  %v8049_v37 = vld [vmem:[%s13155_s1 + $0xf0c] sm:$0xf]  ;;  %v5733_v42 = vor.u32 %v7985_v33, %v5730_v34 }
  0x12   :  { %v7956_v48 = vld [vmem:[%s13155_s1 + $0x37c] sm:$0xf0]  ;;  %v5594_v53 = vld [vmem:[%s13155_s1 + $0x380] sm:$0xf0]  ;;  %v5986_v38 = vld [vmem:[%s13155_s1 + $0xf88] sm:$0xf0] }
  0x13   :  { %v5848_v49 = vld [vmem:[%s13155_s1 + $0xb00] sm:$0xf]  ;;  %v8016_v54 = vld [vmem:[%s13155_s1 + $0xb04] sm:$0xf]  ;;  %v5593_v56 = vor.u32 %v7956_v48, %v5592_v47  ;;  %823 = vmatpush.bf16.msra.mxu1 %v5881_v45  ;;  %v5597_v58 = vor.u32 %v7952_v52, %v5594_v53  ;;  %851 = vmatpush.bf16.msra.mxu3 %v5885_v50  ;;  %v5696_v43 = vld [vmem:[%s13155_s1 + $0x608] sm:$0xf]  ;;  %v5989_v46 = vor.u32 %v8049_v37, %v5986_v38 }
  0x14   :  { %v8020_v51 = vld [vmem:[%s13155_s1 + $0xb7c] sm:$0xf0]  ;;  %v5850_v55 = vld [vmem:[%s13155_s1 + $0xb80] sm:$0xf0]  ;;  %v7981_v44 = vld [vmem:[%s13155_s1 + $0x684] sm:$0xf0] }
  0x15   :  { %v5849_v57 = vor.u32 %v8020_v51, %v5848_v49  ;;  %v5560_v59 = vld [vmem:[%s13155_s1 + $0x200] sm:$0xf]  ;;  %v5853_v62 = vor.u32 %v8016_v54, %v5850_v55  ;;  %v7944_v0 = vld [vmem:[%s13155_s1 + $0x204] sm:$0xf]  ;;  %810 = vmatpush.bf16.msra.mxu0 %v5593_v56  ;;  %838 = vmatpush.bf16.msra.mxu2 %v5597_v58  ;;  %v5952_v45 = vld [vmem:[%s13155_s1 + $0xe08] sm:$0xf]  ;;  %v5697_v52 = vor.u32 %v7981_v44, %v5696_v43 }
  0x16   :  { %v7948_v60 = vld [vmem:[%s13155_s1 + $0x27c] sm:$0xf0]  ;;  %v5562_v1 = vld [vmem:[%s13155_s1 + $0x280] sm:$0xf0]  ;;  %v8045_v47 = vld [vmem:[%s13155_s1 + $0xe84] sm:$0xf0] }
  0x17   :  { %v5816_v61 = vld [vmem:[%s13155_s1 + $0xa00] sm:$0xf]  ;;  %v8008_v2 = vld [vmem:[%s13155_s1 + $0xa04] sm:$0xf]  ;;  %v5561_v4 = vor.u32 %v7948_v60, %v5560_v59  ;;  %824 = vmatpush.bf16.msra.mxu1 %v5849_v57  ;;  %v5565_v6 = vor.u32 %v7944_v0, %v5562_v1  ;;  %852 = vmatpush.bf16.msra.mxu3 %v5853_v62  ;;  %v7977_v48 = vld [vmem:[%s13155_s1 + $0x60c] sm:$0xf]  ;;  %v5953_v53 = vor.u32 %v8045_v47, %v5952_v45 }
  0x18   :  { %v8012_v63 = vld [vmem:[%s13155_s1 + $0xa7c] sm:$0xf0]  ;;  %v5818_v3 = vld [vmem:[%s13155_s1 + $0xa80] sm:$0xf0]  ;;  %v5698_v49 = vld [vmem:[%s13155_s1 + $0x688] sm:$0xf0] }
  0x19   :  { %v5817_v5 = vor.u32 %v8012_v63, %v5816_v61  ;;  %v5528_v7 = vld [vmem:[%s13155_s1 + $0x100] sm:$0xf]  ;;  %v5821_v10 = vor.u32 %v8008_v2, %v5818_v3  ;;  %v7936_v12 = vld [vmem:[%s13155_s1 + $0x104] sm:$0xf]  ;;  %811 = vmatpush.bf16.msra.mxu0 %v5561_v4  ;;  %839 = vmatpush.bf16.msra.mxu2 %v5565_v6  ;;  %v8041_v50 = vld [vmem:[%s13155_s1 + $0xe0c] sm:$0xf]  ;;  %v5701_v54 = vor.u32 %v7977_v48, %v5698_v49 }
  0x1a   :  { %v7940_v8 = vld [vmem:[%s13155_s1 + $0x17c] sm:$0xf0]  ;;  %v5530_v13 = vld [vmem:[%s13155_s1 + $0x180] sm:$0xf0]  ;;  %v5954_v51 = vld [vmem:[%s13155_s1 + $0xe88] sm:$0xf0] }
  0x1b   :  { %v5784_v9 = vld [vmem:[%s13155_s1 + $0x900] sm:$0xf]  ;;  %v8000_v14 = vld [vmem:[%s13155_s1 + $0x904] sm:$0xf]  ;;  %v5529_v16 = vor.u32 %v7940_v8, %v5528_v7  ;;  %825 = vmatpush.bf16.msra.mxu1 %v5817_v5  ;;  %v5533_v20 = vor.u32 %v7936_v12, %v5530_v13  ;;  %853 = vmatpush.bf16.msra.mxu3 %v5821_v10  ;;  %v5664_v55 = vld [vmem:[%s13155_s1 + $0x508] sm:$0xf]  ;;  %v5957_v58 = vor.u32 %v8041_v50, %v5954_v51 }
  0x1c   :  { %v8004_v11 = vld [vmem:[%s13155_s1 + $0x97c] sm:$0xf0]  ;;  %v5786_v15 = vld [vmem:[%s13155_s1 + $0x980] sm:$0xf0]  ;;  %v7973_v56 = vld [vmem:[%s13155_s1 + $0x584] sm:$0xf0] }
  0x1d   :  { %v5496_v17 = vld [vmem:[%s13155_s1] sm:$0xf]  ;;  %v5785_v19 = vor.u32 %v8004_v11, %v5784_v9  ;;  %v7928_v23 = vld [vmem:[%s13155_s1 + $0x4] sm:$0xf]  ;;  %v5789_v24 = vor.u32 %v8000_v14, %v5786_v15  ;;  %812 = vmatpush.bf16.msra.mxu0 %v5529_v16  ;;  %840 = vmatpush.bf16.msra.mxu2 %v5533_v20  ;;  %v5920_v57 = vld [vmem:[%s13155_s1 + $0xd08] sm:$0xf]  ;;  %v5665_v1 = vor.u32 %v7973_v56, %v5664_v55 }
  0x1e   :  { %v7932_v18 = vld [vmem:[%s13155_s1 + $0x7c] sm:$0xf0]  ;;  %v5498_v25 = vld [vmem:[%s13155_s1 + $0x80] sm:$0xf0]  ;;  %v8037_v59 = vld [vmem:[%s13155_s1 + $0xd84] sm:$0xf0] }
  0x1f   :  { %v5752_v21 = vld [vmem:[%s13155_s1 + $0x800] sm:$0xf]  ;;  %v7992_v26 = vld [vmem:[%s13155_s1 + $0x804] sm:$0xf]  ;;  %v5497_v31 = vor.u32 %v7932_v18, %v5496_v17  ;;  %826 = vmatpush.bf16.msra.mxu1 %v5785_v19  ;;  %v5501_v36 = vor.u32 %v7928_v23, %v5498_v25  ;;  %854 = vmatpush.bf16.msra.mxu3 %v5789_v24  ;;  %v7969_v60 = vld [vmem:[%s13155_s1 + $0x50c] sm:$0xf]  ;;  %v5921_v5 = vor.u32 %v8037_v59, %v5920_v57 }
  0x20   :  { %v7996_v22 = vld [vmem:[%s13155_s1 + $0x87c] sm:$0xf0]  ;;  %v5754_v27 = vld [vmem:[%s13155_s1 + $0x880] sm:$0xf0]  ;;  %v5666_v61 = vld [vmem:[%s13155_s1 + $0x588] sm:$0xf0] }
  0x21   :  { %v5753_v35 = vor.u32 %v7996_v22, %v5752_v21  ;;  %v5757_v39 = vor.u32 %v7992_v26, %v5754_v27  ;;  %813 = vmatpush.bf16.msra.mxu0 %v5497_v31  ;;  %841 = vmatpush.bf16.msra.mxu2 %v5501_v36  ;;  %v8033_v62 = vld [vmem:[%s13155_s1 + $0xd0c] sm:$0xf]  ;;  %v5632_v0 = vld [vmem:[%s13155_s1 + $0x408] sm:$0xf]  ;;  %v5488_v3 = vld [vmem:[%s13156_s0] sm:$0xf]  ;;  %v5669_v6 = vor.u32 %v7969_v60, %v5666_v61 }
  0x22   :  { %v5922_v63 = vld [vmem:[%s13155_s1 + $0xd88] sm:$0xf0]  ;;  %v7965_v2 = vld [vmem:[%s13155_s1 + $0x484] sm:$0xf0]  ;;  %v7926_v9 = vld [vmem:[%s13156_s0 + $0x4] sm:$0xf] }
  0x23   :  { %827 = vmatpush.bf16.msra.mxu1 %v5753_v35  ;;  %855 = vmatpush.bf16.msra.mxu3 %v5757_v39  ;;  %v7927_v4 = vld [vmem:[%s13156_s0 + $0x4] sm:$0xf0]  ;;  %v5490_v10 = vld [vmem:[%s13156_s0 + $0x8] sm:$0xf0]  ;;  %v5925_v11 = vor.u32 %v8033_v62, %v5922_v63  ;;  %v5633_v18 = vor.u32 %v7965_v2, %v5632_v0  ;;  %v5736_v2 = vld [vmem:[%s13155_s1 + $0x710] sm:$0xf] }
  0x24   :  { %v5888_v7 = vld [vmem:[%s13155_s1 + $0xc08] sm:$0xf]  ;;  %v8856_v8 = vor.u32 %v7927_v4, %v5488_v3  ;;  %v7961_v13 = vld [vmem:[%s13155_s1 + $0x40c] sm:$0xf]  ;;  %v8873_v15 = vor.u32 %v7926_v9, %v5490_v10  ;;  %v7990_v3 = vld [vmem:[%s13155_s1 + $0x78c] sm:$0xf0] }
  0x25   :  { %862 = vmatpush.bf16.msrb.mxu0 %v5729_v40  ;;  %890 = vmatpush.bf16.msrb.mxu2 %v5733_v42  ;;  %v8029_v12 = vld [vmem:[%s13155_s1 + $0xc84] sm:$0xf0]  ;;  %v5634_v14 = vld [vmem:[%s13155_s1 + $0x488] sm:$0xf0]  ;;  %v5992_v4 = vld [vmem:[%s13155_s1 + $0xf10] sm:$0xf] }
  0x26   :  { %v8025_v16 = vld [vmem:[%s13155_s1 + $0xc0c] sm:$0xf]  ;;  %842 = vmatmul.bf16.vlgmr.msra.gmra.mxu2 %v8856_v8  ;;  %814 = vmatmul.bf16.vlgmr.msra.gmra.mxu0 %v8856_v8  ;;  %v5889_v19 = vor.u32 %v8029_v12, %v5888_v7  ;;  %v5637_v20 = vor.u32 %v7961_v13, %v5634_v14  ;;  %v5600_v21 = vld [vmem:[%s13155_s1 + $0x308] sm:$0xf]  ;;  %v7986_v7 = vld [vmem:[%s13155_s1 + $0x714] sm:$0xf] }
  0x27   :  { %876 = vmatpush.bf16.msrb.mxu1 %v5985_v41  ;;  %904 = vmatpush.bf16.msrb.mxu3 %v5989_v46  ;;  %v5890_v17 = vld [vmem:[%s13155_s1 + $0xc88] sm:$0xf0]  ;;  %v7957_v22 = vld [vmem:[%s13155_s1 + $0x384] sm:$0xf0]  ;;  %v5738_v9 = vld [vmem:[%s13155_s1 + $0x790] sm:$0xf0] }
  0x28   :  { %856 = vmatmul.bf16.vlgmr.msra.gmra.mxu3 %v8873_v15  ;;  %v5856_v23 = vld [vmem:[%s13155_s1 + $0xb08] sm:$0xf]  ;;  %v5893_v24 = vor.u32 %v8025_v16, %v5890_v17  ;;  %v7953_v26 = vld [vmem:[%s13155_s1 + $0x30c] sm:$0xf]  ;;  %828 = vmatmul.bf16.vlgmr.msra.gmra.mxu1 %v8873_v15  ;;  %v5601_v30 = vor.u32 %v7957_v22, %v5600_v21  ;;  %v8050_v12 = vld [vmem:[%s13155_s1 + $0xf14] sm:$0xf]  ;;  %v5737_v16 = vor.u32 %v7990_v3, %v5736_v2 }
  0x29   :  { %863 = vmatpush.bf16.msrb.mxu0 %v5697_v52  ;;  %891 = vmatpush.bf16.msrb.mxu2 %v5701_v54  ;;  %v8021_v25 = vld [vmem:[%s13155_s1 + $0xb84] sm:$0xf0]  ;;  %v5602_v27 = vld [vmem:[%s13155_s1 + $0x388] sm:$0xf0]  ;;  %v5994_v13 = vld [vmem:[%s13155_s1 + $0xf90] sm:$0xf0] }
  0x2a   :  { %v8017_v28 = vld [vmem:[%s13155_s1 + $0xb0c] sm:$0xf]  ;;  %v5857_v31 = vor.u32 %v8021_v25, %v5856_v23  ;;  %v5605_v32 = vor.u32 %v7953_v26, %v5602_v27  ;;  %v5568_v33 = vld [vmem:[%s13155_s1 + $0x208] sm:$0xf]  ;;  %v5960_v21 = vld [vmem:[%s13155_s1 + $0xe10] sm:$0xf]  ;;  %v5997_v22 = vor.u32 %v8050_v12, %v5994_v13 }
  0x2b   :  { %877 = vmatpush.bf16.msrb.mxu1 %v5953_v53  ;;  %905 = vmatpush.bf16.msrb.mxu3 %v5957_v58  ;;  %v5858_v29 = vld [vmem:[%s13155_s1 + $0xb88] sm:$0xf0]  ;;  %v7949_v34 = vld [vmem:[%s13155_s1 + $0x284] sm:$0xf0]  ;;  %v8046_v23 = vld [vmem:[%s13155_s1 + $0xe8c] sm:$0xf0] }
  0x2c   :  { %v5824_v35 = vld [vmem:[%s13155_s1 + $0xa08] sm:$0xf]  ;;  %v5861_v36 = vor.u32 %v8017_v28, %v5858_v29  ;;  %v7945_v38 = vld [vmem:[%s13155_s1 + $0x20c] sm:$0xf]  ;;  %v5569_v42 = vor.u32 %v7949_v34, %v5568_v33  ;;  %v5706_v25 = vld [vmem:[%s13155_s1 + $0x690] sm:$0xf0]  ;;  %v5961_v29 = vor.u32 %v8046_v23, %v5960_v21 }
  0x2d   :  { %864 = vmatpush.bf16.msrb.mxu0 %v5665_v1  ;;  %892 = vmatpush.bf16.msrb.mxu2 %v5669_v6  ;;  %v8013_v37 = vld [vmem:[%s13155_s1 + $0xa84] sm:$0xf0]  ;;  %v5570_v39 = vld [vmem:[%s13155_s1 + $0x288] sm:$0xf0]  ;;  %v8054_v6 = vld [vmem:[%s13155_s1 + $0xf8c] sm:$0xf0] }
  0x2e   :  { %v8009_v40 = vld [vmem:[%s13155_s1 + $0xa0c] sm:$0xf]  ;;  %v5825_v43 = vor.u32 %v8013_v37, %v5824_v35  ;;  %v5573_v44 = vor.u32 %v7945_v38, %v5570_v39  ;;  %v5536_v45 = vld [vmem:[%s13155_s1 + $0x108] sm:$0xf]  ;;  %v5993_v17 = vor.u32 %v8054_v6, %v5992_v4  ;;  %v8042_v26 = vld [vmem:[%s13155_s1 + $0xe14] sm:$0xf] }
  0x2f   :  { %878 = vmatpush.bf16.msrb.mxu1 %v5921_v5  ;;  %906 = vmatpush.bf16.msrb.mxu3 %v5925_v11  ;;  %v5826_v41 = vld [vmem:[%s13155_s1 + $0xa88] sm:$0xf0]  ;;  %v7941_v46 = vld [vmem:[%s13155_s1 + $0x184] sm:$0xf0]  ;;  %v5962_v27 = vld [vmem:[%s13155_s1 + $0xe90] sm:$0xf0] }
  0x30   :  { %v5792_v47 = vld [vmem:[%s13155_s1 + $0x908] sm:$0xf]  ;;  %v5829_v48 = vor.u32 %v8009_v40, %v5826_v41  ;;  %v7937_v50 = vld [vmem:[%s13155_s1 + $0x10c] sm:$0xf]  ;;  %v5537_v54 = vor.u32 %v7941_v46, %v5536_v45  ;;  %v5928_v33 = vld [vmem:[%s13155_s1 + $0xd10] sm:$0xf]  ;;  %v5965_v34 = vor.u32 %v8042_v26, %v5962_v27 }
  0x31   :  { %865 = vmatpush.bf16.msrb.mxu0 %v5633_v18  ;;  %893 = vmatpush.bf16.msrb.mxu2 %v5637_v20  ;;  %v8005_v49 = vld [vmem:[%s13155_s1 + $0x984] sm:$0xf0]  ;;  %v5538_v51 = vld [vmem:[%s13155_s1 + $0x188] sm:$0xf0]  ;;  %v5741_v18 = vor.u32 %v7986_v7, %v5738_v9  ;;  %v7982_v20 = vld [vmem:[%s13155_s1 + $0x68c] sm:$0xf0] }
  0x32   :  { %v8001_v52 = vld [vmem:[%s13155_s1 + $0x90c] sm:$0xf]  ;;  %v5504_v55 = vld [vmem:[%s13155_s1 + $0x8] sm:$0xf]  ;;  %v5793_v57 = vor.u32 %v8005_v49, %v5792_v47  ;;  %v5541_v58 = vor.u32 %v7937_v50, %v5538_v51  ;;  %v8038_v35 = vld [vmem:[%s13155_s1 + $0xd8c] sm:$0xf0] }
  0x33   :  { %879 = vmatpush.bf16.msrb.mxu1 %v5889_v19  ;;  %907 = vmatpush.bf16.msrb.mxu3 %v5893_v24  ;;  %v5794_v53 = vld [vmem:[%s13155_s1 + $0x988] sm:$0xf0]  ;;  %v7933_v56 = vld [vmem:[%s13155_s1 + $0x84] sm:$0xf0]  ;;  %v5704_v19 = vld [vmem:[%s13155_s1 + $0x610] sm:$0xf]  ;;  %v5929_v41 = vor.u32 %v8038_v35, %v5928_v33 }
  0x34   :  { %v5760_v59 = vld [vmem:[%s13155_s1 + $0x808] sm:$0xf]  ;;  %v7929_v61 = vld [vmem:[%s13155_s1 + $0xc] sm:$0xf]  ;;  %v5797_v62 = vor.u32 %v8001_v52, %v5794_v53  ;;  %v5505_v5 = vor.u32 %v7933_v56, %v5504_v55  ;;  %v7978_v24 = vld [vmem:[%s13155_s1 + $0x614] sm:$0xf]  ;;  %v5705_v28 = vor.u32 %v7982_v20, %v5704_v19 }
  0x35   :  { %866 = vmatpush.bf16.msrb.mxu0 %v5601_v30  ;;  %894 = vmatpush.bf16.msrb.mxu2 %v5605_v32  ;;  %v7997_v60 = vld [vmem:[%s13155_s1 + $0x884] sm:$0xf0]  ;;  %v5506_v63 = vld [vmem:[%s13155_s1 + $0x88] sm:$0xf0]  ;;  %v5709_v30 = vor.u32 %v7978_v24, %v5706_v25  ;;  %v7974_v32 = vld [vmem:[%s13155_s1 + $0x58c] sm:$0xf0] }
  0x36   :  { %v7993_v0 = vld [vmem:[%s13155_s1 + $0x80c] sm:$0xf]  ;;  %v5761_v10 = vor.u32 %v7997_v60, %v5760_v59  ;;  %v5509_v11 = vor.u32 %v7929_v61, %v5506_v63  ;;  %v5674_v37 = vld [vmem:[%s13155_s1 + $0x590] sm:$0xf0]  ;;  %v5896_v45 = vld [vmem:[%s13155_s1 + $0xc10] sm:$0xf] }
  0x37   :  { %880 = vmatpush.bf16.msrb.mxu1 %v5857_v31  ;;  %908 = vmatpush.bf16.msrb.mxu3 %v5861_v36  ;;  %v5762_v1 = vld [vmem:[%s13155_s1 + $0x888] sm:$0xf0]  ;;  %v5672_v31 = vld [vmem:[%s13155_s1 + $0x510] sm:$0xf]  ;;  %v7970_v36 = vld [vmem:[%s13155_s1 + $0x514] sm:$0xf] }
  0x38   :  { %v5765_v14 = vor.u32 %v7993_v0, %v5762_v1  ;;  %v8034_v38 = vld [vmem:[%s13155_s1 + $0xd14] sm:$0xf]  ;;  %v5673_v40 = vor.u32 %v7974_v32, %v5672_v31  ;;  %v8030_v47 = vld [vmem:[%s13155_s1 + $0xc8c] sm:$0xf0] }
  0x39   :  { %867 = vmatpush.bf16.msrb.mxu0 %v5569_v42  ;;  %895 = vmatpush.bf16.msrb.mxu2 %v5573_v44  ;;  %v5930_v39 = vld [vmem:[%s13155_s1 + $0xd90] sm:$0xf0]  ;;  %v5677_v42 = vor.u32 %v7970_v36, %v5674_v37  ;;  %v7966_v44 = vld [vmem:[%s13155_s1 + $0x48c] sm:$0xf0]  ;;  %v5897_v53 = vor.u32 %v8030_v47, %v5896_v45  ;;  %v8051_v47 = vld [vmem:[%s13155_s1 + $0xf1c] sm:$0xf] }
  0x3a   :  { %v5933_v46 = vor.u32 %v8034_v38, %v5930_v39  ;;  %v5642_v49 = vld [vmem:[%s13155_s1 + $0x490] sm:$0xf0]  ;;  %v5608_v55 = vld [vmem:[%s13155_s1 + $0x310] sm:$0xf]  ;;  %v5744_v38 = vld [vmem:[%s13155_s1 + $0x718] sm:$0xf] }
  0x3b   :  { %881 = vmatpush.bf16.msrb.mxu1 %v5825_v43  ;;  %909 = vmatpush.bf16.msrb.mxu3 %v5829_v48  ;;  %v5640_v43 = vld [vmem:[%s13155_s1 + $0x410] sm:$0xf]  ;;  %v7962_v48 = vld [vmem:[%s13155_s1 + $0x414] sm:$0xf]  ;;  %v7991_v39 = vld [vmem:[%s13155_s1 + $0x794] sm:$0xf0] }
  0x3c   :  { %v8026_v50 = vld [vmem:[%s13155_s1 + $0xc14] sm:$0xf]  ;;  %v5641_v52 = vor.u32 %v7966_v44, %v5640_v43  ;;  %v7958_v56 = vld [vmem:[%s13155_s1 + $0x38c] sm:$0xf0]  ;;  %v7987_v43 = vld [vmem:[%s13155_s1 + $0x71c] sm:$0xf] }
  0x3d   :  { %868 = vmatpush.bf16.msrb.mxu0 %v5537_v54  ;;  %896 = vmatpush.bf16.msrb.mxu2 %v5541_v58  ;;  %v5898_v51 = vld [vmem:[%s13155_s1 + $0xc90] sm:$0xf0]  ;;  %v5645_v54 = vor.u32 %v7962_v48, %v5642_v49  ;;  %v8022_v59 = vld [vmem:[%s13155_s1 + $0xb8c] sm:$0xf0]  ;;  %v5609_v0 = vor.u32 %v7958_v56, %v5608_v55  ;;  %v5746_v44 = vld [vmem:[%s13155_s1 + $0x798] sm:$0xf0] }
  0x3e   :  { %v5901_v58 = vor.u32 %v8026_v50, %v5898_v51  ;;  %v7954_v60 = vld [vmem:[%s13155_s1 + $0x314] sm:$0xf]  ;;  %v5576_v3 = vld [vmem:[%s13155_s1 + $0x210] sm:$0xf]  ;;  %v6002_v48 = vld [vmem:[%s13155_s1 + $0xf98] sm:$0xf0]  ;;  %v5745_v50 = vor.u32 %v7991_v39, %v5744_v38 }
  0x3f   :  { %882 = vmatpush.bf16.msrb.mxu1 %v5793_v57  ;;  %910 = vmatpush.bf16.msrb.mxu3 %v5797_v62  ;;  %v5864_v57 = vld [vmem:[%s13155_s1 + $0xb10] sm:$0xf]  ;;  %v5610_v61 = vld [vmem:[%s13155_s1 + $0x390] sm:$0xf0]  ;;  %v5968_v55 = vld [vmem:[%s13155_s1 + $0xe18] sm:$0xf]  ;;  %v6005_v56 = vor.u32 %v8051_v47, %v6002_v48 }
  0x40   :  { %v8018_v62 = vld [vmem:[%s13155_s1 + $0xb14] sm:$0xf]  ;;  %v5865_v1 = vor.u32 %v8022_v59, %v5864_v57  ;;  %v5613_v2 = vor.u32 %v7954_v60, %v5610_v61  ;;  %v7950_v4 = vld [vmem:[%s13155_s1 + $0x28c] sm:$0xf0]  ;;  %v8047_v57 = vld [vmem:[%s13155_s1 + $0xe94] sm:$0xf0] }
  0x41   :  { %869 = vmatpush.bf16.msrb.mxu0 %v5505_v5  ;;  %897 = vmatpush.bf16.msrb.mxu2 %v5509_v11  ;;  %v5866_v63 = vld [vmem:[%s13155_s1 + $0xb90] sm:$0xf0]  ;;  %v5832_v5 = vld [vmem:[%s13155_s1 + $0xa10] sm:$0xf]  ;;  %v5577_v13 = vor.u32 %v7950_v4, %v5576_v3  ;;  %v5714_v59 = vld [vmem:[%s13155_s1 + $0x698] sm:$0xf0] }
  0x42   :  { %v5869_v6 = vor.u32 %v8018_v62, %v5866_v63  ;;  %v8014_v7 = vld [vmem:[%s13155_s1 + $0xa8c] sm:$0xf0]  ;;  %v7946_v9 = vld [vmem:[%s13155_s1 + $0x214] sm:$0xf]  ;;  %v8043_v60 = vld [vmem:[%s13155_s1 + $0xe1c] sm:$0xf]  ;;  %v5969_v63 = vor.u32 %v8047_v57, %v5968_v55 }
  0x43   :  { %883 = vmatpush.bf16.msrb.mxu1 %v5761_v10  ;;  %911 = vmatpush.bf16.msrb.mxu3 %v5765_v14  ;;  %v5578_v10 = vld [vmem:[%s13155_s1 + $0x290] sm:$0xf0]  ;;  %v5833_v14 = vor.u32 %v8014_v7, %v5832_v5  ;;  %v5800_v19 = vld [vmem:[%s13155_s1 + $0x910] sm:$0xf]  ;;  %v5970_v61 = vld [vmem:[%s13155_s1 + $0xe98] sm:$0xf0] }
  0x44   :  { %898 = vmatmul.bf16.vlgmr.msrb.gmra.mxu2 %v8856_v8  ;;  %870 = vmatmul.bf16.vlgmr.msrb.gmra.mxu0 %v8856_v8  ;;  %v8010_v11 = vld [vmem:[%s13155_s1 + $0xa14] sm:$0xf]  ;;  %v8006_v21 = vld [vmem:[%s13155_s1 + $0x98c] sm:$0xf0]  ;;  %v5936_v3 = vld [vmem:[%s13155_s1 + $0xd18] sm:$0xf]  ;;  %v5973_v4 = vor.u32 %v8043_v60, %v5970_v61 }
  0x45   :  { %918 = vmatpush.bf16.msra.mxu0 %v5737_v16  ;;  %946 = vmatpush.bf16.msra.mxu2 %v5741_v18  ;;  %v5834_v12 = vld [vmem:[%s13155_s1 + $0xa90] sm:$0xf0]  ;;  %v5581_v16 = vor.u32 %v7946_v9, %v5578_v10  ;;  %v7942_v18 = vld [vmem:[%s13155_s1 + $0x18c] sm:$0xf0]  ;;  %v8039_v5 = vld [vmem:[%s13155_s1 + $0xd94] sm:$0xf0] }
  0x46   :  { %912 = vmatmul.bf16.vlgmr.msrb.gmra.mxu3 %v8873_v15  ;;  %884 = vmatmul.bf16.vlgmr.msrb.gmra.mxu1 %v8873_v15  ;;  %v5837_v20 = vor.u32 %v8010_v11, %v5834_v12  ;;  %v5546_v23 = vld [vmem:[%s13155_s1 + $0x190] sm:$0xf0]  ;;  %v5512_v27 = vld [vmem:[%s13155_s1 + $0x10] sm:$0xf]  ;;  %v5682_v7 = vld [vmem:[%s13155_s1 + $0x598] sm:$0xf0]  ;;  %v5937_v12 = vor.u32 %v8039_v5, %v5936_v3 }
  0x47   :  { %932 = vmatpush.bf16.msra.mxu1 %v5993_v17  ;;  %960 = vmatpush.bf16.msra.mxu3 %v5997_v22  ;;  %v5544_v17 = vld [vmem:[%s13155_s1 + $0x110] sm:$0xf]  ;;  %v7938_v22 = vld [vmem:[%s13155_s1 + $0x114] sm:$0xf]  ;;  %v8035_v9 = vld [vmem:[%s13155_s1 + $0xd1c] sm:$0xf] }
  0x48   :  { %v8002_v24 = vld [vmem:[%s13155_s1 + $0x914] sm:$0xf]  ;;  %v5545_v26 = vor.u32 %v7942_v18, %v5544_v17  ;;  %v5768_v31 = vld [vmem:[%s13155_s1 + $0x810] sm:$0xf]  ;;  %v5938_v10 = vld [vmem:[%s13155_s1 + $0xd98] sm:$0xf0] }
  0x49   :  { %919 = vmatpush.bf16.msra.mxu0 %v5705_v28  ;;  %947 = vmatpush.bf16.msra.mxu2 %v5709_v30  ;;  %v5802_v25 = vld [vmem:[%s13155_s1 + $0x990] sm:$0xf0]  ;;  %v7934_v28 = vld [vmem:[%s13155_s1 + $0x8c] sm:$0xf0]  ;;  %v5549_v30 = vor.u32 %v7938_v22, %v5546_v23  ;;  %v5904_v17 = vld [vmem:[%s13155_s1 + $0xc18] sm:$0xf]  ;;  %v5941_v18 = vor.u32 %v8035_v9, %v5938_v10 }
  0x4a   :  { %v7998_v32 = vld [vmem:[%s13155_s1 + $0x88c] sm:$0xf0]  ;;  %v7930_v33 = vld [vmem:[%s13155_s1 + $0x14] sm:$0xf]  ;;  %v8027_v22 = vld [vmem:[%s13155_s1 + $0xc1c] sm:$0xf] }
  0x4b   :  { %933 = vmatpush.bf16.msra.mxu1 %v5961_v29  ;;  %961 = vmatpush.bf16.msra.mxu3 %v5965_v34  ;;  %v5801_v29 = vor.u32 %v8006_v21, %v5800_v19  ;;  %v5805_v34 = vor.u32 %v8002_v24, %v5802_v25  ;;  %v5514_v35 = vld [vmem:[%s13155_s1 + $0x90] sm:$0xf0]  ;;  %v5769_v45 = vor.u32 %v7998_v32, %v5768_v31  ;;  %v8031_v19 = vld [vmem:[%s13155_s1 + $0xc94] sm:$0xf0]  ;;  %v5650_v21 = vld [vmem:[%s13155_s1 + $0x498] sm:$0xf0] }
  0x4c   :  { %v7994_v36 = vld [vmem:[%s13155_s1 + $0x814] sm:$0xf]  ;;  %v5906_v23 = vld [vmem:[%s13155_s1 + $0xc98] sm:$0xf0]  ;;  %v5905_v25 = vor.u32 %v8031_v19, %v5904_v17  ;;  %v8023_v31 = vld [vmem:[%s13155_s1 + $0xb94] sm:$0xf0] }
  0x4d   :  { %920 = vmatpush.bf16.msra.mxu0 %v5673_v40  ;;  %948 = vmatpush.bf16.msra.mxu2 %v5677_v42  ;;  %v5770_v37 = vld [vmem:[%s13155_s1 + $0x890] sm:$0xf0]  ;;  %v6000_v40 = vld [vmem:[%s13155_s1 + $0xf18] sm:$0xf]  ;;  %v7955_v32 = vld [vmem:[%s13155_s1 + $0x31c] sm:$0xf] }
  0x4e   :  { %v8055_v42 = vld [vmem:[%s13155_s1 + $0xf94] sm:$0xf0]  ;;  %v5773_v49 = vor.u32 %v7994_v36, %v5770_v37  ;;  %v5842_v47 = vld [vmem:[%s13155_s1 + $0xa98] sm:$0xf0]  ;;  %v6232_v9 = vld [vmem:[%s13155_s1 + $0x720] sm:$0xf] }
  0x4f   :  { %934 = vmatpush.bf16.msra.mxu1 %v5929_v41  ;;  %962 = vmatpush.bf16.msra.mxu3 %v5933_v46  ;;  %v5513_v41 = vor.u32 %v7934_v28, %v5512_v27  ;;  %v5517_v46 = vor.u32 %v7930_v33, %v5514_v35  ;;  %v6001_v51 = vor.u32 %v8055_v42, %v6000_v40  ;;  %v5616_v27 = vld [vmem:[%s13155_s1 + $0x318] sm:$0xf]  ;;  %v5618_v33 = vld [vmem:[%s13155_s1 + $0x398] sm:$0xf0]  ;;  %v8116_v10 = vld [vmem:[%s13155_s1 + $0x79c] sm:$0xf0] }
  0x50   :  { %v7959_v28 = vld [vmem:[%s13155_s1 + $0x394] sm:$0xf0]  ;;  %v5874_v35 = vld [vmem:[%s13155_s1 + $0xb98] sm:$0xf0]  ;;  %v5621_v38 = vor.u32 %v7955_v32, %v5618_v33  ;;  %v8176_v19 = vld [vmem:[%s13155_s1 + $0xf24] sm:$0xf] }
  0x51   :  { %921 = vmatpush.bf16.msra.mxu0 %v5641_v52  ;;  %949 = vmatpush.bf16.msra.mxu2 %v5645_v54  ;;  %v5749_v52 = vor.u32 %v7987_v43, %v5746_v44  ;;  %v7983_v54 = vld [vmem:[%s13155_s1 + $0x694] sm:$0xf0]  ;;  %v5617_v36 = vor.u32 %v7959_v28, %v5616_v27  ;;  %v7947_v44 = vld [vmem:[%s13155_s1 + $0x21c] sm:$0xf]  ;;  %v6456_v27 = vld [vmem:[%s13155_s1 + $0xe20] sm:$0xf] }
  0x52   :  { %v5584_v39 = vld [vmem:[%s13155_s1 + $0x218] sm:$0xf]  ;;  %v5554_v57 = vld [vmem:[%s13155_s1 + $0x198] sm:$0xf0]  ;;  %v8168_v32 = vld [vmem:[%s13155_s1 + $0xe24] sm:$0xf] }
  0x53   :  { %935 = vmatpush.bf16.msra.mxu1 %v5897_v53  ;;  %963 = vmatpush.bf16.msra.mxu3 %v5901_v58  ;;  %v5712_v53 = vld [vmem:[%s13155_s1 + $0x618] sm:$0xf]  ;;  %v7979_v58 = vld [vmem:[%s13155_s1 + $0x61c] sm:$0xf]  ;;  %v6458_v33 = vld [vmem:[%s13155_s1 + $0xea0] sm:$0xf0] }
  0x54   :  { %v5713_v62 = vor.u32 %v7983_v54, %v5712_v53  ;;  %v7951_v40 = vld [vmem:[%s13155_s1 + $0x294] sm:$0xf0]  ;;  %v7931_v3 = vld [vmem:[%s13155_s1 + $0x1c] sm:$0xf] }
  0x55   :  { %922 = vmatpush.bf16.msra.mxu0 %v5609_v0  ;;  %950 = vmatpush.bf16.msra.mxu2 %v5613_v2  ;;  %v5717_v0 = vor.u32 %v7979_v58, %v5714_v59  ;;  %v7975_v2 = vld [vmem:[%s13155_s1 + $0x594] sm:$0xf0]  ;;  %v5585_v48 = vor.u32 %v7951_v40, %v5584_v39  ;;  %v8003_v58 = vld [vmem:[%s13155_s1 + $0x91c] sm:$0xf]  ;;  %v6424_v39 = vld [vmem:[%s13155_s1 + $0xd20] sm:$0xf]  ;;  %v6461_v40 = vor.u32 %v8168_v32, %v6458_v33 }
  0x56   :  { %v8015_v43 = vld [vmem:[%s13155_s1 + $0xa94] sm:$0xf0]  ;;  %v5810_v59 = vld [vmem:[%s13155_s1 + $0x998] sm:$0xf0]  ;;  %v6008_v33 = vld [vmem:[%s13155_s1 + $0x20] sm:$0xf] }
  0x57   :  { %936 = vmatpush.bf16.msra.mxu1 %v5865_v1  ;;  %964 = vmatpush.bf16.msra.mxu3 %v5869_v6  ;;  %v5680_v1 = vld [vmem:[%s13155_s1 + $0x518] sm:$0xf]  ;;  %v7971_v6 = vld [vmem:[%s13155_s1 + $0x51c] sm:$0xf] }
  0x58   :  { %v5681_v11 = vor.u32 %v7975_v2, %v5680_v1  ;;  %v5808_v53 = vld [vmem:[%s13155_s1 + $0x918] sm:$0xf]  ;;  %v5522_v5 = vld [vmem:[%s13155_s1 + $0x98] sm:$0xf0] }
  0x59   :  { %923 = vmatpush.bf16.msra.mxu0 %v5577_v13  ;;  %951 = vmatpush.bf16.msra.mxu2 %v5581_v16  ;;  %v5685_v13 = vor.u32 %v7971_v6, %v5682_v7  ;;  %v7967_v16 = vld [vmem:[%s13155_s1 + $0x494] sm:$0xf0]  ;;  %v7995_v6 = vld [vmem:[%s13155_s1 + $0x81c] sm:$0xf] }
  0x5a   :  { %v8007_v55 = vld [vmem:[%s13155_s1 + $0x994] sm:$0xf0]  ;;  %v5778_v7 = vld [vmem:[%s13155_s1 + $0x898] sm:$0xf0] }
  0x5b   :  { %937 = vmatpush.bf16.msra.mxu1 %v5833_v14  ;;  %965 = vmatpush.bf16.msra.mxu3 %v5837_v20  ;;  %v5648_v14 = vld [vmem:[%s13155_s1 + $0x418] sm:$0xf]  ;;  %v7963_v20 = vld [vmem:[%s13155_s1 + $0x41c] sm:$0xf] }
  0x5c   :  { %v5649_v24 = vor.u32 %v7967_v16, %v5648_v14  ;;  %v5520_v61 = vld [vmem:[%s13155_s1 + $0x18] sm:$0xf]  ;;  %v8112_v14 = vld [vmem:[%s13155_s1 + $0x724] sm:$0xf] }
  0x5d   :  { %924 = vmatpush.bf16.msra.mxu0 %v5545_v26  ;;  %952 = vmatpush.bf16.msra.mxu2 %v5549_v30  ;;  %v5653_v26 = vor.u32 %v7963_v20, %v5650_v21  ;;  %v5909_v30 = vor.u32 %v8027_v22, %v5906_v23  ;;  %v5776_v1 = vld [vmem:[%s13155_s1 + $0x818] sm:$0xf]  ;;  %v6234_v16 = vld [vmem:[%s13155_s1 + $0x7a0] sm:$0xf0]  ;;  %v5781_v21 = vor.u32 %v7995_v6, %v5778_v7 }
  0x5e   :  { %v7999_v2 = vld [vmem:[%s13155_s1 + $0x894] sm:$0xf0]  ;;  %v6490_v20 = vld [vmem:[%s13155_s1 + $0xfa0] sm:$0xf0]  ;;  %v6233_v22 = vor.u32 %v8116_v10, %v6232_v9  ;;  %v6072_v10 = vld [vmem:[%s13155_s1 + $0x220] sm:$0xf] }
  0x5f   :  { %938 = vmatpush.bf16.msra.mxu1 %v5801_v29  ;;  %966 = vmatpush.bf16.msra.mxu3 %v5805_v34  ;;  %v5872_v29 = vld [vmem:[%s13155_s1 + $0xb18] sm:$0xf]  ;;  %v8019_v34 = vld [vmem:[%s13155_s1 + $0xb1c] sm:$0xf]  ;;  %v5777_v17 = vor.u32 %v7999_v2, %v5776_v1  ;;  %v6493_v28 = vor.u32 %v8176_v19, %v6490_v20  ;;  %v8148_v1 = vld [vmem:[%s13155_s1 + $0xb9c] sm:$0xf0] }
  0x60   :  { %v5873_v37 = vor.u32 %v8023_v31, %v5872_v29  ;;  %v5877_v42 = vor.u32 %v8019_v34, %v5874_v35  ;;  %v8172_v29 = vld [vmem:[%s13155_s1 + $0xe9c] sm:$0xf0]  ;;  %v6202_v31 = vld [vmem:[%s13155_s1 + $0x6a0] sm:$0xf0] }
  0x61   :  { %925 = vmatpush.bf16.msra.mxu0 %v5513_v41  ;;  %953 = vmatpush.bf16.msra.mxu2 %v5517_v46  ;;  %v5840_v41 = vld [vmem:[%s13155_s1 + $0xa18] sm:$0xf]  ;;  %v8011_v46 = vld [vmem:[%s13155_s1 + $0xa1c] sm:$0xf]  ;;  %v6457_v35 = vor.u32 %v8172_v29, %v6456_v27  ;;  %v8080_v2 = vld [vmem:[%s13155_s1 + $0x324] sm:$0xf] }
  0x62   :  { %v5845_v54 = vor.u32 %v8011_v46, %v5842_v47  ;;  %v6330_v19 = vld [vmem:[%s13155_s1 + $0xaa0] sm:$0xf0]  ;;  %v8132_v27 = vld [vmem:[%s13155_s1 + $0x99c] sm:$0xf0] }
  0x63   :  { %939 = vmatpush.bf16.msra.mxu1 %v5769_v45  ;;  %967 = vmatpush.bf16.msra.mxu3 %v5773_v49  ;;  %v5586_v45 = vld [vmem:[%s13155_s1 + $0x298] sm:$0xf0]  ;;  %v5841_v49 = vor.u32 %v8015_v43, %v5840_v41  ;;  %v8164_v41 = vld [vmem:[%s13155_s1 + $0xd9c] sm:$0xf0]  ;;  %v6170_v43 = vld [vmem:[%s13155_s1 + $0x5a0] sm:$0xf0] }
  0x64   :  { %954 = vmatmul.bf16.vlgmr.msra.gmra.mxu2 %v8856_v8  ;;  %926 = vmatmul.bf16.vlgmr.msra.gmra.mxu0 %v8856_v8  ;;  %v6425_v47 = vor.u32 %v8164_v41, %v6424_v39  ;;  %v6042_v29 = vld [vmem:[%s13155_s1 + $0x1a0] sm:$0xf0] }
  0x65   :  { %974 = vmatpush.bf16.msrb.mxu0 %v5745_v50  ;;  %1002 = vmatpush.bf16.msrb.mxu2 %v5749_v52  ;;  %v5589_v50 = vor.u32 %v7947_v44, %v5586_v45  ;;  %v7943_v52 = vld [vmem:[%s13155_s1 + $0x194] sm:$0xf0]  ;;  %v8160_v44 = vld [vmem:[%s13155_s1 + $0xd24] sm:$0xf] }
  0x66   :  { %968 = vmatmul.bf16.vlgmr.msra.gmra.mxu3 %v8873_v15  ;;  %940 = vmatmul.bf16.vlgmr.msra.gmra.mxu1 %v8873_v15  ;;  %v6426_v45 = vld [vmem:[%s13155_s1 + $0xda0] sm:$0xf0] }
  0x67   :  { %988 = vmatpush.bf16.msrb.mxu1 %v6001_v51  ;;  %1016 = vmatpush.bf16.msrb.mxu3 %v6005_v56  ;;  %v5552_v51 = vld [vmem:[%s13155_s1 + $0x118] sm:$0xf]  ;;  %v7939_v56 = vld [vmem:[%s13155_s1 + $0x11c] sm:$0xf]  ;;  %v8056_v39 = vld [vmem:[%s13155_s1 + $0x24] sm:$0xf] }
  0x68   :  { %v5553_v60 = vor.u32 %v7943_v52, %v5552_v51  ;;  %v6392_v51 = vld [vmem:[%s13155_s1 + $0xc20] sm:$0xf]  ;;  %v6429_v52 = vor.u32 %v8160_v44, %v6426_v45  ;;  %v6010_v41 = vld [vmem:[%s13155_s1 + $0xa0] sm:$0xf0]  ;;  %v6240_v44 = vld [vmem:[%s13155_s1 + $0x728] sm:$0xf] }
  0x69   :  { %975 = vmatpush.bf16.msrb.mxu0 %v5713_v62  ;;  %1003 = vmatpush.bf16.msrb.mxu2 %v5717_v0  ;;  %v7935_v62 = vld [vmem:[%s13155_s1 + $0x94] sm:$0xf0]  ;;  %v5557_v0 = vor.u32 %v7939_v56, %v5554_v57  ;;  %v8152_v56 = vld [vmem:[%s13155_s1 + $0xc24] sm:$0xf]  ;;  %v8117_v45 = vld [vmem:[%s13155_s1 + $0x7a4] sm:$0xf0] }
  0x6a   :  { %v6394_v57 = vld [vmem:[%s13155_s1 + $0xca0] sm:$0xf0] }
  0x6b   :  { %989 = vmatpush.bf16.msrb.mxu1 %v5969_v63  ;;  %1017 = vmatpush.bf16.msrb.mxu3 %v5973_v4  ;;  %v5809_v63 = vor.u32 %v8007_v55, %v5808_v53  ;;  %v5813_v4 = vor.u32 %v8003_v58, %v5810_v59  ;;  %v8156_v53 = vld [vmem:[%s13155_s1 + $0xc9c] sm:$0xf0]  ;;  %v6138_v55 = vld [vmem:[%s13155_s1 + $0x4a0] sm:$0xf0] }
  0x6c   :  { %v6393_v59 = vor.u32 %v8156_v53, %v6392_v51  ;;  %v8177_v53 = vld [vmem:[%s13155_s1 + $0xf2c] sm:$0xf] }
  0x6d   :  { %976 = vmatpush.bf16.msrb.mxu0 %v5681_v11  ;;  %1004 = vmatpush.bf16.msrb.mxu2 %v5685_v13  ;;  %v6488_v11 = vld [vmem:[%s13155_s1 + $0xf20] sm:$0xf] }
  0x6e   :  { %v8180_v13 = vld [vmem:[%s13155_s1 + $0xf9c] sm:$0xf0] }
  0x6f   :  { %990 = vmatpush.bf16.msrb.mxu1 %v5937_v12  ;;  %1018 = vmatpush.bf16.msrb.mxu3 %v5941_v18  ;;  %v5521_v12 = vor.u32 %v7935_v62, %v5520_v61  ;;  %v5525_v18 = vor.u32 %v7931_v3, %v5522_v5  ;;  %v6489_v23 = vor.u32 %v8180_v13, %v6488_v11  ;;  %v6104_v61 = vld [vmem:[%s13155_s1 + $0x320] sm:$0xf]  ;;  %v6106_v3 = vld [vmem:[%s13155_s1 + $0x3a0] sm:$0xf0] }
  0x70   :  { %v8084_v62 = vld [vmem:[%s13155_s1 + $0x39c] sm:$0xf0]  ;;  %v6362_v5 = vld [vmem:[%s13155_s1 + $0xba0] sm:$0xf0]  ;;  %v6109_v9 = vor.u32 %v8080_v2, %v6106_v3  ;;  %v8169_v2 = vld [vmem:[%s13155_s1 + $0xe2c] sm:$0xf] }
  0x71   :  { %977 = vmatpush.bf16.msrb.mxu0 %v5649_v24  ;;  %1005 = vmatpush.bf16.msrb.mxu2 %v5653_v26  ;;  %v6237_v24 = vor.u32 %v8112_v14, %v6234_v16  ;;  %v8108_v26 = vld [vmem:[%s13155_s1 + $0x69c] sm:$0xf0]  ;;  %v6105_v6 = vor.u32 %v8084_v62, %v6104_v61  ;;  %v8072_v16 = vld [vmem:[%s13155_s1 + $0x224] sm:$0xf]  ;;  %v6464_v61 = vld [vmem:[%s13155_s1 + $0xe28] sm:$0xf] }
  0x72   :  { %v8076_v11 = vld [vmem:[%s13155_s1 + $0x29c] sm:$0xf0]  ;;  %v6466_v3 = vld [vmem:[%s13155_s1 + $0xea8] sm:$0xf0] }
  0x73   :  { %991 = vmatpush.bf16.msrb.mxu1 %v5905_v25  ;;  %1019 = vmatpush.bf16.msrb.mxu3 %v5909_v30  ;;  %v6200_v25 = vld [vmem:[%s13155_s1 + $0x620] sm:$0xf]  ;;  %v8104_v30 = vld [vmem:[%s13155_s1 + $0x624] sm:$0xf]  ;;  %v6073_v20 = vor.u32 %v8076_v11, %v6072_v10  ;;  %v6432_v10 = vld [vmem:[%s13155_s1 + $0xd28] sm:$0xf]  ;;  %v6469_v11 = vor.u32 %v8169_v2, %v6466_v3 }
  0x74   :  { %v6201_v34 = vor.u32 %v8108_v26, %v6200_v25  ;;  %v8140_v14 = vld [vmem:[%s13155_s1 + $0xa9c] sm:$0xf0]  ;;  %v6050_v2 = vld [vmem:[%s13155_s1 + $0x1a8] sm:$0xf0] }
  0x75   :  { %978 = vmatpush.bf16.msrb.mxu0 %v5617_v36  ;;  %1006 = vmatpush.bf16.msrb.mxu2 %v5621_v38  ;;  %v6205_v36 = vor.u32 %v8104_v30, %v6202_v31  ;;  %v8100_v38 = vld [vmem:[%s13155_s1 + $0x59c] sm:$0xf0]  ;;  %v8128_v30 = vld [vmem:[%s13155_s1 + $0x924] sm:$0xf]  ;;  %v8129_v3 = vld [vmem:[%s13155_s1 + $0x92c] sm:$0xf] }
  0x76   :  { %v6296_v25 = vld [vmem:[%s13155_s1 + $0x920] sm:$0xf]  ;;  %v6298_v31 = vld [vmem:[%s13155_s1 + $0x9a0] sm:$0xf0] }
  0x77   :  { %992 = vmatpush.bf16.msrb.mxu1 %v5873_v37  ;;  %1020 = vmatpush.bf16.msrb.mxu3 %v5877_v42  ;;  %v6168_v37 = vld [vmem:[%s13155_s1 + $0x520] sm:$0xf]  ;;  %v8096_v42 = vld [vmem:[%s13155_s1 + $0x524] sm:$0xf] }
  0x78   :  { %v6169_v46 = vor.u32 %v8100_v38, %v6168_v37  ;;  %v6264_v37 = vld [vmem:[%s13155_s1 + $0x820] sm:$0xf] }
  0x79   :  { %979 = vmatpush.bf16.msrb.mxu0 %v5585_v48  ;;  %1007 = vmatpush.bf16.msrb.mxu2 %v5589_v50  ;;  %v6173_v48 = vor.u32 %v8096_v42, %v6170_v43  ;;  %v8092_v50 = vld [vmem:[%s13155_s1 + $0x49c] sm:$0xf0]  ;;  %v8120_v42 = vld [vmem:[%s13155_s1 + $0x824] sm:$0xf] }
  0x7a   :  { %v8124_v38 = vld [vmem:[%s13155_s1 + $0x89c] sm:$0xf0]  ;;  %v6266_v43 = vld [vmem:[%s13155_s1 + $0x8a0] sm:$0xf0] }
  0x7b   :  { %993 = vmatpush.bf16.msrb.mxu1 %v5841_v49  ;;  %1021 = vmatpush.bf16.msrb.mxu3 %v5845_v54  ;;  %v6136_v49 = vld [vmem:[%s13155_s1 + $0x420] sm:$0xf]  ;;  %v8088_v54 = vld [vmem:[%s13155_s1 + $0x424] sm:$0xf]  ;;  %v6265_v51 = vor.u32 %v8124_v38, %v6264_v37  ;;  %v8149_v37 = vld [vmem:[%s13155_s1 + $0xba4] sm:$0xf0] }
  0x7c   :  { %v6137_v58 = vor.u32 %v8092_v50, %v6136_v49  ;;  %v8113_v49 = vld [vmem:[%s13155_s1 + $0x72c] sm:$0xf] }
  0x7d   :  { %980 = vmatpush.bf16.msrb.mxu0 %v5553_v60  ;;  %1008 = vmatpush.bf16.msrb.mxu2 %v5557_v0  ;;  %v6141_v60 = vor.u32 %v8088_v54, %v6138_v55  ;;  %v6397_v0 = vor.u32 %v8152_v56, %v6394_v57  ;;  %v6242_v50 = vld [vmem:[%s13155_s1 + $0x7a8] sm:$0xf0]  ;;  %v6269_v55 = vor.u32 %v8120_v42, %v6266_v43 }
  0x7e   :  { %v6498_v54 = vld [vmem:[%s13155_s1 + $0xfa8] sm:$0xf0]  ;;  %v6241_v56 = vor.u32 %v8117_v45, %v6240_v44  ;;  %v6080_v45 = vld [vmem:[%s13155_s1 + $0x228] sm:$0xf] }
  0x7f   :  { %994 = vmatpush.bf16.msrb.mxu1 %v5809_v63  ;;  %1022 = vmatpush.bf16.msrb.mxu3 %v5813_v4  ;;  %v6360_v63 = vld [vmem:[%s13155_s1 + $0xb20] sm:$0xf]  ;;  %v8144_v4 = vld [vmem:[%s13155_s1 + $0xb24] sm:$0xf]  ;;  %v6501_v62 = vor.u32 %v8177_v53, %v6498_v54  ;;  %v8081_v38 = vld [vmem:[%s13155_s1 + $0x32c] sm:$0xf] }
  0x80   :  { %v6361_v7 = vor.u32 %v8148_v1, %v6360_v63  ;;  %v6365_v13 = vor.u32 %v8144_v4, %v6362_v5  ;;  %v8173_v63 = vld [vmem:[%s13155_s1 + $0xea4] sm:$0xf0]  ;;  %v6210_v1 = vld [vmem:[%s13155_s1 + $0x6a8] sm:$0xf0] }
  0x81   :  { %981 = vmatpush.bf16.msrb.mxu0 %v5521_v12  ;;  %1009 = vmatpush.bf16.msrb.mxu2 %v5525_v18  ;;  %v6328_v12 = vld [vmem:[%s13155_s1 + $0xa20] sm:$0xf]  ;;  %v8136_v18 = vld [vmem:[%s13155_s1 + $0xa24] sm:$0xf]  ;;  %v6465_v5 = vor.u32 %v8173_v63, %v6464_v61  ;;  %v6338_v53 = vld [vmem:[%s13155_s1 + $0xaa8] sm:$0xf0] }
  0x82   :  { %v6333_v26 = vor.u32 %v8136_v18, %v6330_v19  ;;  %v8069_v61 = vld [vmem:[%s13155_s1 + $0x1a4] sm:$0xf0] }
  0x83   :  { %995 = vmatpush.bf16.msrb.mxu1 %v5777_v17  ;;  %1023 = vmatpush.bf16.msrb.mxu3 %v5781_v21  ;;  %v6074_v17 = vld [vmem:[%s13155_s1 + $0x2a0] sm:$0xf0]  ;;  %v6329_v21 = vor.u32 %v8140_v14, %v6328_v12  ;;  %v8165_v12 = vld [vmem:[%s13155_s1 + $0xda4] sm:$0xf0]  ;;  %v6178_v14 = vld [vmem:[%s13155_s1 + $0x5a8] sm:$0xf0] }
  0x84   :  { %982 = vmatmul.bf16.vlgmr.msrb.gmra.mxu0 %v8856_v8  ;;  %1010 = vmatmul.bf16.vlgmr.msrb.gmra.mxu2 %v8856_v8  ;;  %v6433_v19 = vor.u32 %v8165_v12, %v6432_v10  ;;  %v8061_v10 = vld [vmem:[%s13155_s1 + $0xa4] sm:$0xf0] }
  0x85   :  { %1798 = vmatpush.bf16.msra.mxu0 %v6233_v22  ;;  %1826 = vmatpush.bf16.msra.mxu2 %v6237_v24  ;;  %v6077_v22 = vor.u32 %v8072_v16, %v6074_v17  ;;  %v8068_v24 = vld [vmem:[%s13155_s1 + $0x19c] sm:$0xf0]  ;;  %v8161_v16 = vld [vmem:[%s13155_s1 + $0xd2c] sm:$0xf] }
  0x86   :  { %996 = vmatmul.bf16.vlgmr.msrb.gmra.mxu1 %v8873_v15  ;;  %1024 = vmatmul.bf16.vlgmr.msrb.gmra.mxu3 %v8873_v15  ;;  %v6434_v17 = vld [vmem:[%s13155_s1 + $0xda8] sm:$0xf0] }
  0x87   :  { %1812 = vmatpush.bf16.msra.mxu1 %v6489_v23  ;;  %1840 = vmatpush.bf16.msra.mxu3 %v6493_v28  ;;  %v6040_v23 = vld [vmem:[%s13155_s1 + $0x120] sm:$0xf]  ;;  %v8064_v28 = vld [vmem:[%s13155_s1 + $0x124] sm:$0xf] }
  0x88   :  { %v6041_v32 = vor.u32 %v8068_v24, %v6040_v23  ;;  %v6400_v23 = vld [vmem:[%s13155_s1 + $0xc28] sm:$0xf]  ;;  %v6437_v24 = vor.u32 %v8161_v16, %v6434_v17  ;;  %v8057_v17 = vld [vmem:[%s13155_s1 + $0x2c] sm:$0xf] }
  0x89   :  { %1799 = vmatpush.bf16.msra.mxu0 %v6201_v34  ;;  %1827 = vmatpush.bf16.msra.mxu2 %v6205_v36  ;;  %v8060_v34 = vld [vmem:[%s13155_s1 + $0x9c] sm:$0xf0]  ;;  %v6045_v36 = vor.u32 %v8064_v28, %v6042_v29  ;;  %v8153_v28 = vld [vmem:[%s13155_s1 + $0xc2c] sm:$0xf]  ;;  %v8125_v16 = vld [vmem:[%s13155_s1 + $0x8a4] sm:$0xf0] }
  0x8a   :  { %v6402_v29 = vld [vmem:[%s13155_s1 + $0xca8] sm:$0xf0] }
  0x8b   :  { %1813 = vmatpush.bf16.msra.mxu1 %v6457_v35  ;;  %1841 = vmatpush.bf16.msra.mxu3 %v6461_v40  ;;  %v6297_v35 = vor.u32 %v8132_v27, %v6296_v25  ;;  %v6301_v40 = vor.u32 %v8128_v30, %v6298_v31  ;;  %v8157_v25 = vld [vmem:[%s13155_s1 + $0xca4] sm:$0xf0]  ;;  %v6146_v27 = vld [vmem:[%s13155_s1 + $0x4a8] sm:$0xf0] }
  0x8c   :  { %v6401_v31 = vor.u32 %v8157_v25, %v6400_v23  ;;  %v8118_v23 = vld [vmem:[%s13155_s1 + $0x7ac] sm:$0xf0] }
  0x8d   :  { %1800 = vmatpush.bf16.msra.mxu0 %v6169_v46  ;;  %1828 = vmatpush.bf16.msra.mxu2 %v6173_v48  ;;  %v6496_v46 = vld [vmem:[%s13155_s1 + $0xf28] sm:$0xf] }
  0x8e   :  { %v8181_v48 = vld [vmem:[%s13155_s1 + $0xfa4] sm:$0xf0] }
  0x8f   :  { %1814 = vmatpush.bf16.msra.mxu1 %v6425_v47  ;;  %1842 = vmatpush.bf16.msra.mxu3 %v6429_v52  ;;  %v6009_v47 = vor.u32 %v8060_v34, %v6008_v33  ;;  %v6013_v52 = vor.u32 %v8056_v39, %v6010_v41  ;;  %v6497_v57 = vor.u32 %v8181_v48, %v6496_v46  ;;  %v6112_v33 = vld [vmem:[%s13155_s1 + $0x328] sm:$0xf]  ;;  %v6114_v39 = vld [vmem:[%s13155_s1 + $0x3a8] sm:$0xf0] }
  0x90   :  { %v8085_v34 = vld [vmem:[%s13155_s1 + $0x3a4] sm:$0xf0]  ;;  %v6370_v41 = vld [vmem:[%s13155_s1 + $0xba8] sm:$0xf0]  ;;  %v6117_v44 = vor.u32 %v8081_v38, %v6114_v39  ;;  %v8110_v38 = vld [vmem:[%s13155_s1 + $0x6ac] sm:$0xf0] }
  0x91   :  { %1801 = vmatpush.bf16.msra.mxu0 %v6137_v58  ;;  %1829 = vmatpush.bf16.msra.mxu2 %v6141_v60  ;;  %v6245_v58 = vor.u32 %v8113_v49, %v6242_v50  ;;  %v8109_v60 = vld [vmem:[%s13155_s1 + $0x6a4] sm:$0xf0]  ;;  %v6113_v42 = vor.u32 %v8085_v34, %v6112_v33  ;;  %v8073_v50 = vld [vmem:[%s13155_s1 + $0x22c] sm:$0xf]  ;;  %v6472_v39 = vld [vmem:[%s13155_s1 + $0xe30] sm:$0xf] }
  0x92   :  { %v8077_v46 = vld [vmem:[%s13155_s1 + $0x2a4] sm:$0xf0] }
  0x93   :  { %1815 = vmatpush.bf16.msra.mxu1 %v6393_v59  ;;  %1843 = vmatpush.bf16.msra.mxu3 %v6397_v0  ;;  %v6208_v59 = vld [vmem:[%s13155_s1 + $0x628] sm:$0xf]  ;;  %v8105_v0 = vld [vmem:[%s13155_s1 + $0x62c] sm:$0xf] }
  0x94   :  { %v6209_v4 = vor.u32 %v8109_v60, %v6208_v59  ;;  %v8141_v49 = vld [vmem:[%s13155_s1 + $0xaa4] sm:$0xf0] }
  0x95   :  { %1802 = vmatpush.bf16.msra.mxu0 %v6105_v6  ;;  %1830 = vmatpush.bf16.msra.mxu2 %v6109_v9  ;;  %v6213_v6 = vor.u32 %v8105_v0, %v6210_v1  ;;  %v8101_v9 = vld [vmem:[%s13155_s1 + $0x5a4] sm:$0xf0]  ;;  %v8065_v1 = vld [vmem:[%s13155_s1 + $0x12c] sm:$0xf] }
  0x96   :  { %v6048_v60 = vld [vmem:[%s13155_s1 + $0x128] sm:$0xf] }
  0x97   :  { %1816 = vmatpush.bf16.msra.mxu1 %v6361_v7  ;;  %1844 = vmatpush.bf16.msra.mxu3 %v6365_v13  ;;  %v6176_v7 = vld [vmem:[%s13155_s1 + $0x528] sm:$0xf]  ;;  %v8097_v13 = vld [vmem:[%s13155_s1 + $0x52c] sm:$0xf] }
  0x98   :  { %v6177_v18 = vor.u32 %v8101_v9, %v6176_v7  ;;  %v8133_v0 = vld [vmem:[%s13155_s1 + $0x9a4] sm:$0xf0]  ;;  %v6049_v7 = vor.u32 %v8069_v61, %v6048_v60  ;;  %v6442_v60 = vld [vmem:[%s13155_s1 + $0xdb0] sm:$0xf0] }
  0x99   :  { %1803 = vmatpush.bf16.msra.mxu0 %v6073_v20  ;;  %1831 = vmatpush.bf16.msra.mxu2 %v6077_v22  ;;  %v6181_v20 = vor.u32 %v8097_v13, %v6178_v14  ;;  %v8093_v22 = vld [vmem:[%s13155_s1 + $0x4a4] sm:$0xf0]  ;;  %v6053_v13 = vor.u32 %v8065_v1, %v6050_v2  ;;  %v8094_v1 = vld [vmem:[%s13155_s1 + $0x4ac] sm:$0xf0] }
  0x9a   :  { %v6016_v9 = vld [vmem:[%s13155_s1 + $0x28] sm:$0xf]  ;;  %v6408_v2 = vld [vmem:[%s13155_s1 + $0xc30] sm:$0xf] }
  0x9b   :  { %1817 = vmatpush.bf16.msra.mxu1 %v6329_v21  ;;  %1845 = vmatpush.bf16.msra.mxu3 %v6333_v26  ;;  %v6144_v21 = vld [vmem:[%s13155_s1 + $0x428] sm:$0xf]  ;;  %v8089_v26 = vld [vmem:[%s13155_s1 + $0x42c] sm:$0xf]  ;;  %v6017_v25 = vor.u32 %v8061_v10, %v6016_v9  ;;  %v8154_v10 = vld [vmem:[%s13155_s1 + $0xc34] sm:$0xf] }
  0x9c   :  { %v6145_v30 = vor.u32 %v8093_v22, %v6144_v21  ;;  %v6272_v14 = vld [vmem:[%s13155_s1 + $0x828] sm:$0xf]  ;;  %v6274_v21 = vld [vmem:[%s13155_s1 + $0x8a8] sm:$0xf0]  ;;  %v6248_v22 = vld [vmem:[%s13155_s1 + $0x730] sm:$0xf] }
  0x9d   :  { %1804 = vmatpush.bf16.msra.mxu0 %v6041_v32  ;;  %1832 = vmatpush.bf16.msra.mxu2 %v6045_v36  ;;  %v6149_v32 = vor.u32 %v8089_v26, %v6146_v27  ;;  %v6405_v36 = vor.u32 %v8153_v28, %v6402_v29  ;;  %v8182_v26 = vld [vmem:[%s13155_s1 + $0xfac] sm:$0xf0]  ;;  %v8114_v27 = vld [vmem:[%s13155_s1 + $0x734] sm:$0xf]  ;;  %v6273_v29 = vor.u32 %v8125_v16, %v6272_v14 }
  0x9e   :  { %v6250_v28 = vld [vmem:[%s13155_s1 + $0x7b0] sm:$0xf0]  ;;  %v6249_v34 = vor.u32 %v8118_v23, %v6248_v22  ;;  %v8150_v23 = vld [vmem:[%s13155_s1 + $0xbac] sm:$0xf0] }
  0x9f   :  { %1818 = vmatpush.bf16.msra.mxu1 %v6297_v35  ;;  %1846 = vmatpush.bf16.msra.mxu3 %v6301_v40  ;;  %v6368_v35 = vld [vmem:[%s13155_s1 + $0xb28] sm:$0xf]  ;;  %v8145_v40 = vld [vmem:[%s13155_s1 + $0xb2c] sm:$0xf] }
  0xa0   :  { %v6369_v43 = vor.u32 %v8149_v37, %v6368_v35  ;;  %v6373_v48 = vor.u32 %v8145_v40, %v6370_v41  ;;  %v6216_v37 = vld [vmem:[%s13155_s1 + $0x630] sm:$0xf] }
  0xa1   :  { %1805 = vmatpush.bf16.msra.mxu0 %v6009_v47  ;;  %1833 = vmatpush.bf16.msra.mxu2 %v6013_v52  ;;  %v6336_v47 = vld [vmem:[%s13155_s1 + $0xa28] sm:$0xf]  ;;  %v8137_v52 = vld [vmem:[%s13155_s1 + $0xa2c] sm:$0xf]  ;;  %v8174_v41 = vld [vmem:[%s13155_s1 + $0xeac] sm:$0xf0] }
  0xa2   :  { %v6341_v63 = vor.u32 %v8137_v52, %v6338_v53 }
  0xa3   :  { %1819 = vmatpush.bf16.msra.mxu1 %v6265_v51  ;;  %1847 = vmatpush.bf16.msra.mxu3 %v6269_v55  ;;  %v6082_v51 = vld [vmem:[%s13155_s1 + $0x2a8] sm:$0xf0]  ;;  %v815_v54 = vpop.f32.mrf.mxu0 }
  0xa4   :  { %1806 = vmatmul.bf16.vlgmr.msra.gmra.mxu0 %v8856_v8  ;;  %1834 = vmatmul.bf16.vlgmr.msra.gmra.mxu2 %v8856_v8  ;;  %v6085_v59 = vor.u32 %v8073_v50, %v6082_v51  ;;  %v8102_v50 = vld [vmem:[%s13155_s1 + $0x5ac] sm:$0xf0] }
  0xa5   :  { %1854 = vmatpush.bf16.msrb.mxu0 %v6241_v56  ;;  %1882 = vmatpush.bf16.msrb.mxu2 %v6245_v58  ;;  %v829_v55 = vpop.f32.mrf.mxu1  ;;  %v6081_v56 = vor.u32 %v8077_v46, %v6080_v45  ;;  %v6337_v58 = vor.u32 %v8141_v49, %v6336_v47  ;;  %v6474_v45 = vld [vmem:[%s13155_s1 + $0xeb0] sm:$0xf0]  ;;  %v6217_v46 = vor.u32 %v8110_v38, %v6216_v37  ;;  %v6184_v49 = vld [vmem:[%s13155_s1 + $0x530] sm:$0xf] }
  0xa6   :  { %1820 = vmatmul.bf16.vlgmr.msra.gmra.mxu1 %v8873_v15  ;;  %1848 = vmatmul.bf16.vlgmr.msra.gmra.mxu3 %v8873_v15  ;;  %v6473_v47 = vor.u32 %v8174_v41, %v6472_v39  ;;  %v6440_v51 = vld [vmem:[%s13155_s1 + $0xd30] sm:$0xf]  ;;  %v6185_v61 = vor.u32 %v8102_v50, %v6184_v49  ;;  %v8074_v37 = vld [vmem:[%s13155_s1 + $0x234] sm:$0xf] }
  0xa7   :  { %1868 = vmatpush.bf16.msrb.mxu1 %v6497_v57  ;;  %1896 = vmatpush.bf16.msrb.mxu3 %v6501_v62  ;;  %v9717_v57 = vadd.f32 %v829_v55, %v815_v54  ;;  %v6304_v62 = vld [vmem:[%s13155_s1 + $0x928] sm:$0xf]  ;;  %v8166_v55 = vld [vmem:[%s13155_s1 + $0xdac] sm:$0xf0]  ;;  %v6090_v38 = vld [vmem:[%s13155_s1 + $0x2b0] sm:$0xf0] }
  0xa8   :  { %v6305_v12 = vor.u32 %v8133_v0, %v6304_v62  ;;  %v6441_v62 = vor.u32 %v8166_v55, %v6440_v51  ;;  %v6152_v0 = vld [vmem:[%s13155_s1 + $0x430] sm:$0xf]  ;;  %v8138_v41 = vld [vmem:[%s13155_s1 + $0xa34] sm:$0xf] }
  0xa9   :  { %1855 = vmatpush.bf16.msrb.mxu0 %v6209_v4  ;;  %1883 = vmatpush.bf16.msrb.mxu2 %v6213_v6  ;;  %v6306_v4 = vld [vmem:[%s13155_s1 + $0x9a8] sm:$0xf0]  ;;  %v6312_v49 = vld [vmem:[%s13155_s1 + $0x930] sm:$0xf]  ;;  %v6058_v55 = vld [vmem:[%s13155_s1 + $0x1b0] sm:$0xf0] }
  0xaa   :  { %v8134_v51 = vld [vmem:[%s13155_s1 + $0x9ac] sm:$0xf0] }
  0xab   :  { %1869 = vmatpush.bf16.msrb.mxu1 %v6465_v5  ;;  %1897 = vmatpush.bf16.msrb.mxu3 %v6469_v11  ;;  %v843_v5 = vpop.f32.mrf.mxu2  ;;  %v857_v6 = vpop.f32.mrf.mxu3 }
  0xac   :  { %v9749_v11 = vadd.f32 %v857_v6, %v843_v5  ;;  %v9826_v52 = vpop.f32.mrf.mxu0  ;;  %v8090_v5 = vld [vmem:[%s13155_s1 + $0x434] sm:$0xf] }
  0xad   :  { %1856 = vmatpush.bf16.msrb.mxu0 %v6177_v18  ;;  %1884 = vmatpush.bf16.msrb.mxu2 %v6181_v20  ;;  %v6309_v18 = vor.u32 %v8129_v3, %v6306_v4  ;;  %v8121_v20 = vld [vmem:[%s13155_s1 + $0x82c] sm:$0xf]  ;;  %v9828_v53 = vpop.f32.mrf.mxu1  ;;  %v8158_v4 = vld [vmem:[%s13155_s1 + $0xcac] sm:$0xf0]  ;;  %v6154_v6 = vld [vmem:[%s13155_s1 + $0x4b0] sm:$0xf0] }
  0xae   :  { %v6277_v33 = vor.u32 %v8121_v20, %v6274_v21  ;;  %v6409_v14 = vor.u32 %v8158_v4, %v6408_v2  ;;  %v6157_v16 = vor.u32 %v8090_v5, %v6154_v6  ;;  %v8058_v2 = vld [vmem:[%s13155_s1 + $0x34] sm:$0xf] }
  0xaf   :  { %1870 = vmatpush.bf16.msrb.mxu1 %v6433_v19  ;;  %1898 = vmatpush.bf16.msrb.mxu3 %v6437_v24  ;;  %v6018_v19 = vld [vmem:[%s13155_s1 + $0xa8] sm:$0xf0]  ;;  %v6504_v24 = vld [vmem:[%s13155_s1 + $0xf30] sm:$0xf]  ;;  %v6026_v4 = vld [vmem:[%s13155_s1 + $0xb0] sm:$0xf0] }
  0xb0   :  { %v6505_v35 = vor.u32 %v8182_v26, %v6504_v24  ;;  %v8082_v24 = vld [vmem:[%s13155_s1 + $0x334] sm:$0xf] }
  0xb1   :  { %1857 = vmatpush.bf16.msrb.mxu0 %v6145_v30  ;;  %1885 = vmatpush.bf16.msrb.mxu2 %v6149_v32  ;;  %v6021_v30 = vor.u32 %v8057_v17, %v6018_v19  ;;  %v6506_v32 = vld [vmem:[%s13155_s1 + $0xfb0] sm:$0xf0]  ;;  %v6120_v17 = vld [vmem:[%s13155_s1 + $0x330] sm:$0xf] }
  0xb2   :  { %v6376_v19 = vld [vmem:[%s13155_s1 + $0xb30] sm:$0xf]  ;;  %v8122_v5 = vld [vmem:[%s13155_s1 + $0x834] sm:$0xf] }
  0xb3   :  { %1871 = vmatpush.bf16.msrb.mxu1 %v6401_v31  ;;  %1899 = vmatpush.bf16.msrb.mxu3 %v6405_v36  ;;  %v8178_v31 = vld [vmem:[%s13155_s1 + $0xf34] sm:$0xf]  ;;  %v6253_v36 = vor.u32 %v8114_v27, %v6250_v28  ;;  %v9869_v9 = vpop.f32.mrf.mxu3 }
  0xb4   :  { %v6509_v40 = vor.u32 %v8178_v31, %v6506_v32  ;;  %v8146_v27 = vld [vmem:[%s13155_s1 + $0xb34] sm:$0xf]  ;;  %v6088_v32 = vld [vmem:[%s13155_s1 + $0x230] sm:$0xf] }
  0xb5   :  { %1858 = vmatpush.bf16.msrb.mxu0 %v6113_v42  ;;  %1886 = vmatpush.bf16.msrb.mxu2 %v6117_v44  ;;  %v8106_v42 = vld [vmem:[%s13155_s1 + $0x634] sm:$0xf] }
  0xb6   :  { %v8170_v44 = vld [vmem:[%s13155_s1 + $0xe34] sm:$0xf] }
  0xb7   :  { %1872 = vmatpush.bf16.msrb.mxu1 %v6369_v43  ;;  %1900 = vmatpush.bf16.msrb.mxu3 %v6373_v48  ;;  %v6218_v43 = vld [vmem:[%s13155_s1 + $0x6b0] sm:$0xf0]  ;;  %v6477_v54 = vor.u32 %v8170_v44, %v6474_v45 }
  0xb8   :  { %v6221_v48 = vor.u32 %v8106_v42, %v6218_v43  ;;  %v6378_v28 = vld [vmem:[%s13155_s1 + $0xbb0] sm:$0xf0] }
  0xb9   :  { %1859 = vmatpush.bf16.msrb.mxu0 %v6081_v56  ;;  %1887 = vmatpush.bf16.msrb.mxu2 %v6085_v59  ;;  %v8098_v56 = vld [vmem:[%s13155_s1 + $0x534] sm:$0xf] }
  0xba   :  { %v8162_v59 = vld [vmem:[%s13155_s1 + $0xd34] sm:$0xf] }
  0xbb   :  { %1873 = vmatpush.bf16.msrb.mxu1 %v6337_v58  ;;  %1901 = vmatpush.bf16.msrb.mxu3 %v6341_v63  ;;  %v6186_v58 = vld [vmem:[%s13155_s1 + $0x5b0] sm:$0xf0]  ;;  %v6445_v3 = vor.u32 %v8162_v59, %v6442_v60  ;;  %v6024_v60 = vld [vmem:[%s13155_s1 + $0x30] sm:$0xf] }
  0xbc   :  { %v6189_v63 = vor.u32 %v8098_v56, %v6186_v58  ;;  %v6346_v42 = vld [vmem:[%s13155_s1 + $0xab0] sm:$0xf0] }
  0xbd   :  { %1860 = vmatpush.bf16.msrb.mxu0 %v6049_v7  ;;  %1888 = vmatpush.bf16.msrb.mxu2 %v6053_v13  ;;  %v9867_v7 = vpop.f32.mrf.mxu2  ;;  %v6153_v13 = vor.u32 %v8094_v1, %v6152_v0  ;;  %v6349_v50 = vor.u32 %v8138_v41, %v6346_v42  ;;  %v8130_v56 = vld [vmem:[%s13155_s1 + $0x934] sm:$0xf]  ;;  %v6280_v0 = vld [vmem:[%s13155_s1 + $0x830] sm:$0xf]  ;;  %v8103_v41 = vld [vmem:[%s13155_s1 + $0x5b4] sm:$0xf0] }
  0xbe   :  { %v6314_v58 = vld [vmem:[%s13155_s1 + $0x9b0] sm:$0xf0]  ;;  %v8126_v1 = vld [vmem:[%s13155_s1 + $0x8ac] sm:$0xf0]  ;;  %v6448_v42 = vld [vmem:[%s13155_s1 + $0xd38] sm:$0xf] }
  0xbf   :  { %1874 = vmatpush.bf16.msrb.mxu1 %v6305_v12  ;;  %1902 = vmatpush.bf16.msrb.mxu3 %v6309_v18  ;;  %v6410_v12 = vld [vmem:[%s13155_s1 + $0xcb0] sm:$0xf0]  ;;  %v8086_v18 = vld [vmem:[%s13155_s1 + $0x3ac] sm:$0xf0] }
  0xc0   :  { %v6413_v22 = vor.u32 %v8154_v10, %v6410_v12  ;;  %v6282_v6 = vld [vmem:[%s13155_s1 + $0x8b0] sm:$0xf0]  ;;  %v6256_v10 = vld [vmem:[%s13155_s1 + $0x738] sm:$0xf] }
  0xc1   :  { %1861 = vmatpush.bf16.msrb.mxu0 %v6017_v25  ;;  %1889 = vmatpush.bf16.msrb.mxu2 %v6021_v30  ;;  %v871_v20 = vpop.f32.mrf.mxu0  ;;  %v6122_v25 = vld [vmem:[%s13155_s1 + $0x3b0] sm:$0xf0]  ;;  %v6377_v30 = vor.u32 %v8150_v23, %v6376_v19  ;;  %v8119_v12 = vld [vmem:[%s13155_s1 + $0x7b4] sm:$0xf0]  ;;  %v6281_v19 = vor.u32 %v8126_v1, %v6280_v0  ;;  %v6285_v23 = vor.u32 %v8122_v5, %v6282_v6  ;;  %v6162_v0 = vld [vmem:[%s13155_s1 + $0x4b8] sm:$0xf0] }
  0xc2   :  { %v6125_v31 = vor.u32 %v8082_v24, %v6122_v25  ;;  %v6257_v24 = vor.u32 %v8119_v12, %v6256_v10  ;;  %v6128_v12 = vld [vmem:[%s13155_s1 + $0x338] sm:$0xf] }
  0xc3   :  { %1875 = vmatpush.bf16.msrb.mxu1 %v6273_v29  ;;  %1903 = vmatpush.bf16.msrb.mxu3 %v6277_v33  ;;  %v885_v21 = vpop.f32.mrf.mxu1  ;;  %v6121_v29 = vor.u32 %v8086_v18, %v6120_v17  ;;  %v8078_v33 = vld [vmem:[%s13155_s1 + $0x2ac] sm:$0xf0]  ;;  %v8115_v17 = vld [vmem:[%s13155_s1 + $0x73c] sm:$0xf] }
  0xc4   :  { %1862 = vmatmul.bf16.vlgmr.msrb.gmra.mxu0 %v8856_v8  ;;  %1890 = vmatmul.bf16.vlgmr.msrb.gmra.mxu2 %v8856_v8  ;;  %v9895_v26 = vadd.f32 %v885_v21, %v871_v20  ;;  %v6089_v44 = vor.u32 %v8078_v33, %v6088_v32  ;;  %v6258_v18 = vld [vmem:[%s13155_s1 + $0x7b8] sm:$0xf0]  ;;  %v6029_v20 = vor.u32 %v8058_v2, %v6026_v4  ;;  %v8175_v32 = vld [vmem:[%s13155_s1 + $0xeb4] sm:$0xf0] }
  0xc5   :  { %1910 = vmatpush.bf16.msra.mxu0 %v6249_v34  ;;  %1938 = vmatpush.bf16.msra.mxu2 %v6253_v36  ;;  %v6344_v34 = vld [vmem:[%s13155_s1 + $0xa30] sm:$0xf]  ;;  %v8179_v21 = vld [vmem:[%s13155_s1 + $0xf3c] sm:$0xf] }
  0xc6   :  { %1876 = vmatmul.bf16.vlgmr.msrb.gmra.mxu1 %v8873_v15  ;;  %1904 = vmatmul.bf16.vlgmr.msrb.gmra.mxu3 %v8873_v15  ;;  %v8142_v36 = vld [vmem:[%s13155_s1 + $0xaac] sm:$0xf0]  ;;  %v8107_v33 = vld [vmem:[%s13155_s1 + $0x63c] sm:$0xf] }
  0xc7   :  { %1924 = vmatpush.bf16.msra.mxu1 %v6505_v35  ;;  %1952 = vmatpush.bf16.msra.mxu3 %v6509_v40  ;;  %v6381_v35 = vor.u32 %v8146_v27, %v6378_v28  ;;  %v899_v39 = vpop.f32.mrf.mxu2  ;;  %v6345_v45 = vor.u32 %v8142_v36, %v6344_v34  ;;  %v6261_v27 = vor.u32 %v8115_v17, %v6258_v18  ;;  %v6224_v28 = vld [vmem:[%s13155_s1 + $0x638] sm:$0xf]  ;;  %v6226_v34 = vld [vmem:[%s13155_s1 + $0x6b8] sm:$0xf0] }
  0xc8   :  { %v6482_v36 = vld [vmem:[%s13155_s1 + $0xeb8] sm:$0xf0] }
  0xc9   :  { %1911 = vmatpush.bf16.msra.mxu0 %v6217_v46  ;;  %1939 = vmatpush.bf16.msra.mxu2 %v6221_v48  ;;  %v913_v40 = vpop.f32.mrf.mxu3  ;;  %v6093_v46 = vor.u32 %v8074_v37, %v6090_v38  ;;  %v8070_v48 = vld [vmem:[%s13155_s1 + $0x1ac] sm:$0xf0]  ;;  %v6418_v4 = vld [vmem:[%s13155_s1 + $0xcb8] sm:$0xf0] }
  0xca   :  { %v9927_v43 = vadd.f32 %v913_v40, %v899_v39  ;;  %v6229_v39 = vor.u32 %v8107_v33, %v6226_v34  ;;  %v6192_v40 = vld [vmem:[%s13155_s1 + $0x538] sm:$0xf]  ;;  %v8075_v34 = vld [vmem:[%s13155_s1 + $0x23c] sm:$0xf] }
  0xcb   :  { %1925 = vmatpush.bf16.msra.mxu1 %v6473_v47  ;;  %1953 = vmatpush.bf16.msra.mxu3 %v6477_v54  ;;  %v6056_v47 = vld [vmem:[%s13155_s1 + $0x130] sm:$0xf]  ;;  %v8066_v54 = vld [vmem:[%s13155_s1 + $0x134] sm:$0xf]  ;;  %v8143_v33 = vld [vmem:[%s13155_s1 + $0xab4] sm:$0xf0] }
  0xcc   :  { %v6057_v59 = vor.u32 %v8070_v48, %v6056_v47  ;;  %v8167_v47 = vld [vmem:[%s13155_s1 + $0xdb4] sm:$0xf0]  ;;  %v8099_v48 = vld [vmem:[%s13155_s1 + $0x53c] sm:$0xf] }
  0xcd   :  { %1912 = vmatpush.bf16.msra.mxu0 %v6185_v61  ;;  %1940 = vmatpush.bf16.msra.mxu2 %v6189_v63  ;;  %v8062_v61 = vld [vmem:[%s13155_s1 + $0xac] sm:$0xf0]  ;;  %v6061_v63 = vor.u32 %v8066_v54, %v6058_v55  ;;  %v6193_v54 = vor.u32 %v8103_v41, %v6192_v40  ;;  %v6449_v55 = vor.u32 %v8167_v47, %v6448_v42  ;;  %v6064_v47 = vld [vmem:[%s13155_s1 + $0x138] sm:$0xf] }
  0xcf   :  { %1926 = vmatpush.bf16.msra.mxu1 %v6441_v62  ;;  %1954 = vmatpush.bf16.msra.mxu3 %v6445_v3  ;;  %v6313_v62 = vor.u32 %v8134_v51, %v6312_v49  ;;  %v6317_v3 = vor.u32 %v8130_v56, %v6314_v58  ;;  %v6194_v49 = vld [vmem:[%s13155_s1 + $0x5b8] sm:$0xf0]  ;;  %v6160_v58 = vld [vmem:[%s13155_s1 + $0x438] sm:$0xf]  ;;  %v10075_v1 = vpop.f32.mrf.mxu2 }
  0xd0   :  { %v6450_v51 = vld [vmem:[%s13155_s1 + $0xdb8] sm:$0xf0]  ;;  %v6197_v56 = vor.u32 %v8099_v48, %v6194_v49  ;;  %v8071_v48 = vld [vmem:[%s13155_s1 + $0x1b4] sm:$0xf0] }
  0xd1   :  { %1913 = vmatpush.bf16.msra.mxu0 %v6153_v13  ;;  %1941 = vmatpush.bf16.msra.mxu2 %v6157_v16  ;;  %v6512_v13 = vld [vmem:[%s13155_s1 + $0xf38] sm:$0xf]  ;;  %v10077_v2 = vpop.f32.mrf.mxu3 }
  0xd2   :  { %v8183_v16 = vld [vmem:[%s13155_s1 + $0xfb4] sm:$0xf0] }
  0xd3   :  { %1927 = vmatpush.bf16.msra.mxu1 %v6409_v14  ;;  %1955 = vmatpush.bf16.msra.mxu3 %v6413_v22  ;;  %v6025_v14 = vor.u32 %v8062_v61, %v6024_v60  ;;  %v6514_v22 = vld [vmem:[%s13155_s1 + $0xfb8] sm:$0xf0]  ;;  %v6513_v25 = vor.u32 %v8183_v16, %v6512_v13  ;;  %v6416_v60 = vld [vmem:[%s13155_s1 + $0xc38] sm:$0xf] }
  0xd4   :  { %v8087_v13 = vld [vmem:[%s13155_s1 + $0x3b4] sm:$0xf0] }
  0xd5   :  { %1914 = vmatpush.bf16.msra.mxu0 %v6121_v29  ;;  %1942 = vmatpush.bf16.msra.mxu2 %v6125_v31  ;;  %v8111_v29 = vld [vmem:[%s13155_s1 + $0x6b4] sm:$0xf0]  ;;  %v6517_v31 = vor.u32 %v8179_v21, %v6514_v22  ;;  %v6130_v21 = vld [vmem:[%s13155_s1 + $0x3b8] sm:$0xf0] }
  0xd6   :  { %v6225_v37 = vor.u32 %v8111_v29, %v6224_v28  ;;  %v6096_v29 = vld [vmem:[%s13155_s1 + $0x238] sm:$0xf] }
  0xd7   :  { %1928 = vmatpush.bf16.msra.mxu1 %v6377_v30  ;;  %1956 = vmatpush.bf16.msra.mxu3 %v6381_v35  ;;  %v6480_v30 = vld [vmem:[%s13155_s1 + $0xe38] sm:$0xf]  ;;  %v8171_v35 = vld [vmem:[%s13155_s1 + $0xe3c] sm:$0xf] }
  0xd8   :  { %v6481_v38 = vor.u32 %v8175_v32, %v6480_v30  ;;  %v8079_v30 = vld [vmem:[%s13155_s1 + $0x2b4] sm:$0xf0] }
  0xd9   :  { %1915 = vmatpush.bf16.msra.mxu0 %v6089_v44  ;;  %1943 = vmatpush.bf16.msra.mxu2 %v6093_v46  ;;  %v10034_v44 = vpop.f32.mrf.mxu0  ;;  %v6485_v46 = vor.u32 %v8171_v35, %v6482_v36  ;;  %v6098_v35 = vld [vmem:[%s13155_s1 + $0x2b8] sm:$0xf0]  ;;  %v6097_v41 = vor.u32 %v8079_v30, %v6096_v29  ;;  %v6320_v49 = vld [vmem:[%s13155_s1 + $0x938] sm:$0xf] }
  0xdb   :  { %1929 = vmatpush.bf16.msra.mxu1 %v6345_v45  ;;  %1957 = vmatpush.bf16.msra.mxu3 %v6349_v50  ;;  %v10036_v45 = vpop.f32.mrf.mxu1  ;;  %v8163_v50 = vld [vmem:[%s13155_s1 + $0xd3c] sm:$0xf] }
  0xdc   :  { %v6453_v61 = vor.u32 %v8163_v50, %v6450_v51  ;;  %v8135_v51 = vld [vmem:[%s13155_s1 + $0x9b4] sm:$0xf0] }
  0xdd   :  { %1916 = vmatpush.bf16.msra.mxu0 %v6057_v59  ;;  %1944 = vmatpush.bf16.msra.mxu2 %v6061_v63  ;;  %v8095_v59 = vld [vmem:[%s13155_s1 + $0x4b4] sm:$0xf0]  ;;  %v8091_v63 = vld [vmem:[%s13155_s1 + $0x43c] sm:$0xf] }
  0xde   :  { %v6161_v5 = vor.u32 %v8095_v59, %v6160_v58  ;;  %v6165_v10 = vor.u32 %v8091_v63, %v6162_v0  ;;  %v6322_v58 = vld [vmem:[%s13155_s1 + $0x9b8] sm:$0xf0]  ;;  %v6065_v59 = vor.u32 %v8071_v48, %v6064_v47  ;;  %v6288_v0 = vld [vmem:[%s13155_s1 + $0x838] sm:$0xf] }
  0xdf   :  { %1930 = vmatpush.bf16.msra.mxu1 %v6313_v62  ;;  %1958 = vmatpush.bf16.msra.mxu3 %v6317_v3  ;;  %v8159_v62 = vld [vmem:[%s13155_s1 + $0xcb4] sm:$0xf0]  ;;  %v8155_v3 = vld [vmem:[%s13155_s1 + $0xc3c] sm:$0xf] }
  0xe0   :  { %v6417_v6 = vor.u32 %v8159_v62, %v6416_v60  ;;  %v6421_v18 = vor.u32 %v8155_v3, %v6418_v4  ;;  %v6032_v60 = vld [vmem:[%s13155_s1 + $0x38] sm:$0xf]  ;;  %v6321_v62 = vor.u32 %v8135_v51, %v6320_v49  ;;  %v8059_v4 = vld [vmem:[%s13155_s1 + $0x3c] sm:$0xf]  ;;  %v6680_v49 = vld [vmem:[%s13155_s1 + $0x540] sm:$0xf] }
  0xe1   :  { %1917 = vmatpush.bf16.msra.mxu0 %v6025_v14  ;;  %1945 = vmatpush.bf16.msra.mxu2 %v6029_v20  ;;  %v6384_v14 = vld [vmem:[%s13155_s1 + $0xb38] sm:$0xf]  ;;  %v927_v16 = vpop.f32.mrf.mxu0  ;;  %v8083_v20 = vld [vmem:[%s13155_s1 + $0x33c] sm:$0xf]  ;;  %v6936_v51 = vld [vmem:[%s13155_s1 + $0xd40] sm:$0xf] }
  0xe2   :  { %v6133_v28 = vor.u32 %v8083_v20, %v6130_v21  ;;  %v8127_v3 = vld [vmem:[%s13155_s1 + $0x8b4] sm:$0xf0]  ;;  %v6746_v20 = vld [vmem:[%s13155_s1 + $0x7c0] sm:$0xf0] }
  0xe3   :  { %1931 = vmatpush.bf16.msra.mxu1 %v6281_v19  ;;  %1959 = vmatpush.bf16.msra.mxu3 %v6285_v23  ;;  %v941_v17 = vpop.f32.mrf.mxu1  ;;  %v8151_v19 = vld [vmem:[%s13155_s1 + $0xbb4] sm:$0xf0]  ;;  %v8147_v23 = vld [vmem:[%s13155_s1 + $0xb3c] sm:$0xf]  ;;  %v6289_v21 = vor.u32 %v8127_v3, %v6288_v0  ;;  %v6648_v0 = vld [vmem:[%s13155_s1 + $0x440] sm:$0xf] }
  0xe4   :  { %1918 = vmatmul.bf16.vlgmr.msra.gmra.mxu0 %v8856_v8  ;;  %1946 = vmatmul.bf16.vlgmr.msra.gmra.mxu2 %v8856_v8  ;;  %v10103_v22 = vadd.f32 %v941_v17, %v927_v16  ;;  %v7000_v16 = vld [vmem:[%s13155_s1 + $0xf40] sm:$0xf] }
  0xe5   :  { %1966 = vmatpush.bf16.msrb.mxu0 %v6257_v24  ;;  %1994 = vmatpush.bf16.msrb.mxu2 %v6261_v27  ;;  %v6386_v24 = vld [vmem:[%s13155_s1 + $0xbb8] sm:$0xf0]  ;;  %v6385_v27 = vor.u32 %v8151_v19, %v6384_v14  ;;  %v8244_v14 = vld [vmem:[%s13155_s1 + $0x7bc] sm:$0xf0]  ;;  %v8240_v19 = vld [vmem:[%s13155_s1 + $0x744] sm:$0xf] }
  0xe6   :  { %1932 = vmatmul.bf16.vlgmr.msra.gmra.mxu1 %v8873_v15  ;;  %1960 = vmatmul.bf16.vlgmr.msra.gmra.mxu3 %v8873_v15  ;;  %v6389_v32 = vor.u32 %v8147_v23, %v6386_v24  ;;  %v8304_v24 = vld [vmem:[%s13155_s1 + $0xf44] sm:$0xf]  ;;  %v6749_v30 = vor.u32 %v8240_v19, %v6746_v20  ;;  %v8220_v3 = vld [vmem:[%s13155_s1 + $0x4bc] sm:$0xf0] }
  0xe7   :  { %1980 = vmatpush.bf16.msrb.mxu1 %v6513_v25  ;;  %2008 = vmatpush.bf16.msrb.mxu3 %v6517_v31  ;;  %v6129_v25 = vor.u32 %v8087_v13, %v6128_v12  ;;  %v6352_v31 = vld [vmem:[%s13155_s1 + $0xa38] sm:$0xf]  ;;  %v955_v36 = vpop.f32.mrf.mxu2  ;;  %v6290_v12 = vld [vmem:[%s13155_s1 + $0x8b8] sm:$0xf0]  ;;  %v6744_v13 = vld [vmem:[%s13155_s1 + $0x740] sm:$0xf] }
  0xe8   :  { %v6353_v42 = vor.u32 %v8143_v33, %v6352_v31  ;;  %v6712_v31 = vld [vmem:[%s13155_s1 + $0x640] sm:$0xf] }
  0xe9   :  { %1967 = vmatpush.bf16.msrb.mxu0 %v6225_v37  ;;  %1995 = vmatpush.bf16.msrb.mxu2 %v6229_v39  ;;  %v969_v37 = vpop.f32.mrf.mxu3  ;;  %v6354_v39 = vld [vmem:[%s13155_s1 + $0xab8] sm:$0xf0]  ;;  %v6968_v33 = vld [vmem:[%s13155_s1 + $0xe40] sm:$0xf] }
  0xea   :  { %v10135_v40 = vadd.f32 %v969_v37, %v955_v36  ;;  %v8232_v36 = vld [vmem:[%s13155_s1 + $0x644] sm:$0xf] }
  0xeb   :  { %1981 = vmatpush.bf16.msrb.mxu1 %v6481_v38  ;;  %2009 = vmatpush.bf16.msrb.mxu3 %v6485_v46  ;;  %v8139_v38 = vld [vmem:[%s13155_s1 + $0xa3c] sm:$0xf]  ;;  %v6101_v46 = vor.u32 %v8075_v34, %v6098_v35  ;;  %v8300_v35 = vld [vmem:[%s13155_s1 + $0xebc] sm:$0xf0]  ;;  %v6714_v37 = vld [vmem:[%s13155_s1 + $0x6c0] sm:$0xf0] }
  0xec   :  { %v6357_v50 = vor.u32 %v8139_v38, %v6354_v39  ;;  %v10227_v38 = vpop.f32.mrf.mxu0  ;;  %v10229_v39 = vpop.f32.mrf.mxu1  ;;  %v6969_v47 = vor.u32 %v8300_v35, %v6968_v33  ;;  %v6717_v48 = vor.u32 %v8232_v36, %v6714_v37  ;;  %v8272_v33 = vld [vmem:[%s13155_s1 + $0xb44] sm:$0xf] }
  0xed   :  { %1968 = vmatpush.bf16.msrb.mxu0 %v6193_v54  ;;  %1996 = vmatpush.bf16.msrb.mxu2 %v6197_v56  ;;  %v8067_v54 = vld [vmem:[%s13155_s1 + $0x13c] sm:$0xf]  ;;  %13243 = vst [vmem:[#allocation2_spill] sm:$0xff] %v10227_v38 }
  0xee   :  { %v8131_v56 = vld [vmem:[%s13155_s1 + $0x93c] sm:$0xf]  ;;  %13244 = vst [vmem:[#allocation3_spill] sm:$0xff] %v10229_v39 }
  0xef   :  { %1982 = vmatpush.bf16.msrb.mxu1 %v6449_v55  ;;  %2010 = vmatpush.bf16.msrb.mxu3 %v6453_v61  ;;  %v6066_v55 = vld [vmem:[%s13155_s1 + $0x1b8] sm:$0xf0]  ;;  %v8063_v61 = vld [vmem:[%s13155_s1 + $0xb4] sm:$0xf0] }
  0xf0   :  { %v6069_v63 = vor.u32 %v8067_v54, %v6066_v55  ;;  %v6033_v17 = vor.u32 %v8063_v61, %v6032_v60  ;;  %v8292_v55 = vld [vmem:[%s13155_s1 + $0xdbc] sm:$0xf0]  ;;  %v6938_v60 = vld [vmem:[%s13155_s1 + $0xdc0] sm:$0xf0] }
  0xf1   :  { %1969 = vmatpush.bf16.msrb.mxu0 %v6161_v5  ;;  %1997 = vmatpush.bf16.msrb.mxu2 %v6165_v10  ;;  %v6325_v5 = vor.u32 %v8131_v56, %v6322_v58  ;;  %v8123_v10 = vld [vmem:[%s13155_s1 + $0x83c] sm:$0xf]  ;;  %v8224_v56 = vld [vmem:[%s13155_s1 + $0x544] sm:$0xf] }
  0xf2   :  { %v6682_v58 = vld [vmem:[%s13155_s1 + $0x5c0] sm:$0xf0] }
  0xf3   :  { %1983 = vmatpush.bf16.msrb.mxu1 %v6417_v6  ;;  %2011 = vmatpush.bf16.msrb.mxu3 %v6421_v18  ;;  %v6034_v6 = vld [vmem:[%s13155_s1 + $0xb8] sm:$0xf0]  ;;  %v8308_v18 = vld [vmem:[%s13155_s1 + $0xfbc] sm:$0xf0] }
  0xf4   :  { %v6037_v23 = vor.u32 %v8059_v4, %v6034_v6  ;;  %v7001_v29 = vor.u32 %v8308_v18, %v7000_v16  ;;  %v6904_v4 = vld [vmem:[%s13155_s1 + $0xc40] sm:$0xf]  ;;  %v10289_v16 = vpop.f32.mrf.mxu2  ;;  %v6649_v18 = vor.u32 %v8220_v3, %v6648_v0 }
  0xf5   :  { %1970 = vmatpush.bf16.msrb.mxu0 %v6129_v25  ;;  %1998 = vmatpush.bf16.msrb.mxu2 %v6133_v28  ;;  %v7002_v25 = vld [vmem:[%s13155_s1 + $0xfc0] sm:$0xf0]  ;;  %v6745_v28 = vor.u32 %v8244_v14, %v6744_v13  ;;  %v8284_v6 = vld [vmem:[%s13155_s1 + $0xcbc] sm:$0xf0]  ;;  %13245 = vst [vmem:[#allocation4_spill] sm:$0xff] %v10289_v16 }
  0xf6   :  { %v7005_v34 = vor.u32 %v8304_v24, %v7002_v25  ;;  %v8280_v13 = vld [vmem:[%s13155_s1 + $0xc44] sm:$0xf]  ;;  %v6616_v24 = vld [vmem:[%s13155_s1 + $0x340] sm:$0xf] }
  0xf7   :  { %1984 = vmatpush.bf16.msrb.mxu1 %v6385_v27  ;;  %2012 = vmatpush.bf16.msrb.mxu3 %v6389_v32  ;;  %v6293_v27 = vor.u32 %v8123_v10, %v6290_v12  ;;  %v8236_v32 = vld [vmem:[%s13155_s1 + $0x6bc] sm:$0xf0]  ;;  %v8216_v10 = vld [vmem:[%s13155_s1 + $0x444] sm:$0xf] }
  0xf8   :  { %v6650_v12 = vld [vmem:[%s13155_s1 + $0x4c0] sm:$0xf0]  ;;  %v8212_v25 = vld [vmem:[%s13155_s1 + $0x3bc] sm:$0xf0] }
  0xf9   :  { %1971 = vmatpush.bf16.msrb.mxu0 %v6097_v41  ;;  %1999 = vmatpush.bf16.msrb.mxu2 %v6101_v46  ;;  %v8296_v41 = vld [vmem:[%s13155_s1 + $0xe44] sm:$0xf]  ;;  %v6713_v46 = vor.u32 %v8236_v32, %v6712_v31  ;;  %v6617_v35 = vor.u32 %v8212_v25, %v6616_v24  ;;  %v6808_v0 = vld [vmem:[%s13155_s1 + $0x940] sm:$0xf] }
  0xfa   :  { %v6906_v14 = vld [vmem:[%s13155_s1 + $0xcc0] sm:$0xf0] }
  0xfb   :  { %1985 = vmatpush.bf16.msrb.mxu1 %v6353_v42  ;;  %2013 = vmatpush.bf16.msrb.mxu3 %v6357_v50  ;;  %v6970_v42 = vld [vmem:[%s13155_s1 + $0xec0] sm:$0xf0]  ;;  %v8228_v50 = vld [vmem:[%s13155_s1 + $0x5bc] sm:$0xf0] }
  0xfc   :  { %v6973_v54 = vor.u32 %v8296_v41, %v6970_v42  ;;  %v6681_v61 = vor.u32 %v8228_v50, %v6680_v49  ;;  %v8208_v31 = vld [vmem:[%s13155_s1 + $0x344] sm:$0xf]  ;;  %v6584_v41 = vld [vmem:[%s13155_s1 + $0x240] sm:$0xf] }
  0xfd   :  { %1972 = vmatpush.bf16.msrb.mxu0 %v6065_v59  ;;  %2000 = vmatpush.bf16.msrb.mxu2 %v6069_v63  ;;  %v8288_v59 = vld [vmem:[%s13155_s1 + $0xd44] sm:$0xf]  ;;  %v6685_v63 = vor.u32 %v8224_v56, %v6682_v58  ;;  %v8204_v42 = vld [vmem:[%s13155_s1 + $0x2bc] sm:$0xf0] }
  0xfe   :  { %v6618_v32 = vld [vmem:[%s13155_s1 + $0x3c0] sm:$0xf0]  ;;  %v6585_v58 = vor.u32 %v8204_v42, %v6584_v41 }
  0xff   :  { %1986 = vmatpush.bf16.msrb.mxu1 %v6321_v62  ;;  %2014 = vmatpush.bf16.msrb.mxu3 %v6325_v5  ;;  %v6937_v62 = vor.u32 %v8292_v55, %v6936_v51  ;;  %v6941_v5 = vor.u32 %v8288_v59, %v6938_v60  ;;  %v6621_v37 = vor.u32 %v8208_v31, %v6618_v32  ;;  %v8200_v49 = vld [vmem:[%s13155_s1 + $0x244] sm:$0xf]  ;;  %v6752_v31 = vld [vmem:[%s13155_s1 + $0x748] sm:$0xf] }
 0x100   :  { %v6586_v50 = vld [vmem:[%s13155_s1 + $0x2c0] sm:$0xf0]  ;;  %v8245_v32 = vld [vmem:[%s13155_s1 + $0x7c4] sm:$0xf0] }
 0x101   :  { %1973 = vmatpush.bf16.msrb.mxu0 %v6033_v17  ;;  %2001 = vmatpush.bf16.msrb.mxu2 %v6037_v23  ;;  %v10291_v17 = vpop.f32.mrf.mxu3  ;;  %v983_v19 = vpop.f32.mrf.mxu0  ;;  %v6653_v23 = vor.u32 %v8216_v10, %v6650_v12  ;;  %v8264_v51 = vld [vmem:[%s13155_s1 + $0xa44] sm:$0xf] }
 0x102   :  { %13246 = vst [vmem:[#allocation5_spill] sm:$0xff] %v10291_v17  ;;  %v8256_v10 = vld [vmem:[%s13155_s1 + $0x944] sm:$0xf] }
 0x103   :  { %1987 = vmatpush.bf16.msrb.mxu1 %v6289_v21  ;;  %2015 = vmatpush.bf16.msrb.mxu3 %v6293_v27  ;;  %v997_v20 = vpop.f32.mrf.mxu1  ;;  %v6905_v21 = vor.u32 %v8284_v6, %v6904_v4  ;;  %v6872_v27 = vld [vmem:[%s13155_s1 + $0xb40] sm:$0xf]  ;;  %v6554_v6 = vld [vmem:[%s13155_s1 + $0x1c0] sm:$0xf0] }
 0x104   :  { %1974 = vmatmul.bf16.vlgmr.msrb.gmra.mxu0 %v8856_v8  ;;  %2002 = vmatmul.bf16.vlgmr.msrb.gmra.mxu2 %v8856_v8  ;;  %v8260_v4 = vld [vmem:[%s13155_s1 + $0x9bc] sm:$0xf0]  ;;  %v6810_v12 = vld [vmem:[%s13155_s1 + $0x9c0] sm:$0xf0] }
 0x105   :  { %2806 = vmatpush.bf16.msra.mxu0 %v6745_v28  ;;  %2834 = vmatpush.bf16.msra.mxu2 %v6749_v30  ;;  %v10302_v28 = vadd.f32 %v997_v20, %v983_v19  ;;  %v8276_v30 = vld [vmem:[%s13155_s1 + $0xbbc] sm:$0xf0]  ;;  %v6809_v19 = vor.u32 %v8260_v4, %v6808_v0  ;;  %v8184_v24 = vld [vmem:[%s13155_s1 + $0x44] sm:$0xf]  ;;  %v6813_v25 = vor.u32 %v8256_v10, %v6810_v12  ;;  %v6722_v0 = vld [vmem:[%s13155_s1 + $0x6c8] sm:$0xf0] }
 0x106   :  { %1988 = vmatmul.bf16.vlgmr.msrb.gmra.mxu1 %v8873_v15  ;;  %2016 = vmatmul.bf16.vlgmr.msrb.gmra.mxu3 %v8873_v15  ;;  %v6873_v36 = vor.u32 %v8276_v30, %v6872_v27  ;;  %v6522_v27 = vld [vmem:[%s13155_s1 + $0xc0] sm:$0xf0]  ;;  %v6978_v4 = vld [vmem:[%s13155_s1 + $0xec8] sm:$0xf0]  ;;  %v6688_v12 = vld [vmem:[%s13155_s1 + $0x548] sm:$0xf] }
 0x107   :  { %2820 = vmatpush.bf16.msra.mxu1 %v7001_v29  ;;  %2848 = vmatpush.bf16.msra.mxu3 %v7005_v34  ;;  %v6909_v29 = vor.u32 %v8280_v13, %v6906_v14  ;;  %v6874_v34 = vld [vmem:[%s13155_s1 + $0xbc0] sm:$0xf0]  ;;  %v1011_v55 = vpop.f32.mrf.mxu2  ;;  %v6520_v14 = vld [vmem:[%s13155_s1 + $0x40] sm:$0xf]  ;;  %v6525_v42 = vor.u32 %v8184_v24, %v6522_v27  ;;  %v6946_v24 = vld [vmem:[%s13155_s1 + $0xdc8] sm:$0xf0] }
 0x108   :  { %v6778_v30 = vld [vmem:[%s13155_s1 + $0x8c0] sm:$0xf0] }
 0x109   :  { %2807 = vmatpush.bf16.msra.mxu0 %v6713_v46  ;;  %2835 = vmatpush.bf16.msra.mxu2 %v6717_v48  ;;  %v6840_v46 = vld [vmem:[%s13155_s1 + $0xa40] sm:$0xf]  ;;  %v1025_v56 = vpop.f32.mrf.mxu3 }
 0x10a   :  { %v8268_v48 = vld [vmem:[%s13155_s1 + $0xabc] sm:$0xf0]  ;;  %v10343_v59 = vadd.f32 %v1025_v56, %v1011_v55  ;;  %v6720_v55 = vld [vmem:[%s13155_s1 + $0x648] sm:$0xf] }
 0x10b   :  { %2821 = vmatpush.bf16.msra.mxu1 %v6969_v47  ;;  %2849 = vmatpush.bf16.msra.mxu3 %v6973_v54  ;;  %v6877_v47 = vor.u32 %v8272_v33, %v6874_v34  ;;  %v6842_v54 = vld [vmem:[%s13155_s1 + $0xac0] sm:$0xf0]  ;;  %v6841_v60 = vor.u32 %v8268_v48, %v6840_v46  ;;  %v7008_v33 = vld [vmem:[%s13155_s1 + $0xf48] sm:$0xf]  ;;  %v8305_v46 = vld [vmem:[%s13155_s1 + $0xf4c] sm:$0xf] }
 0x10c   :  { %v6845_v3 = vor.u32 %v8264_v51, %v6842_v54  ;;  %v10417_v54 = vpop.f32.mrf.mxu0  ;;  %v8237_v56 = vld [vmem:[%s13155_s1 + $0x6c4] sm:$0xf0] }
 0x10d   :  { %2808 = vmatpush.bf16.msra.mxu0 %v6681_v61  ;;  %2836 = vmatpush.bf16.msra.mxu2 %v6685_v63  ;;  %v6589_v61 = vor.u32 %v8200_v49, %v6586_v50  ;;  %v8196_v63 = vld [vmem:[%s13155_s1 + $0x1bc] sm:$0xf0]  ;;  %v6753_v49 = vor.u32 %v8245_v32, %v6752_v31  ;;  %13247 = vst [vmem:[#allocation6_spill] sm:$0xff] %v10417_v54  ;;  %v6656_v32 = vld [vmem:[%s13155_s1 + $0x448] sm:$0xf] }
 0x10e   :  { %v7320_v54 = vld [vmem:[%s13155_s1 + $0x960] sm:$0xf] }
 0x10f   :  { %2822 = vmatpush.bf16.msra.mxu1 %v6937_v62  ;;  %2850 = vmatpush.bf16.msra.mxu3 %v6941_v5  ;;  %v6552_v62 = vld [vmem:[%s13155_s1 + $0x140] sm:$0xf]  ;;  %v8192_v5 = vld [vmem:[%s13155_s1 + $0x144] sm:$0xf]  ;;  %v10473_v27 = vpop.f32.mrf.mxu2 }
 0x110   :  { %v6553_v13 = vor.u32 %v8196_v63, %v6552_v62  ;;  %v6557_v20 = vor.u32 %v8192_v5, %v6554_v6  ;;  %v8301_v62 = vld [vmem:[%s13155_s1 + $0xec4] sm:$0xf0]  ;;  %v8233_v63 = vld [vmem:[%s13155_s1 + $0x64c] sm:$0xf]  ;;  %v6721_v5 = vor.u32 %v8237_v56, %v6720_v55  ;;  %13249 = vst [vmem:[#allocation8_spill] sm:$0xff] %v10473_v27 }
 0x111   :  { %2809 = vmatpush.bf16.msra.mxu0 %v6649_v18  ;;  %2837 = vmatpush.bf16.msra.mxu2 %v6653_v23  ;;  %v8188_v18 = vld [vmem:[%s13155_s1 + $0xbc] sm:$0xf0]  ;;  %v6725_v10 = vor.u32 %v8233_v63, %v6722_v0  ;;  %v10475_v31 = vpop.f32.mrf.mxu3  ;;  %v6624_v56 = vld [vmem:[%s13155_s1 + $0x348] sm:$0xf]  ;;  %v8209_v0 = vld [vmem:[%s13155_s1 + $0x34c] sm:$0xf] }
 0x112   :  { %v8252_v23 = vld [vmem:[%s13155_s1 + $0x8bc] sm:$0xf0]  ;;  %v6521_v34 = vor.u32 %v8188_v18, %v6520_v14  ;;  %v6944_v14 = vld [vmem:[%s13155_s1 + $0xd48] sm:$0xf]  ;;  %13250 = vst [vmem:[#allocation9_spill] sm:$0xff] %v10475_v31 }
 0x113   :  { %2823 = vmatpush.bf16.msra.mxu1 %v6905_v21  ;;  %2851 = vmatpush.bf16.msra.mxu3 %v6909_v29  ;;  %v6776_v21 = vld [vmem:[%s13155_s1 + $0x840] sm:$0xf]  ;;  %v8248_v29 = vld [vmem:[%s13155_s1 + $0x844] sm:$0xf]  ;;  %v8277_v63 = vld [vmem:[%s13155_s1 + $0xbc4] sm:$0xf0] }
 0x114   :  { %v6777_v41 = vor.u32 %v8252_v23, %v6776_v21  ;;  %v6781_v48 = vor.u32 %v8248_v29, %v6778_v30  ;;  %v6690_v21 = vld [vmem:[%s13155_s1 + $0x5c8] sm:$0xf0] }
 0x115   :  { %2810 = vmatpush.bf16.msra.mxu0 %v6617_v35  ;;  %2838 = vmatpush.bf16.msra.mxu2 %v6621_v37  ;;  %v8309_v35 = vld [vmem:[%s13155_s1 + $0xfc4] sm:$0xf0]  ;;  %v6754_v37 = vld [vmem:[%s13155_s1 + $0x7c8] sm:$0xf0] }
 0x116   :  { %v7009_v50 = vor.u32 %v8309_v35, %v7008_v33  ;;  %v8289_v23 = vld [vmem:[%s13155_s1 + $0xd4c] sm:$0xf]  ;;  %v8221_v33 = vld [vmem:[%s13155_s1 + $0x4c4] sm:$0xf0] }
 0x117   :  { %2824 = vmatpush.bf16.msra.mxu1 %v6873_v36  ;;  %2852 = vmatpush.bf16.msra.mxu3 %v6877_v47  ;;  %v8241_v36 = vld [vmem:[%s13155_s1 + $0x74c] sm:$0xf]  ;;  %v6949_v35 = vor.u32 %v8289_v23, %v6946_v24  ;;  %v8269_v23 = vld [vmem:[%s13155_s1 + $0xac4] sm:$0xf0] }
 0x118   :  { %v7010_v47 = vld [vmem:[%s13155_s1 + $0xfc8] sm:$0xf0]  ;;  %v6757_v51 = vor.u32 %v8241_v36, %v6754_v37  ;;  %v8285_v36 = vld [vmem:[%s13155_s1 + $0xcc4] sm:$0xf0] }
 0x119   :  { %2811 = vmatpush.bf16.msra.mxu0 %v6585_v58  ;;  %2839 = vmatpush.bf16.msra.mxu2 %v6589_v61  ;;  %v6976_v58 = vld [vmem:[%s13155_s1 + $0xe48] sm:$0xf]  ;;  %v10428_v61 = vpop.f32.mrf.mxu1  ;;  %v8217_v37 = vld [vmem:[%s13155_s1 + $0x44c] sm:$0xf] }
 0x11a   :  { %13248 = vst [vmem:[#allocation7_spill] sm:$0xff] %v10428_v61  ;;  %v6977_v6 = vor.u32 %v8301_v62, %v6976_v58  ;;  %v8213_v58 = vld [vmem:[%s13155_s1 + $0x3c4] sm:$0xf0]  ;;  %v8201_v24 = vld [vmem:[%s13155_s1 + $0x24c] sm:$0xf] }
 0x11b   :  { %2825 = vmatpush.bf16.msra.mxu1 %v6841_v60  ;;  %2853 = vmatpush.bf16.msra.mxu3 %v6845_v3  ;;  %v7013_v60 = vor.u32 %v8305_v46, %v7010_v47  ;;  %v8297_v3 = vld [vmem:[%s13155_s1 + $0xe4c] sm:$0xf]  ;;  %v8324_v61 = vld [vmem:[%s13155_s1 + $0x1dc] sm:$0xf0] }
 0x11c   :  { %v6981_v18 = vor.u32 %v8297_v3, %v6978_v4  ;;  %v8281_v46 = vld [vmem:[%s13155_s1 + $0xc4c] sm:$0xf] }
 0x11d   :  { %2812 = vmatpush.bf16.msra.mxu0 %v6553_v13  ;;  %2840 = vmatpush.bf16.msra.mxu2 %v6557_v20  ;;  %v8229_v13 = vld [vmem:[%s13155_s1 + $0x5c4] sm:$0xf0]  ;;  %v8225_v20 = vld [vmem:[%s13155_s1 + $0x54c] sm:$0xf] }
 0x11e   :  { %v6693_v30 = vor.u32 %v8225_v20, %v6690_v21  ;;  %v6914_v47 = vld [vmem:[%s13155_s1 + $0xcc8] sm:$0xf0] }
 0x11f   :  { %2826 = vmatpush.bf16.msra.mxu1 %v6809_v19  ;;  %2854 = vmatpush.bf16.msra.mxu3 %v6813_v25  ;;  %v8293_v19 = vld [vmem:[%s13155_s1 + $0xdc4] sm:$0xf0]  ;;  %v6689_v25 = vor.u32 %v8229_v13, %v6688_v12  ;;  %v6917_v62 = vor.u32 %v8281_v46, %v6914_v47  ;;  %v6626_v3 = vld [vmem:[%s13155_s1 + $0x3c8] sm:$0xf0] }
 0x120   :  { %v6945_v29 = vor.u32 %v8293_v19, %v6944_v14  ;;  %v6629_v13 = vor.u32 %v8209_v0, %v6626_v3  ;;  %v6592_v14 = vld [vmem:[%s13155_s1 + $0x248] sm:$0xf] }
 0x121   :  { %2813 = vmatpush.bf16.msra.mxu0 %v6521_v34  ;;  %2841 = vmatpush.bf16.msra.mxu2 %v6525_v42  ;;  %v6912_v34 = vld [vmem:[%s13155_s1 + $0xc48] sm:$0xf]  ;;  %v1807_v42 = vpop.f32.mrf.mxu0 }
 0x122   :  { %v6848_v19 = vld [vmem:[%s13155_s1 + $0xa48] sm:$0xf] }
 0x123   :  { %2827 = vmatpush.bf16.msra.mxu1 %v6777_v41  ;;  %2855 = vmatpush.bf16.msra.mxu3 %v6781_v48  ;;  %v6658_v41 = vld [vmem:[%s13155_s1 + $0x4c8] sm:$0xf0]  ;;  %v1821_v48 = vpop.f32.mrf.mxu1  ;;  %v6784_v3 = vld [vmem:[%s13155_s1 + $0x848] sm:$0xf] }
 0x124   :  { %2814 = vmatmul.bf16.vlgmr.msra.gmra.mxu0 %v8856_v8  ;;  %2842 = vmatmul.bf16.vlgmr.msra.gmra.mxu2 %v8856_v8  ;;  %v6661_v55 = vor.u32 %v8217_v37, %v6658_v41  ;;  %v6560_v37 = vld [vmem:[%s13155_s1 + $0x148] sm:$0xf] }
 0x125   :  { %2862 = vmatpush.bf16.msrb.mxu0 %v6753_v49  ;;  %2890 = vmatpush.bf16.msrb.mxu2 %v6757_v51  ;;  %v6657_v49 = vor.u32 %v8221_v33, %v6656_v32  ;;  %v6913_v51 = vor.u32 %v8285_v36, %v6912_v34  ;;  %v6850_v32 = vld [vmem:[%s13155_s1 + $0xac8] sm:$0xf0]  ;;  %v8197_v41 = vld [vmem:[%s13155_s1 + $0x1c4] sm:$0xf0] }
 0x126   :  { %2828 = vmatmul.bf16.vlgmr.msra.gmra.mxu1 %v8873_v15  ;;  %2856 = vmatmul.bf16.vlgmr.msra.gmra.mxu3 %v8873_v15 }
 0x127   :  { %2876 = vmatpush.bf16.msrb.mxu1 %v7009_v50  ;;  %2904 = vmatpush.bf16.msrb.mxu3 %v7013_v60  ;;  %v10501_v50 = vadd.f32 %v1821_v48, %v1807_v42  ;;  %v6880_v60 = vld [vmem:[%s13155_s1 + $0xb48] sm:$0xf]  ;;  %v1835_v21 = vpop.f32.mrf.mxu2 }
 0x128   :  { %v6881_v12 = vor.u32 %v8277_v63, %v6880_v60  ;;  %v6816_v42 = vld [vmem:[%s13155_s1 + $0x948] sm:$0xf] }
 0x129   :  { %2863 = vmatpush.bf16.msrb.mxu0 %v6721_v5  ;;  %2891 = vmatpush.bf16.msrb.mxu2 %v6725_v10  ;;  %v8273_v5 = vld [vmem:[%s13155_s1 + $0xb4c] sm:$0xf]  ;;  %v6625_v10 = vor.u32 %v8213_v58, %v6624_v56  ;;  %v8261_v48 = vld [vmem:[%s13155_s1 + $0x9c4] sm:$0xf0]  ;;  %v6561_v58 = vor.u32 %v8197_v41, %v6560_v37 }
 0x12a   :  { %v6818_v56 = vld [vmem:[%s13155_s1 + $0x9c8] sm:$0xf0]  ;;  %v6528_v60 = vld [vmem:[%s13155_s1 + $0x48] sm:$0xf]  ;;  %v6817_v63 = vor.u32 %v8261_v48, %v6816_v42  ;;  %v6728_v42 = vld [vmem:[%s13155_s1 + $0x650] sm:$0xf] }
 0x12b   :  { %2877 = vmatpush.bf16.msrb.mxu1 %v6977_v6  ;;  %2905 = vmatpush.bf16.msrb.mxu3 %v6981_v18  ;;  %v6882_v6 = vld [vmem:[%s13155_s1 + $0xbc8] sm:$0xf0]  ;;  %v8205_v18 = vld [vmem:[%s13155_s1 + $0x2c4] sm:$0xf0]  ;;  %v6984_v48 = vld [vmem:[%s13155_s1 + $0xe50] sm:$0xf] }
 0x12c   :  { %v6885_v20 = vor.u32 %v8273_v5, %v6882_v6  ;;  %v6593_v34 = vor.u32 %v8205_v18, %v6592_v14  ;;  %v8253_v5 = vld [vmem:[%s13155_s1 + $0x8c4] sm:$0xf0]  ;;  %v8185_v6 = vld [vmem:[%s13155_s1 + $0x4c] sm:$0xf]  ;;  %v6760_v18 = vld [vmem:[%s13155_s1 + $0x750] sm:$0xf] }
 0x12d   :  { %2864 = vmatpush.bf16.msrb.mxu0 %v6689_v25  ;;  %2892 = vmatpush.bf16.msrb.mxu2 %v6693_v30  ;;  %v6594_v25 = vld [vmem:[%s13155_s1 + $0x2c8] sm:$0xf0] }
 0x12e   :  { %v8265_v30 = vld [vmem:[%s13155_s1 + $0xa4c] sm:$0xf]  ;;  %v6597_v36 = vor.u32 %v8201_v24, %v6594_v25  ;;  %v8242_v24 = vld [vmem:[%s13155_s1 + $0x754] sm:$0xf] }
 0x12f   :  { %2878 = vmatpush.bf16.msrb.mxu1 %v6945_v29  ;;  %2906 = vmatpush.bf16.msrb.mxu3 %v6949_v35  ;;  %v1849_v29 = vpop.f32.mrf.mxu3  ;;  %v6849_v35 = vor.u32 %v8269_v23, %v6848_v19  ;;  %v6853_v47 = vor.u32 %v8265_v30, %v6850_v32  ;;  %v6786_v14 = vld [vmem:[%s13155_s1 + $0x8c8] sm:$0xf0]  ;;  %v8246_v19 = vld [vmem:[%s13155_s1 + $0x7cc] sm:$0xf0]  ;;  %v6762_v25 = vld [vmem:[%s13155_s1 + $0x7d0] sm:$0xf0] }
 0x130   :  { %v10553_v33 = vadd.f32 %v1849_v29, %v1835_v21  ;;  %v8310_v23 = vld [vmem:[%s13155_s1 + $0xfcc] sm:$0xf0]  ;;  %v6785_v29 = vor.u32 %v8253_v5, %v6784_v3  ;;  %v8306_v32 = vld [vmem:[%s13155_s1 + $0xf54] sm:$0xf]  ;;  %v6765_v41 = vor.u32 %v8242_v24, %v6762_v25 }
 0x131   :  { %2865 = vmatpush.bf16.msrb.mxu0 %v6657_v49  ;;  %2893 = vmatpush.bf16.msrb.mxu2 %v6661_v55  ;;  %v8193_v49 = vld [vmem:[%s13155_s1 + $0x14c] sm:$0xf] }
 0x132   :  { %v8257_v55 = vld [vmem:[%s13155_s1 + $0x94c] sm:$0xf] }
 0x133   :  { %2879 = vmatpush.bf16.msrb.mxu1 %v6913_v51  ;;  %2907 = vmatpush.bf16.msrb.mxu3 %v6917_v62  ;;  %v6562_v51 = vld [vmem:[%s13155_s1 + $0x1c8] sm:$0xf0]  ;;  %v8189_v62 = vld [vmem:[%s13155_s1 + $0xc4] sm:$0xf0] }
 0x134   :  { %v6565_v0 = vor.u32 %v8193_v49, %v6562_v51  ;;  %v6529_v21 = vor.u32 %v8189_v62, %v6528_v60  ;;  %v8302_v51 = vld [vmem:[%s13155_s1 + $0xecc] sm:$0xf0]  ;;  %v8298_v60 = vld [vmem:[%s13155_s1 + $0xe54] sm:$0xf] }
 0x135   :  { %2866 = vmatpush.bf16.msrb.mxu0 %v6625_v10  ;;  %2894 = vmatpush.bf16.msrb.mxu2 %v6629_v13  ;;  %v6821_v10 = vor.u32 %v8257_v55, %v6818_v56  ;;  %v8249_v13 = vld [vmem:[%s13155_s1 + $0x84c] sm:$0xf]  ;;  %v8234_v55 = vld [vmem:[%s13155_s1 + $0x654] sm:$0xf]  ;;  %v6985_v3 = vor.u32 %v8302_v51, %v6984_v48 }
 0x136   :  { %v6730_v56 = vld [vmem:[%s13155_s1 + $0x6d0] sm:$0xf0] }
 0x137   :  { %2880 = vmatpush.bf16.msrb.mxu1 %v6881_v12  ;;  %2908 = vmatpush.bf16.msrb.mxu3 %v6885_v20  ;;  %v6530_v12 = vld [vmem:[%s13155_s1 + $0xc8] sm:$0xf0]  ;;  %v7016_v20 = vld [vmem:[%s13155_s1 + $0xf50] sm:$0xf]  ;;  %v6986_v62 = vld [vmem:[%s13155_s1 + $0xed0] sm:$0xf0]  ;;  %v6733_v5 = vor.u32 %v8234_v55, %v6730_v56 }
 0x138   :  { %v6533_v30 = vor.u32 %v8185_v6, %v6530_v12  ;;  %v7017_v37 = vor.u32 %v8310_v23, %v7016_v20  ;;  %v6696_v6 = vld [vmem:[%s13155_s1 + $0x550] sm:$0xf]  ;;  %v8290_v20 = vld [vmem:[%s13155_s1 + $0xd54] sm:$0xf] }
 0x139   :  { %2867 = vmatpush.bf16.msrb.mxu0 %v6593_v34  ;;  %2895 = vmatpush.bf16.msrb.mxu2 %v6597_v36  ;;  %v7018_v34 = vld [vmem:[%s13155_s1 + $0xfd0] sm:$0xf0]  ;;  %v6761_v36 = vor.u32 %v8246_v19, %v6760_v18  ;;  %v6952_v12 = vld [vmem:[%s13155_s1 + $0xd50] sm:$0xf] }
 0x13a   :  { %v7021_v49 = vor.u32 %v8306_v32, %v7018_v34  ;;  %v8226_v18 = vld [vmem:[%s13155_s1 + $0x554] sm:$0xf]  ;;  %v6920_v32 = vld [vmem:[%s13155_s1 + $0xc50] sm:$0xf]  ;;  %v10694_v34 = vpop.f32.mrf.mxu2 }
 0x13b   :  { %2881 = vmatpush.bf16.msrb.mxu1 %v6849_v35  ;;  %2909 = vmatpush.bf16.msrb.mxu3 %v6853_v47  ;;  %v6789_v35 = vor.u32 %v8249_v13, %v6786_v14  ;;  %v8238_v47 = vld [vmem:[%s13155_s1 + $0x6cc] sm:$0xf0]  ;;  %v6989_v13 = vor.u32 %v8298_v60, %v6986_v62  ;;  %v6698_v19 = vld [vmem:[%s13155_s1 + $0x5d0] sm:$0xf0] }
 0x13c   :  { %v8294_v14 = vld [vmem:[%s13155_s1 + $0xdcc] sm:$0xf0]  ;;  %v6701_v25 = vor.u32 %v8226_v18, %v6698_v19  ;;  %v8282_v48 = vld [vmem:[%s13155_s1 + $0xc54] sm:$0xf] }
 0x13d   :  { %2868 = vmatpush.bf16.msrb.mxu0 %v6561_v58  ;;  %2896 = vmatpush.bf16.msrb.mxu2 %v6565_v0  ;;  %v10647_v58 = vpop.f32.mrf.mxu0  ;;  %v6729_v0 = vor.u32 %v8238_v47, %v6728_v42  ;;  %v6953_v24 = vor.u32 %v8294_v14, %v6952_v12  ;;  %v10705_v42 = vpop.f32.mrf.mxu3  ;;  %v8210_v12 = vld [vmem:[%s13155_s1 + $0x354] sm:$0xf] }
 0x13e   :  { %v8274_v18 = vld [vmem:[%s13155_s1 + $0xb54] sm:$0xf] }
 0x13f   :  { %2882 = vmatpush.bf16.msrb.mxu1 %v6817_v63  ;;  %2910 = vmatpush.bf16.msrb.mxu3 %v6821_v10  ;;  %v10655_v63 = vpop.f32.mrf.mxu1  ;;  %v8230_v10 = vld [vmem:[%s13155_s1 + $0x5cc] sm:$0xf0]  ;;  %v6890_v19 = vld [vmem:[%s13155_s1 + $0xbd0] sm:$0xf0] }
 0x140   :  { %v6697_v23 = vor.u32 %v8230_v10, %v6696_v6  ;;  %v8278_v10 = vld [vmem:[%s13155_s1 + $0xbcc] sm:$0xf0] }
 0x141   :  { %2869 = vmatpush.bf16.msrb.mxu0 %v6529_v21  ;;  %2897 = vmatpush.bf16.msrb.mxu2 %v6533_v30  ;;  %v6954_v21 = vld [vmem:[%s13155_s1 + $0xdd0] sm:$0xf0]  ;;  %v8222_v30 = vld [vmem:[%s13155_s1 + $0x4cc] sm:$0xf0] }
 0x143   :  { %2883 = vmatpush.bf16.msrb.mxu1 %v6785_v29  ;;  %2911 = vmatpush.bf16.msrb.mxu3 %v6789_v35  ;;  %v6664_v29 = vld [vmem:[%s13155_s1 + $0x450] sm:$0xf]  ;;  %v6957_v35 = vor.u32 %v8290_v20, %v6954_v21 }
 0x144   :  { %2870 = vmatmul.bf16.vlgmr.msrb.gmra.mxu0 %v8856_v8  ;;  %2898 = vmatmul.bf16.vlgmr.msrb.gmra.mxu2 %v8856_v8  ;;  %v6665_v55 = vor.u32 %v8222_v30, %v6664_v29  ;;  %v6856_v29 = vld [vmem:[%s13155_s1 + $0xa50] sm:$0xf]  ;;  %v6893_v30 = vor.u32 %v8274_v18, %v6890_v19  ;;  %v8258_v18 = vld [vmem:[%s13155_s1 + $0x954] sm:$0xf] }
 0x145   :  { %2918 = vmatpush.bf16.msra.mxu0 %v6761_v36  ;;  %2946 = vmatpush.bf16.msra.mxu2 %v6765_v41  ;;  %v8286_v36 = vld [vmem:[%s13155_s1 + $0xccc] sm:$0xf0]  ;;  %v6666_v41 = vld [vmem:[%s13155_s1 + $0x4d0] sm:$0xf0]  ;;  %v1863_v47 = vpop.f32.mrf.mxu0 }
 0x146   :  { %2884 = vmatmul.bf16.vlgmr.msrb.gmra.mxu1 %v8873_v15  ;;  %2912 = vmatmul.bf16.vlgmr.msrb.gmra.mxu3 %v8873_v15  ;;  %v6921_v60 = vor.u32 %v8286_v36, %v6920_v32  ;;  %v8202_v36 = vld [vmem:[%s13155_s1 + $0x254] sm:$0xf] }
 0x147   :  { %2932 = vmatpush.bf16.msra.mxu1 %v7017_v37  ;;  %2960 = vmatpush.bf16.msra.mxu3 %v7021_v49  ;;  %v8218_v37 = vld [vmem:[%s13155_s1 + $0x454] sm:$0xf]  ;;  %v1877_v51 = vpop.f32.mrf.mxu1  ;;  %v1891_v32 = vpop.f32.mrf.mxu2 }
 0x148   :  { %v6922_v49 = vld [vmem:[%s13155_s1 + $0xcd0] sm:$0xf0]  ;;  %v10713_v56 = vadd.f32 %v1877_v51, %v1863_v47  ;;  %v6669_v62 = vor.u32 %v8218_v37, %v6666_v41 }
 0x149   :  { %2919 = vmatpush.bf16.msra.mxu0 %v6729_v0  ;;  %2947 = vmatpush.bf16.msra.mxu2 %v6733_v5  ;;  %v6632_v0 = vld [vmem:[%s13155_s1 + $0x350] sm:$0xf]  ;;  %v6925_v6 = vor.u32 %v8282_v48, %v6922_v49  ;;  %v6602_v37 = vld [vmem:[%s13155_s1 + $0x2d0] sm:$0xf0]  ;;  %v1905_v41 = vpop.f32.mrf.mxu3 }
 0x14a   :  { %v6888_v5 = vld [vmem:[%s13155_s1 + $0xb50] sm:$0xf]  ;;  %v8266_v47 = vld [vmem:[%s13155_s1 + $0xa54] sm:$0xf]  ;;  %v10765_v49 = vadd.f32 %v1905_v41, %v1891_v32 }
 0x14b   :  { %2933 = vmatpush.bf16.msra.mxu1 %v6985_v3  ;;  %2961 = vmatpush.bf16.msra.mxu3 %v6989_v13  ;;  %v8214_v3 = vld [vmem:[%s13155_s1 + $0x3cc] sm:$0xf0]  ;;  %v6634_v13 = vld [vmem:[%s13155_s1 + $0x3d0] sm:$0xf0]  ;;  %v6889_v21 = vor.u32 %v8278_v10, %v6888_v5 }
 0x14c   :  { %v6633_v20 = vor.u32 %v8214_v3, %v6632_v0  ;;  %v6858_v48 = vld [vmem:[%s13155_s1 + $0xad0] sm:$0xf0]  ;;  %v8198_v0 = vld [vmem:[%s13155_s1 + $0x1cc] sm:$0xf0] }
 0x14d   :  { %2920 = vmatpush.bf16.msra.mxu0 %v6697_v23  ;;  %2948 = vmatpush.bf16.msra.mxu2 %v6701_v25  ;;  %v6637_v23 = vor.u32 %v8210_v12, %v6634_v13  ;;  %v8206_v25 = vld [vmem:[%s13155_s1 + $0x2cc] sm:$0xf0]  ;;  %v8194_v12 = vld [vmem:[%s13155_s1 + $0x154] sm:$0xf] }
 0x14e   :  { %v6824_v3 = vld [vmem:[%s13155_s1 + $0x950] sm:$0xf]  ;;  %v6570_v13 = vld [vmem:[%s13155_s1 + $0x1d0] sm:$0xf0] }
 0x14f   :  { %2934 = vmatpush.bf16.msra.mxu1 %v6953_v24  ;;  %2962 = vmatpush.bf16.msra.mxu3 %v6957_v35  ;;  %v6600_v24 = vld [vmem:[%s13155_s1 + $0x250] sm:$0xf]  ;;  %v6826_v19 = vld [vmem:[%s13155_s1 + $0x9d0] sm:$0xf0] }
 0x150   :  { %v8270_v35 = vld [vmem:[%s13155_s1 + $0xacc] sm:$0xf0]  ;;  %v6601_v51 = vor.u32 %v8206_v25, %v6600_v24  ;;  %v6573_v25 = vor.u32 %v8194_v12, %v6570_v13  ;;  %v8186_v32 = vld [vmem:[%s13155_s1 + $0x54] sm:$0xf]  ;;  %v7026_v12 = vld [vmem:[%s13155_s1 + $0xfd8] sm:$0xf0] }
 0x151   :  { %2921 = vmatpush.bf16.msra.mxu0 %v6665_v55  ;;  %2949 = vmatpush.bf16.msra.mxu2 %v6669_v62  ;;  %v6857_v55 = vor.u32 %v8270_v35, %v6856_v29  ;;  %v6568_v62 = vld [vmem:[%s13155_s1 + $0x150] sm:$0xf]  ;;  %v6829_v35 = vor.u32 %v8258_v18, %v6826_v19  ;;  %v6794_v41 = vld [vmem:[%s13155_s1 + $0x8d0] sm:$0xf0] }
 0x152   :  { %v8262_v10 = vld [vmem:[%s13155_s1 + $0x9cc] sm:$0xf0] }
 0x153   :  { %2935 = vmatpush.bf16.msra.mxu1 %v6921_v60  ;;  %2963 = vmatpush.bf16.msra.mxu3 %v6925_v6  ;;  %v6605_v60 = vor.u32 %v8202_v36, %v6602_v37  ;;  %v6861_v6 = vor.u32 %v8266_v47, %v6858_v48  ;;  %v6825_v24 = vor.u32 %v8262_v10, %v6824_v3  ;;  %v6792_v29 = vld [vmem:[%s13155_s1 + $0x850] sm:$0xf]  ;;  %v6538_v36 = vld [vmem:[%s13155_s1 + $0xd0] sm:$0xf0]  ;;  %v6768_v47 = vld [vmem:[%s13155_s1 + $0x758] sm:$0xf] }
 0x154   :  { %v8250_v37 = vld [vmem:[%s13155_s1 + $0x854] sm:$0xf]  ;;  %v8247_v48 = vld [vmem:[%s13155_s1 + $0x7d4] sm:$0xf0]  ;;  %v8307_v10 = vld [vmem:[%s13155_s1 + $0xf5c] sm:$0xf] }
 0x155   :  { %2922 = vmatpush.bf16.msra.mxu0 %v6633_v20  ;;  %2950 = vmatpush.bf16.msra.mxu2 %v6637_v23  ;;  %v6569_v20 = vor.u32 %v8198_v0, %v6568_v62  ;;  %v8190_v23 = vld [vmem:[%s13155_s1 + $0xcc] sm:$0xf0]  ;;  %v8243_v62 = vld [vmem:[%s13155_s1 + $0x75c] sm:$0xf]  ;;  %v6797_v13 = vor.u32 %v8250_v37, %v6794_v41  ;;  %v6769_v18 = vor.u32 %v8247_v48, %v6768_v47  ;;  %v10867_v41 = vpop.f32.mrf.mxu1 }
 0x156   :  { %v6770_v0 = vld [vmem:[%s13155_s1 + $0x7d8] sm:$0xf0] }
 0x157   :  { %2936 = vmatpush.bf16.msra.mxu1 %v6889_v21  ;;  %2964 = vmatpush.bf16.msra.mxu3 %v6893_v30  ;;  %v6536_v21 = vld [vmem:[%s13155_s1 + $0x50] sm:$0xf]  ;;  %v6994_v37 = vld [vmem:[%s13155_s1 + $0xed8] sm:$0xf0] }
 0x158   :  { %v8254_v30 = vld [vmem:[%s13155_s1 + $0x8cc] sm:$0xf0] }
 0x159   :  { %2923 = vmatpush.bf16.msra.mxu0 %v6601_v51  ;;  %2951 = vmatpush.bf16.msra.mxu2 %v6605_v60  ;;  %v7024_v51 = vld [vmem:[%s13155_s1 + $0xf58] sm:$0xf]  ;;  %v6793_v3 = vor.u32 %v8254_v30, %v6792_v29  ;;  %v8235_v30 = vld [vmem:[%s13155_s1 + $0x65c] sm:$0xf] }
 0x15a   :  { %v8311_v60 = vld [vmem:[%s13155_s1 + $0xfd4] sm:$0xf0] }
 0x15b   :  { %2937 = vmatpush.bf16.msra.mxu1 %v6857_v55  ;;  %2965 = vmatpush.bf16.msra.mxu3 %v6861_v6  ;;  %v6537_v55 = vor.u32 %v8190_v23, %v6536_v21  ;;  %v6541_v6 = vor.u32 %v8186_v32, %v6538_v36  ;;  %v7025_v19 = vor.u32 %v8311_v60, %v7024_v51  ;;  %v6736_v21 = vld [vmem:[%s13155_s1 + $0x658] sm:$0xf]  ;;  %v6738_v32 = vld [vmem:[%s13155_s1 + $0x6d8] sm:$0xf0] }
 0x15c   :  { %v8239_v23 = vld [vmem:[%s13155_s1 + $0x6d4] sm:$0xf0]  ;;  %v8299_v36 = vld [vmem:[%s13155_s1 + $0xe5c] sm:$0xf]  ;;  %v6741_v51 = vor.u32 %v8235_v30, %v6738_v32 }
 0x15d   :  { %2924 = vmatpush.bf16.msra.mxu0 %v6569_v20  ;;  %2952 = vmatpush.bf16.msra.mxu2 %v6573_v25  ;;  %v6773_v20 = vor.u32 %v8243_v62, %v6770_v0  ;;  %v7029_v25 = vor.u32 %v8307_v10, %v7026_v12  ;;  %v8303_v29 = vld [vmem:[%s13155_s1 + $0xed4] sm:$0xf0]  ;;  %v6737_v47 = vor.u32 %v8239_v23, %v6736_v21  ;;  %v6706_v10 = vld [vmem:[%s13155_s1 + $0x5d8] sm:$0xf0] }
 0x15e   :  { %v8231_v60 = vld [vmem:[%s13155_s1 + $0x5d4] sm:$0xf0]  ;;  %v6997_v0 = vor.u32 %v8299_v36, %v6994_v37  ;;  %v8291_v12 = vld [vmem:[%s13155_s1 + $0xd5c] sm:$0xf]  ;;  %v10917_v37 = vpop.f32.mrf.mxu3 }
 0x15f   :  { %2938 = vmatpush.bf16.msra.mxu1 %v6825_v24  ;;  %2966 = vmatpush.bf16.msra.mxu3 %v6829_v35  ;;  %v6992_v24 = vld [vmem:[%s13155_s1 + $0xe58] sm:$0xf]  ;;  %v10859_v35 = vpop.f32.mrf.mxu0  ;;  %v8219_v32 = vld [vmem:[%s13155_s1 + $0x45c] sm:$0xf] }
 0x160   :  { %v6993_v48 = vor.u32 %v8303_v29, %v6992_v24  ;;  %v6960_v62 = vld [vmem:[%s13155_s1 + $0xd58] sm:$0xf]  ;;  %v6674_v36 = vld [vmem:[%s13155_s1 + $0x4d8] sm:$0xf0] }
 0x161   :  { %2925 = vmatpush.bf16.msra.mxu0 %v6537_v55  ;;  %2953 = vmatpush.bf16.msra.mxu2 %v6541_v6  ;;  %v6704_v55 = vld [vmem:[%s13155_s1 + $0x558] sm:$0xf]  ;;  %v8227_v6 = vld [vmem:[%s13155_s1 + $0x55c] sm:$0xf] }
 0x162   :  { %v6672_v21 = vld [vmem:[%s13155_s1 + $0x458] sm:$0xf] }
 0x163   :  { %2939 = vmatpush.bf16.msra.mxu1 %v6793_v3  ;;  %2967 = vmatpush.bf16.msra.mxu3 %v6797_v13  ;;  %v8295_v3 = vld [vmem:[%s13155_s1 + $0xdd4] sm:$0xf0]  ;;  %v6962_v13 = vld [vmem:[%s13155_s1 + $0xdd8] sm:$0xf0] }
 0x164   :  { %2926 = vmatmul.bf16.vlgmr.msra.gmra.mxu0 %v8856_v8  ;;  %2954 = vmatmul.bf16.vlgmr.msra.gmra.mxu2 %v8856_v8  ;;  %v8223_v23 = vld [vmem:[%s13155_s1 + $0x4d4] sm:$0xf0]  ;;  %v6965_v29 = vor.u32 %v8291_v12, %v6962_v13 }
 0x165   :  { %2974 = vmatpush.bf16.msrb.mxu0 %v6769_v18  ;;  %3002 = vmatpush.bf16.msrb.mxu2 %v6773_v20  ;;  %v6705_v18 = vor.u32 %v8231_v60, %v6704_v55  ;;  %v6709_v20 = vor.u32 %v8227_v6, %v6706_v10  ;;  %v6928_v24 = vld [vmem:[%s13155_s1 + $0xc58] sm:$0xf]  ;;  %v1933_v55 = vpop.f32.mrf.mxu1  ;;  %v6673_v60 = vor.u32 %v8223_v23, %v6672_v21  ;;  %v8275_v23 = vld [vmem:[%s13155_s1 + $0xb5c] sm:$0xf] }
 0x166   :  { %2940 = vmatmul.bf16.vlgmr.msra.gmra.mxu1 %v8873_v15  ;;  %2968 = vmatmul.bf16.vlgmr.msra.gmra.mxu3 %v8873_v15  ;;  %v8287_v30 = vld [vmem:[%s13155_s1 + $0xcd4] sm:$0xf0] }
 0x167   :  { %2988 = vmatpush.bf16.msrb.mxu1 %v7025_v19  ;;  %3016 = vmatpush.bf16.msrb.mxu3 %v7029_v25  ;;  %v6961_v19 = vor.u32 %v8295_v3, %v6960_v62  ;;  %v10906_v25 = vpop.f32.mrf.mxu2  ;;  %v6677_v3 = vor.u32 %v8219_v32, %v6674_v36  ;;  %v6640_v6 = vld [vmem:[%s13155_s1 + $0x358] sm:$0xf] }
 0x168   :  { %v8215_v10 = vld [vmem:[%s13155_s1 + $0x3d4] sm:$0xf0] }
 0x169   :  { %2975 = vmatpush.bf16.msrb.mxu0 %v6737_v47  ;;  %3003 = vmatpush.bf16.msrb.mxu2 %v6741_v51  ;;  %v1919_v47 = vpop.f32.mrf.mxu0  ;;  %v6930_v51 = vld [vmem:[%s13155_s1 + $0xcd8] sm:$0xf0]  ;;  %v6896_v12 = vld [vmem:[%s13155_s1 + $0xb58] sm:$0xf] }
 0x16a   :  { %v10925_v62 = vadd.f32 %v1933_v55, %v1919_v47  ;;  %v6608_v36 = vld [vmem:[%s13155_s1 + $0x258] sm:$0xf] }
 0x16b   :  { %2989 = vmatpush.bf16.msrb.mxu1 %v6993_v48  ;;  %3017 = vmatpush.bf16.msrb.mxu3 %v6997_v0  ;;  %v8283_v48 = vld [vmem:[%s13155_s1 + $0xc5c] sm:$0xf]  ;;  %v6929_v0 = vor.u32 %v8287_v30, %v6928_v24  ;;  %v8207_v47 = vld [vmem:[%s13155_s1 + $0x2d4] sm:$0xf0] }
 0x16c   :  { %v6933_v13 = vor.u32 %v8283_v48, %v6930_v51  ;;  %v6898_v24 = vld [vmem:[%s13155_s1 + $0xbd8] sm:$0xf0]  ;;  %v6864_v48 = vld [vmem:[%s13155_s1 + $0xa58] sm:$0xf] }
 0x16d   :  { %2976 = vmatpush.bf16.msrb.mxu0 %v6705_v18  ;;  %3004 = vmatpush.bf16.msrb.mxu2 %v6709_v20  ;;  %v8279_v18 = vld [vmem:[%s13155_s1 + $0xbd4] sm:$0xf0]  ;;  %v6642_v20 = vld [vmem:[%s13155_s1 + $0x3d8] sm:$0xf0]  ;;  %v6901_v51 = vor.u32 %v8275_v23, %v6898_v24 }
 0x16e   :  { %v6897_v30 = vor.u32 %v8279_v18, %v6896_v12  ;;  %v6866_v12 = vld [vmem:[%s13155_s1 + $0xad8] sm:$0xf0]  ;;  %v6609_v18 = vor.u32 %v8207_v47, %v6608_v36  ;;  %v6576_v23 = vld [vmem:[%s13155_s1 + $0x158] sm:$0xf] }
 0x16f   :  { %2990 = vmatpush.bf16.msrb.mxu1 %v6961_v19  ;;  %3018 = vmatpush.bf16.msrb.mxu3 %v6965_v29  ;;  %v8211_v19 = vld [vmem:[%s13155_s1 + $0x35c] sm:$0xf]  ;;  %v6641_v29 = vor.u32 %v8215_v10, %v6640_v6  ;;  %v1947_v55 = vpop.f32.mrf.mxu2  ;;  %v1961_v6 = vpop.f32.mrf.mxu3  ;;  %v8199_v24 = vld [vmem:[%s13155_s1 + $0x1d4] sm:$0xf0] }
 0x170   :  { %v6645_v32 = vor.u32 %v8211_v19, %v6642_v20  ;;  %v8267_v10 = vld [vmem:[%s13155_s1 + $0xa5c] sm:$0xf]  ;;  %v6832_v21 = vld [vmem:[%s13155_s1 + $0x958] sm:$0xf] }
 0x171   :  { %2977 = vmatpush.bf16.msrb.mxu0 %v6673_v60  ;;  %3005 = vmatpush.bf16.msrb.mxu2 %v6677_v3  ;;  %v8271_v60 = vld [vmem:[%s13155_s1 + $0xad4] sm:$0xf0]  ;;  %v6610_v3 = vld [vmem:[%s13155_s1 + $0x2d8] sm:$0xf0] }
 0x172   :  { %v6865_v19 = vor.u32 %v8271_v60, %v6864_v48  ;;  %v8195_v36 = vld [vmem:[%s13155_s1 + $0x15c] sm:$0xf]  ;;  %v6544_v60 = vld [vmem:[%s13155_s1 + $0x58] sm:$0xf] }
 0x173   :  { %2991 = vmatpush.bf16.msrb.mxu1 %v6929_v0  ;;  %3019 = vmatpush.bf16.msrb.mxu3 %v6933_v13  ;;  %v8203_v0 = vld [vmem:[%s13155_s1 + $0x25c] sm:$0xf]  ;;  %v10977_v13 = vadd.f32 %v1961_v6, %v1947_v55  ;;  %v6577_v55 = vor.u32 %v8199_v24, %v6576_v23  ;;  %v7256_v24 = vld [vmem:[%s13155_s1 + $0x760] sm:$0xf] }
 0x174   :  { %v6613_v20 = vor.u32 %v8203_v0, %v6610_v3  ;;  %v6578_v47 = vld [vmem:[%s13155_s1 + $0x1d8] sm:$0xf0]  ;;  %v8191_v0 = vld [vmem:[%s13155_s1 + $0xd4] sm:$0xf0] }
 0x175   :  { %2978 = vmatpush.bf16.msrb.mxu0 %v6641_v29  ;;  %3006 = vmatpush.bf16.msrb.mxu2 %v6645_v32  ;;  %v8263_v32 = vld [vmem:[%s13155_s1 + $0x9d4] sm:$0xf0]  ;;  %v8259_v48 = vld [vmem:[%s13155_s1 + $0x95c] sm:$0xf]  ;;  %v6581_v6 = vor.u32 %v8195_v36, %v6578_v47  ;;  %v6545_v36 = vor.u32 %v8191_v0, %v6544_v60  ;;  %v8436_v47 = vld [vmem:[%s13155_s1 + $0xfdc] sm:$0xf0] }
 0x176   :  { %v6833_v3 = vor.u32 %v8263_v32, %v6832_v21  ;;  %v8251_v21 = vld [vmem:[%s13155_s1 + $0x85c] sm:$0xf]  ;;  %v7512_v32 = vld [vmem:[%s13155_s1 + $0xf60] sm:$0xf]  ;;  %v7514_v60 = vld [vmem:[%s13155_s1 + $0xfe0] sm:$0xf0] }
 0x177   :  { %2992 = vmatpush.bf16.msrb.mxu1 %v6897_v30  ;;  %3020 = vmatpush.bf16.msrb.mxu3 %v6901_v51  ;;  %v6869_v30 = vor.u32 %v8267_v10, %v6866_v12  ;;  %v6834_v51 = vld [vmem:[%s13155_s1 + $0x9d8] sm:$0xf0]  ;;  %v6800_v10 = vld [vmem:[%s13155_s1 + $0x858] sm:$0xf]  ;;  %v7513_v46 = vor.u32 %v8436_v47, %v7512_v32 }
 0x178   :  { %v8255_v12 = vld [vmem:[%s13155_s1 + $0x8d4] sm:$0xf0]  ;;  %v6837_v23 = vor.u32 %v8259_v48, %v6834_v51  ;;  %v8368_v48 = vld [vmem:[%s13155_s1 + $0x764] sm:$0xf] }
 0x179   :  { %2979 = vmatpush.bf16.msrb.mxu0 %v6609_v18  ;;  %3007 = vmatpush.bf16.msrb.mxu2 %v6613_v20  ;;  %v8187_v18 = vld [vmem:[%s13155_s1 + $0x5c] sm:$0xf]  ;;  %v7258_v51 = vld [vmem:[%s13155_s1 + $0x7e0] sm:$0xf0]  ;;  %v6801_v29 = vor.u32 %v8255_v12, %v6800_v10  ;;  %v7480_v10 = vld [vmem:[%s13155_s1 + $0xe60] sm:$0xf] }
 0x17a   :  { %v6802_v20 = vld [vmem:[%s13155_s1 + $0x8d8] sm:$0xf0]  ;;  %v7261_v4 = vor.u32 %v8368_v48, %v7258_v51  ;;  %v7448_v48 = vld [vmem:[%s13155_s1 + $0xd60] sm:$0xf]  ;;  %v7194_v51 = vld [vmem:[%s13155_s1 + $0x5e0] sm:$0xf0] }
 0x17b   :  { %2993 = vmatpush.bf16.msrb.mxu1 %v6865_v19  ;;  %3021 = vmatpush.bf16.msrb.mxu3 %v6869_v30  ;;  %v6546_v19 = vld [vmem:[%s13155_s1 + $0xd8] sm:$0xf0]  ;;  %v8372_v30 = vld [vmem:[%s13155_s1 + $0x7dc] sm:$0xf0]  ;;  %v6805_v0 = vor.u32 %v8251_v21, %v6802_v20  ;;  %v11071_v21 = vpop.f32.mrf.mxu0  ;;  %v8424_v20 = vld [vmem:[%s13155_s1 + $0xe64] sm:$0xf] }
 0x17c   :  { %v6549_v5 = vor.u32 %v8187_v18, %v6546_v19  ;;  %v7257_v14 = vor.u32 %v8372_v30, %v7256_v24  ;;  %v8428_v18 = vld [vmem:[%s13155_s1 + $0xedc] sm:$0xf0]  ;;  %v7226_v19 = vld [vmem:[%s13155_s1 + $0x6e0] sm:$0xf0]  ;;  %13251 = vst [vmem:[#allocation10_spill] sm:$0xff] %v11071_v21  ;;  %v11079_v30 = vpop.f32.mrf.mxu1 }
 0x17d   :  { %2980 = vmatpush.bf16.msrb.mxu0 %v6577_v55  ;;  %3008 = vmatpush.bf16.msrb.mxu2 %v6581_v6  ;;  %v8432_v55 = vld [vmem:[%s13155_s1 + $0xf64] sm:$0xf]  ;;  %v8364_v6 = vld [vmem:[%s13155_s1 + $0x6dc] sm:$0xf0]  ;;  %13252 = vst [vmem:[#allocation11_spill] sm:$0xff] %v11079_v30 }
 0x17e   :  { %v7517_v12 = vor.u32 %v8432_v55, %v7514_v60  ;;  %v7482_v24 = vld [vmem:[%s13155_s1 + $0xee0] sm:$0xf0]  ;;  %v7408_v30 = vld [vmem:[%s13155_s1 + $0xb78] sm:$0xf] }
 0x17f   :  { %2994 = vmatpush.bf16.msrb.mxu1 %v6833_v3  ;;  %3022 = vmatpush.bf16.msrb.mxu3 %v6837_v23  ;;  %v7224_v3 = vld [vmem:[%s13155_s1 + $0x660] sm:$0xf]  ;;  %v8360_v23 = vld [vmem:[%s13155_s1 + $0x664] sm:$0xf] }
 0x180   :  { %v7225_v32 = vor.u32 %v8364_v6, %v7224_v3  ;;  %v7229_v47 = vor.u32 %v8360_v23, %v7226_v19  ;;  %v8416_v55 = vld [vmem:[%s13155_s1 + $0xd64] sm:$0xf]  ;;  %v11118_v23 = vpop.f32.mrf.mxu2 }
 0x181   :  { %2981 = vmatpush.bf16.msrb.mxu0 %v6545_v36  ;;  %3009 = vmatpush.bf16.msrb.mxu2 %v6549_v5  ;;  %v7481_v36 = vor.u32 %v8428_v18, %v7480_v10  ;;  %v7192_v5 = vld [vmem:[%s13155_s1 + $0x560] sm:$0xf]  ;;  %v7450_v60 = vld [vmem:[%s13155_s1 + $0xde0] sm:$0xf0]  ;;  %13253 = vst [vmem:[#allocation12_spill] sm:$0xff] %v11118_v23 }
 0x182   :  { %v7160_v10 = vld [vmem:[%s13155_s1 + $0x460] sm:$0xf]  ;;  %v7453_v19 = vor.u32 %v8416_v55, %v7450_v60 }
 0x183   :  { %2995 = vmatpush.bf16.msrb.mxu1 %v6801_v29  ;;  %3023 = vmatpush.bf16.msrb.mxu3 %v6805_v0  ;;  %v8356_v29 = vld [vmem:[%s13155_s1 + $0x5dc] sm:$0xf0] }
 0x184   :  { %2982 = vmatmul.bf16.vlgmr.msrb.gmra.mxu0 %v8856_v8  ;;  %3010 = vmatmul.bf16.vlgmr.msrb.gmra.mxu2 %v8856_v8  ;;  %v7193_v0 = vor.u32 %v8356_v29, %v7192_v5  ;;  %v7416_v18 = vld [vmem:[%s13155_s1 + $0xc60] sm:$0xf]  ;;  %v8408_v5 = vld [vmem:[%s13155_s1 + $0xc64] sm:$0xf] }
 0x185   :  { %3814 = vmatpush.bf16.msra.mxu0 %v7257_v14  ;;  %3842 = vmatpush.bf16.msra.mxu2 %v7261_v4  ;;  %v7485_v14 = vor.u32 %v8424_v20, %v7482_v24  ;;  %v8420_v4 = vld [vmem:[%s13155_s1 + $0xddc] sm:$0xf0]  ;;  %v8344_v24 = vld [vmem:[%s13155_s1 + $0x464] sm:$0xf] }
 0x186   :  { %2996 = vmatmul.bf16.vlgmr.msrb.gmra.mxu1 %v8873_v15  ;;  %3024 = vmatmul.bf16.vlgmr.msrb.gmra.mxu3 %v8873_v15  ;;  %v7449_v3 = vor.u32 %v8420_v4, %v7448_v48  ;;  %v8412_v20 = vld [vmem:[%s13155_s1 + $0xcdc] sm:$0xf0]  ;;  %v7418_v29 = vld [vmem:[%s13155_s1 + $0xce0] sm:$0xf0]  ;;  %v1989_v48 = vpop.f32.mrf.mxu1 }
 0x187   :  { %3828 = vmatpush.bf16.msra.mxu1 %v7513_v46  ;;  %3856 = vmatpush.bf16.msra.mxu3 %v7517_v12  ;;  %v8352_v46 = vld [vmem:[%s13155_s1 + $0x564] sm:$0xf]  ;;  %v8348_v12 = vld [vmem:[%s13155_s1 + $0x4dc] sm:$0xf0] }
 0x188   :  { %v7197_v6 = vor.u32 %v8352_v46, %v7194_v51  ;;  %v7417_v46 = vor.u32 %v8412_v20, %v7416_v18  ;;  %v7128_v55 = vld [vmem:[%s13155_s1 + $0x360] sm:$0xf]  ;;  %v7386_v20 = vld [vmem:[%s13155_s1 + $0xbe0] sm:$0xf0] }
 0x189   :  { %3815 = vmatpush.bf16.msra.mxu0 %v7225_v32  ;;  %3843 = vmatpush.bf16.msra.mxu2 %v7229_v47  ;;  %v7162_v32 = vld [vmem:[%s13155_s1 + $0x4e0] sm:$0xf0]  ;;  %v1975_v47 = vpop.f32.mrf.mxu0  ;;  %v8340_v60 = vld [vmem:[%s13155_s1 + $0x3dc] sm:$0xf0] }
 0x18a   :  { %v11137_v4 = vadd.f32 %v1989_v48, %v1975_v47  ;;  %v7165_v51 = vor.u32 %v8344_v24, %v7162_v32  ;;  %v7129_v24 = vor.u32 %v8340_v60, %v7128_v55  ;;  %v7352_v48 = vld [vmem:[%s13155_s1 + $0xa60] sm:$0xf]  ;;  %v7098_v55 = vld [vmem:[%s13155_s1 + $0x2e0] sm:$0xf0] }
 0x18b   :  { %3829 = vmatpush.bf16.msra.mxu1 %v7481_v36  ;;  %3857 = vmatpush.bf16.msra.mxu3 %v7485_v14  ;;  %v11129_v36 = vpop.f32.mrf.mxu3  ;;  %v7161_v14 = vor.u32 %v8348_v12, %v7160_v10  ;;  %v7421_v10 = vor.u32 %v8408_v5, %v7418_v29  ;;  %v7130_v12 = vld [vmem:[%s13155_s1 + $0x3e0] sm:$0xf0]  ;;  %v7096_v5 = vld [vmem:[%s13155_s1 + $0x260] sm:$0xf] }
 0x18c   :  { %13254 = vst [vmem:[#allocation13_spill] sm:$0xff] %v11129_v36  ;;  %v8332_v29 = vld [vmem:[%s13155_s1 + $0x2dc] sm:$0xf0]  ;;  %v8446_v36 = vld [vmem:[%s13157_s3 + $0xb4] sm:$0xf] }
 0x18d   :  { %3816 = vmatpush.bf16.msra.mxu0 %v7193_v0  ;;  %3844 = vmatpush.bf16.msra.mxu2 %v7197_v6  ;;  %v7384_v0 = vld [vmem:[%s13155_s1 + $0xb60] sm:$0xf]  ;;  %v8336_v6 = vld [vmem:[%s13155_s1 + $0x364] sm:$0xf] }
 0x18e   :  { %v7133_v47 = vor.u32 %v8336_v6, %v7130_v12  ;;  %v7097_v6 = vor.u32 %v8332_v29, %v7096_v5  ;;  %v8320_v5 = vld [vmem:[%s13155_s1 + $0x164] sm:$0xf] }
 0x18f   :  { %3830 = vmatpush.bf16.msra.mxu1 %v7449_v3  ;;  %3858 = vmatpush.bf16.msra.mxu3 %v7453_v19  ;;  %v8404_v3 = vld [vmem:[%s13155_s1 + $0xbdc] sm:$0xf0]  ;;  %v8400_v19 = vld [vmem:[%s13155_s1 + $0xb64] sm:$0xf] }
 0x190   :  { %v7385_v32 = vor.u32 %v8404_v3, %v7384_v0  ;;  %v7389_v18 = vor.u32 %v8400_v19, %v7386_v20  ;;  %v8392_v0 = vld [vmem:[%s13155_s1 + $0xa64] sm:$0xf]  ;;  %v7064_v20 = vld [vmem:[%s13155_s1 + $0x160] sm:$0xf] }
 0x191   :  { %3817 = vmatpush.bf16.msra.mxu0 %v7161_v14  ;;  %3845 = vmatpush.bf16.msra.mxu2 %v7165_v51  ;;  %v2003_v14 = vpop.f32.mrf.mxu2  ;;  %v8328_v51 = vld [vmem:[%s13155_s1 + $0x264] sm:$0xf] }
 0x192   :  { %v7101_v19 = vor.u32 %v8328_v51, %v7098_v55  ;;  %v7066_v29 = vld [vmem:[%s13155_s1 + $0x1e0] sm:$0xf0]  ;;  %v8316_v51 = vld [vmem:[%s13155_s1 + $0xdc] sm:$0xf0] }
 0x193   :  { %3831 = vmatpush.bf16.msra.mxu1 %v7417_v46  ;;  %3859 = vmatpush.bf16.msra.mxu3 %v7421_v10  ;;  %v8396_v46 = vld [vmem:[%s13155_s1 + $0xadc] sm:$0xf0]  ;;  %v2017_v60 = vpop.f32.mrf.mxu3  ;;  %v7354_v10 = vld [vmem:[%s13155_s1 + $0xae0] sm:$0xf0] }
 0x194   :  { %v11189_v3 = vadd.f32 %v2017_v60, %v2003_v14  ;;  %v7353_v12 = vor.u32 %v8396_v46, %v7352_v48  ;;  %v7322_v48 = vld [vmem:[%s13155_s1 + $0x9e0] sm:$0xf0]  ;;  %v7065_v14 = vor.u32 %v8324_v61, %v7064_v20  ;;  %v7032_v46 = vld [vmem:[%s13155_s1 + $0x60] sm:$0xf]  ;;  %v7069_v60 = vor.u32 %v8320_v5, %v7066_v29  ;;  %v7264_v20 = vld [vmem:[%s13155_s1 + $0x768] sm:$0xf] }
 0x195   :  { %3818 = vmatpush.bf16.msra.mxu0 %v7129_v24  ;;  %3846 = vmatpush.bf16.msra.mxu2 %v7133_v47  ;;  %v8388_v47 = vld [vmem:[%s13155_s1 + $0x9dc] sm:$0xf0]  ;;  %v7033_v5 = vor.u32 %v8316_v51, %v7032_v46  ;;  %v8437_v29 = vld [vmem:[%s13155_s1 + $0xfe4] sm:$0xf0]  ;;  %v7522_v46 = vld [vmem:[%s13155_s1 + $0xfe8] sm:$0xf0] }
 0x196   :  { %v7321_v55 = vor.u32 %v8388_v47, %v7320_v54  ;;  %v8380_v61 = vld [vmem:[%s13155_s1 + $0x8dc] sm:$0xf0]  ;;  %v8376_v54 = vld [vmem:[%s13155_s1 + $0x864] sm:$0xf]  ;;  %v7520_v47 = vld [vmem:[%s13155_s1 + $0xf68] sm:$0xf] }
 0x197   :  { %3832 = vmatpush.bf16.msra.mxu1 %v7385_v32  ;;  %3860 = vmatpush.bf16.msra.mxu3 %v7389_v18  ;;  %v7357_v32 = vor.u32 %v8392_v0, %v7354_v10  ;;  %v8384_v18 = vld [vmem:[%s13155_s1 + $0x964] sm:$0xf]  ;;  %v7288_v0 = vld [vmem:[%s13155_s1 + $0x860] sm:$0xf]  ;;  %v7521_v39 = vor.u32 %v8437_v29, %v7520_v47 }
 0x198   :  { %v8312_v10 = vld [vmem:[%s13155_s1 + $0x64] sm:$0xf]  ;;  %v7289_v24 = vor.u32 %v8380_v61, %v7288_v0  ;;  %v7488_v0 = vld [vmem:[%s13155_s1 + $0xe68] sm:$0xf] }
 0x199   :  { %3819 = vmatpush.bf16.msra.mxu0 %v7097_v6  ;;  %3847 = vmatpush.bf16.msra.mxu2 %v7101_v19  ;;  %v7325_v6 = vor.u32 %v8384_v18, %v7322_v48  ;;  %v7290_v19 = vld [vmem:[%s13155_s1 + $0x8e0] sm:$0xf0]  ;;  %v8369_v18 = vld [vmem:[%s13155_s1 + $0x76c] sm:$0xf] }
 0x19a   :  { %v7266_v48 = vld [vmem:[%s13155_s1 + $0x7e8] sm:$0xf0]  ;;  %v7293_v51 = vor.u32 %v8376_v54, %v7290_v19  ;;  %v11283_v54 = vpop.f32.mrf.mxu0 }
 0x19b   :  { %3833 = vmatpush.bf16.msra.mxu1 %v7353_v12  ;;  %3861 = vmatpush.bf16.msra.mxu3 %v7357_v32  ;;  %v7034_v12 = vld [vmem:[%s13155_s1 + $0xe0] sm:$0xf0]  ;;  %v8373_v32 = vld [vmem:[%s13155_s1 + $0x7e4] sm:$0xf0]  ;;  %v7269_v38 = vor.u32 %v8369_v18, %v7266_v48  ;;  %13255 = vst [vmem:[#allocation14_spill] sm:$0xff] %v11283_v54 }
 0x19c   :  { %v7037_v31 = vor.u32 %v8312_v10, %v7034_v12  ;;  %v7265_v27 = vor.u32 %v8373_v32, %v7264_v20  ;;  %v8429_v10 = vld [vmem:[%s13155_s1 + $0xee4] sm:$0xf0]  ;;  %v7234_v12 = vld [vmem:[%s13155_s1 + $0x6e8] sm:$0xf0]  ;;  %v11291_v32 = vpop.f32.mrf.mxu1 }
 0x19d   :  { %3820 = vmatpush.bf16.msra.mxu0 %v7065_v14  ;;  %3848 = vmatpush.bf16.msra.mxu2 %v7069_v60  ;;  %v8433_v14 = vld [vmem:[%s13155_s1 + $0xf6c] sm:$0xf]  ;;  %v8365_v60 = vld [vmem:[%s13155_s1 + $0x6e4] sm:$0xf0]  ;;  %13256 = vst [vmem:[#allocation15_spill] sm:$0xff] %v11291_v32 }
 0x19e   :  { %v7525_v61 = vor.u32 %v8433_v14, %v7522_v46  ;;  %v8425_v19 = vld [vmem:[%s13155_s1 + $0xe6c] sm:$0xf]  ;;  %v7456_v18 = vld [vmem:[%s13155_s1 + $0xd68] sm:$0xf] }
 0x19f   :  { %3834 = vmatpush.bf16.msra.mxu1 %v7321_v55  ;;  %3862 = vmatpush.bf16.msra.mxu3 %v7325_v6  ;;  %v7232_v55 = vld [vmem:[%s13155_s1 + $0x668] sm:$0xf]  ;;  %v8361_v6 = vld [vmem:[%s13155_s1 + $0x66c] sm:$0xf] }
 0x1a0   :  { %v7490_v20 = vld [vmem:[%s13155_s1 + $0xee8] sm:$0xf0]  ;;  %v7233_v47 = vor.u32 %v8365_v60, %v7232_v55  ;;  %v7237_v29 = vor.u32 %v8361_v6, %v7234_v12  ;;  %v11330_v6 = vpop.f32.mrf.mxu2  ;;  %v7392_v32 = vld [vmem:[%s13155_s1 + $0xb68] sm:$0xf] }
 0x1a1   :  { %3821 = vmatpush.bf16.msra.mxu0 %v7033_v5  ;;  %3849 = vmatpush.bf16.msra.mxu2 %v7037_v31  ;;  %v7489_v5 = vor.u32 %v8429_v10, %v7488_v0  ;;  %v7200_v31 = vld [vmem:[%s13155_s1 + $0x568] sm:$0xf]  ;;  %v7202_v48 = vld [vmem:[%s13155_s1 + $0x5e8] sm:$0xf0]  ;;  %13257 = vst [vmem:[#allocation16_spill] sm:$0xff] %v11330_v6 }
 0x1a2   :  { %v8417_v14 = vld [vmem:[%s13155_s1 + $0xd6c] sm:$0xf]  ;;  %v7168_v0 = vld [vmem:[%s13155_s1 + $0x468] sm:$0xf] }
 0x1a3   :  { %3835 = vmatpush.bf16.msra.mxu1 %v7289_v24  ;;  %3863 = vmatpush.bf16.msra.mxu3 %v7293_v51  ;;  %v8357_v24 = vld [vmem:[%s13155_s1 + $0x5e4] sm:$0xf0]  ;;  %v7458_v46 = vld [vmem:[%s13155_s1 + $0xde8] sm:$0xf0] }
 0x1a4   :  { %3822 = vmatmul.bf16.vlgmr.msra.gmra.mxu0 %v8856_v8  ;;  %3850 = vmatmul.bf16.vlgmr.msra.gmra.mxu2 %v8856_v8  ;;  %v7201_v51 = vor.u32 %v8357_v24, %v7200_v31  ;;  %v7424_v10 = vld [vmem:[%s13155_s1 + $0xc68] sm:$0xf]  ;;  %v7461_v12 = vor.u32 %v8417_v14, %v7458_v46  ;;  %v8409_v31 = vld [vmem:[%s13155_s1 + $0xc6c] sm:$0xf] }
 0x1a5   :  { %3870 = vmatpush.bf16.msrb.mxu0 %v7265_v27  ;;  %3898 = vmatpush.bf16.msrb.mxu2 %v7269_v38  ;;  %v7493_v27 = vor.u32 %v8425_v19, %v7490_v20  ;;  %v8421_v38 = vld [vmem:[%s13155_s1 + $0xde4] sm:$0xf0]  ;;  %v8345_v20 = vld [vmem:[%s13155_s1 + $0x46c] sm:$0xf] }
 0x1a6   :  { %3836 = vmatmul.bf16.vlgmr.msra.gmra.mxu1 %v8873_v15  ;;  %3864 = vmatmul.bf16.vlgmr.msra.gmra.mxu3 %v8873_v15  ;;  %v7457_v55 = vor.u32 %v8421_v38, %v7456_v18  ;;  %v8413_v19 = vld [vmem:[%s13155_s1 + $0xce4] sm:$0xf0]  ;;  %v7426_v24 = vld [vmem:[%s13155_s1 + $0xce8] sm:$0xf0]  ;;  %v2829_v18 = vpop.f32.mrf.mxu1 }
 0x1a7   :  { %3884 = vmatpush.bf16.msrb.mxu1 %v7521_v39  ;;  %3912 = vmatpush.bf16.msrb.mxu3 %v7525_v61  ;;  %v8353_v39 = vld [vmem:[%s13155_s1 + $0x56c] sm:$0xf]  ;;  %v8349_v61 = vld [vmem:[%s13155_s1 + $0x4e4] sm:$0xf0] }
 0x1a8   :  { %v7205_v60 = vor.u32 %v8353_v39, %v7202_v48  ;;  %v7425_v39 = vor.u32 %v8413_v19, %v7424_v10  ;;  %v7136_v14 = vld [vmem:[%s13155_s1 + $0x368] sm:$0xf]  ;;  %v7394_v19 = vld [vmem:[%s13155_s1 + $0xbe8] sm:$0xf0] }
 0x1a9   :  { %3871 = vmatpush.bf16.msrb.mxu0 %v7233_v47  ;;  %3899 = vmatpush.bf16.msrb.mxu2 %v7237_v29  ;;  %v7170_v47 = vld [vmem:[%s13155_s1 + $0x4e8] sm:$0xf0]  ;;  %v2815_v29 = vpop.f32.mrf.mxu0  ;;  %v8341_v46 = vld [vmem:[%s13155_s1 + $0x3e4] sm:$0xf0] }
 0x1aa   :  { %v2830_v38 = vadd.f32 %v2829_v18, %v2815_v29  ;;  %v7173_v48 = vor.u32 %v8345_v20, %v7170_v47  ;;  %v7137_v20 = vor.u32 %v8341_v46, %v7136_v14  ;;  %v2843_v18 = vpop.f32.mrf.mxu2  ;;  %v7362_v14 = vld [vmem:[%s13155_s1 + $0xae8] sm:$0xf0] }
 0x1ab   :  { %3885 = vmatpush.bf16.msrb.mxu1 %v7489_v5  ;;  %3913 = vmatpush.bf16.msrb.mxu3 %v7493_v27  ;;  %v11341_v5 = vpop.f32.mrf.mxu3  ;;  %v7169_v27 = vor.u32 %v8349_v61, %v7168_v0  ;;  %v7138_v0 = vld [vmem:[%s13155_s1 + $0x3e8] sm:$0xf0]  ;;  %v13259_v61 = vmax.f32 %v9717_v57, %v10501_v50  ;;  %v7104_v57 = vld [vmem:[%s13155_s1 + $0x268] sm:$0xf] }
 0x1ac   :  { %13258 = vst [vmem:[#allocation17_spill] sm:$0xff] %v11341_v5  ;;  %v8333_v50 = vld [vmem:[%s13155_s1 + $0x2e4] sm:$0xf0]  ;;  %v7400_v5 = vld [vmem:[%s13155_s1 + $0xb70] sm:$0xf] }
 0x1ad   :  { %3872 = vmatpush.bf16.msrb.mxu0 %v7201_v51  ;;  %3900 = vmatpush.bf16.msrb.mxu2 %v7205_v60  ;;  %v7429_v51 = vor.u32 %v8409_v31, %v7426_v24  ;;  %v8337_v60 = vld [vmem:[%s13155_s1 + $0x36c] sm:$0xf]  ;;  %v11370_v10 = vmax.f32 %v13259_v61, %v2830_v38  ;;  %v7360_v31 = vld [vmem:[%s13155_s1 + $0xa68] sm:$0xf] }
 0x1ae   :  { %v7141_v29 = vor.u32 %v8337_v60, %v7138_v0  ;;  %v7106_v38 = vld [vmem:[%s13155_s1 + $0x2e8] sm:$0xf0]  ;;  %v7072_v0 = vld [vmem:[%s13155_s1 + $0x168] sm:$0xf] }
 0x1af   :  { %3886 = vmatpush.bf16.msrb.mxu1 %v7457_v55  ;;  %3914 = vmatpush.bf16.msrb.mxu3 %v7461_v12  ;;  %v8405_v55 = vld [vmem:[%s13155_s1 + $0xbe4] sm:$0xf0]  ;;  %v8401_v12 = vld [vmem:[%s13155_s1 + $0xb6c] sm:$0xf] }
 0x1b0   :  { %v7393_v47 = vor.u32 %v8405_v55, %v7392_v32  ;;  %v7397_v24 = vor.u32 %v8401_v12, %v7394_v19  ;;  %v8397_v32 = vld [vmem:[%s13155_s1 + $0xae4] sm:$0xf0]  ;;  %v13260_v19 = vmax.f32 %v9749_v11, %v10553_v33  ;;  %v7330_v11 = vld [vmem:[%s13155_s1 + $0x9e8] sm:$0xf0] }
 0x1b1   :  { %3873 = vmatpush.bf16.msrb.mxu0 %v7169_v27  ;;  %3901 = vmatpush.bf16.msrb.mxu2 %v7173_v48  ;;  %v8329_v27 = vld [vmem:[%s13155_s1 + $0x26c] sm:$0xf]  ;;  %v7361_v55 = vor.u32 %v8397_v32, %v7360_v31  ;;  %v8325_v61 = vld [vmem:[%s13155_s1 + $0x1e4] sm:$0xf0] }
 0x1b2   :  { %v8393_v48 = vld [vmem:[%s13155_s1 + $0xa6c] sm:$0xf]  ;;  %v7109_v60 = vor.u32 %v8329_v27, %v7106_v38  ;;  %v7328_v12 = vld [vmem:[%s13155_s1 + $0x968] sm:$0xf]  ;;  %v7073_v33 = vor.u32 %v8325_v61, %v7072_v0  ;;  %v8374_v0 = vld [vmem:[%s13155_s1 + $0x7ec] sm:$0xf0] }
 0x1b3   :  { %3887 = vmatpush.bf16.msrb.mxu1 %v7425_v39  ;;  %3915 = vmatpush.bf16.msrb.mxu3 %v7429_v51  ;;  %v2857_v39 = vpop.f32.mrf.mxu3  ;;  %v7105_v51 = vor.u32 %v8333_v50, %v7104_v57  ;;  %v8321_v57 = vld [vmem:[%s13155_s1 + $0x16c] sm:$0xf]  ;;  %v7296_v38 = vld [vmem:[%s13155_s1 + $0x868] sm:$0xf]  ;;  %v7528_v61 = vld [vmem:[%s13155_s1 + $0xf70] sm:$0xf] }
 0x1b4   :  { %v2858_v46 = vadd.f32 %v2857_v39, %v2843_v18  ;;  %v7074_v50 = vld [vmem:[%s13155_s1 + $0x1e8] sm:$0xf0]  ;;  %v8317_v18 = vld [vmem:[%s13155_s1 + $0xe4] sm:$0xf0] }
 0x1b5   :  { %3874 = vmatpush.bf16.msrb.mxu0 %v7137_v20  ;;  %3902 = vmatpush.bf16.msrb.mxu2 %v7141_v29  ;;  %v8389_v29 = vld [vmem:[%s13155_s1 + $0x9e4] sm:$0xf0]  ;;  %v8385_v31 = vld [vmem:[%s13155_s1 + $0x96c] sm:$0xf]  ;;  %v7077_v27 = vor.u32 %v8321_v57, %v7074_v50 }
 0x1b6   :  { %v11414_v20 = vmax.f32 %v13260_v19, %v2858_v46  ;;  %v7329_v32 = vor.u32 %v8389_v29, %v7328_v12  ;;  %v8381_v39 = vld [vmem:[%s13155_s1 + $0x8e4] sm:$0xf0]  ;;  %v7042_v46 = vld [vmem:[%s13155_s1 + $0xe8] sm:$0xf0]  ;;  %v8438_v19 = vld [vmem:[%s13155_s1 + $0xfec] sm:$0xf0] }
 0x1b7   :  { %3888 = vmatpush.bf16.msrb.mxu1 %v7393_v47  ;;  %3916 = vmatpush.bf16.msrb.mxu3 %v7397_v24  ;;  %v7365_v47 = vor.u32 %v8393_v48, %v7362_v14  ;;  %v7040_v24 = vld [vmem:[%s13155_s1 + $0x68] sm:$0xf]  ;;  %v8313_v48 = vld [vmem:[%s13155_s1 + $0x6c] sm:$0xf]  ;;  %v7333_v14 = vor.u32 %v8385_v31, %v7330_v11  ;;  %v7274_v29 = vld [vmem:[%s13155_s1 + $0x7f0] sm:$0xf0]  ;;  %v7297_v57 = vor.u32 %v8381_v39, %v7296_v38 }
 0x1b8   :  { %v7041_v12 = vor.u32 %v8317_v18, %v7040_v24  ;;  %v7045_v50 = vor.u32 %v8313_v48, %v7042_v46  ;;  %v8434_v31 = vld [vmem:[%s13155_s1 + $0xf74] sm:$0xf]  ;;  %v7529_v18 = vor.u32 %v8438_v19, %v7528_v61  ;;  %v7496_v38 = vld [vmem:[%s13155_s1 + $0xe70] sm:$0xf] }
 0x1b9   :  { %3875 = vmatpush.bf16.msrb.mxu0 %v7105_v51  ;;  %3903 = vmatpush.bf16.msrb.mxu2 %v7109_v60  ;;  %v8377_v51 = vld [vmem:[%s13155_s1 + $0x86c] sm:$0xf]  ;;  %v7272_v60 = vld [vmem:[%s13155_s1 + $0x770] sm:$0xf]  ;;  %v7530_v11 = vld [vmem:[%s13155_s1 + $0xff0] sm:$0xf0] }
 0x1ba   :  { %v7273_v24 = vor.u32 %v8374_v0, %v7272_v60  ;;  %v7533_v39 = vor.u32 %v8434_v31, %v7530_v11  ;;  %v8430_v48 = vld [vmem:[%s13155_s1 + $0xeec] sm:$0xf0]  ;;  %v7242_v46 = vld [vmem:[%s13155_s1 + $0x6f0] sm:$0xf0]  ;;  %v11505_v0 = vpop.f32.mrf.mxu1 }
 0x1bb   :  { %3889 = vmatpush.bf16.msrb.mxu1 %v7361_v55  ;;  %3917 = vmatpush.bf16.msrb.mxu3 %v7365_v47  ;;  %v7298_v55 = vld [vmem:[%s13155_s1 + $0x8e8] sm:$0xf0]  ;;  %v8370_v47 = vld [vmem:[%s13155_s1 + $0x774] sm:$0xf] }
 0x1bc   :  { %v7277_v54 = vor.u32 %v8370_v47, %v7274_v29  ;;  %v7498_v60 = vld [vmem:[%s13155_s1 + $0xef0] sm:$0xf0]  ;;  %v7208_v47 = vld [vmem:[%s13155_s1 + $0x570] sm:$0xf] }
 0x1bd   :  { %3876 = vmatpush.bf16.msrb.mxu0 %v7073_v33  ;;  %3904 = vmatpush.bf16.msrb.mxu2 %v7077_v27  ;;  %v7301_v33 = vor.u32 %v8377_v51, %v7298_v55  ;;  %v8366_v27 = vld [vmem:[%s13155_s1 + $0x6ec] sm:$0xf0]  ;;  %v11497_v51 = vpop.f32.mrf.mxu0  ;;  %v8426_v55 = vld [vmem:[%s13155_s1 + $0xe74] sm:$0xf] }
 0x1be   :  { %v8358_v29 = vld [vmem:[%s13155_s1 + $0x5ec] sm:$0xf0]  ;;  %v8354_v31 = vld [vmem:[%s13155_s1 + $0x574] sm:$0xf] }
 0x1bf   :  { %3890 = vmatpush.bf16.msrb.mxu1 %v7329_v32  ;;  %3918 = vmatpush.bf16.msrb.mxu3 %v7333_v14  ;;  %v7240_v32 = vld [vmem:[%s13155_s1 + $0x670] sm:$0xf]  ;;  %v8362_v14 = vld [vmem:[%s13155_s1 + $0x674] sm:$0xf] }
 0x1c0   :  { %v7241_v61 = vor.u32 %v8366_v27, %v7240_v32  ;;  %v7245_v19 = vor.u32 %v8362_v14, %v7242_v46  ;;  %v7210_v11 = vld [vmem:[%s13155_s1 + $0x5f0] sm:$0xf0]  ;;  %v11544_v14 = vpop.f32.mrf.mxu2 }
 0x1c1   :  { %3877 = vmatpush.bf16.msrb.mxu0 %v7041_v12  ;;  %3905 = vmatpush.bf16.msrb.mxu2 %v7045_v50  ;;  %v7497_v12 = vor.u32 %v8430_v48, %v7496_v38  ;;  %v7501_v50 = vor.u32 %v8426_v55, %v7498_v60  ;;  %v7213_v27 = vor.u32 %v8354_v31, %v7210_v11  ;;  %v7176_v38 = vld [vmem:[%s13155_s1 + $0x470] sm:$0xf]  ;;  %v8346_v60 = vld [vmem:[%s13155_s1 + $0x474] sm:$0xf] }
 0x1c2   :  { %v7432_v48 = vld [vmem:[%s13155_s1 + $0xc70] sm:$0xf] }
 0x1c3   :  { %3891 = vmatpush.bf16.msrb.mxu1 %v7297_v57  ;;  %3919 = vmatpush.bf16.msrb.mxu3 %v7301_v33  ;;  %v7464_v57 = vld [vmem:[%s13155_s1 + $0xd70] sm:$0xf]  ;;  %v8418_v33 = vld [vmem:[%s13155_s1 + $0xd74] sm:$0xf] }
 0x1c4   :  { %3878 = vmatmul.bf16.vlgmr.msrb.gmra.mxu0 %v8856_v8  ;;  %3906 = vmatmul.bf16.vlgmr.msrb.gmra.mxu2 %v8856_v8  ;;  %v8414_v55 = vld [vmem:[%s13155_s1 + $0xcec] sm:$0xf0] }
 0x1c5   :  { %3926 = vmatpush.bf16.msra.mxu0 %v7273_v24  ;;  %3954 = vmatpush.bf16.msra.mxu2 %v7277_v54  ;;  %v8422_v54 = vld [vmem:[%s13155_s1 + $0xdec] sm:$0xf0]  ;;  %v7466_v24 = vld [vmem:[%s13155_s1 + $0xdf0] sm:$0xf0]  ;;  %v7433_v31 = vor.u32 %v8414_v55, %v7432_v48 }
 0x1c6   :  { %3892 = vmatmul.bf16.vlgmr.msrb.gmra.mxu1 %v8873_v15  ;;  %3920 = vmatmul.bf16.vlgmr.msrb.gmra.mxu3 %v8873_v15  ;;  %v7465_v32 = vor.u32 %v8422_v54, %v7464_v57  ;;  %v7469_v46 = vor.u32 %v8418_v33, %v7466_v24  ;;  %v2885_v57 = vpop.f32.mrf.mxu1  ;;  %v7144_v33 = vld [vmem:[%s13155_s1 + $0x370] sm:$0xf]  ;;  %v7402_v55 = vld [vmem:[%s13155_s1 + $0xbf0] sm:$0xf0] }
 0x1c7   :  { %3940 = vmatpush.bf16.msra.mxu1 %v7529_v18  ;;  %3968 = vmatpush.bf16.msra.mxu3 %v7533_v39  ;;  %v7209_v18 = vor.u32 %v8358_v29, %v7208_v47  ;;  %v8350_v39 = vld [vmem:[%s13155_s1 + $0x4ec] sm:$0xf0]  ;;  %v8410_v47 = vld [vmem:[%s13155_s1 + $0xc74] sm:$0xf] }
 0x1c8   :  { %v7434_v29 = vld [vmem:[%s13155_s1 + $0xcf0] sm:$0xf0]  ;;  %v8342_v24 = vld [vmem:[%s13155_s1 + $0x3ec] sm:$0xf0] }
 0x1c9   :  { %3927 = vmatpush.bf16.msra.mxu0 %v7241_v61  ;;  %3955 = vmatpush.bf16.msra.mxu2 %v7245_v19  ;;  %v7178_v61 = vld [vmem:[%s13155_s1 + $0x4f0] sm:$0xf0]  ;;  %v2871_v19 = vpop.f32.mrf.mxu0 }
 0x1ca   :  { %v2886_v54 = vadd.f32 %v2885_v57, %v2871_v19  ;;  %v7181_v11 = vor.u32 %v8346_v60, %v7178_v61  ;;  %v7145_v60 = vor.u32 %v8342_v24, %v7144_v33  ;;  %v2899_v57 = vpop.f32.mrf.mxu2  ;;  %v7370_v33 = vld [vmem:[%s13155_s1 + $0xaf0] sm:$0xf0] }
 0x1cb   :  { %3941 = vmatpush.bf16.msra.mxu1 %v7497_v12  ;;  %3969 = vmatpush.bf16.msra.mxu3 %v7501_v50  ;;  %v11555_v12 = vpop.f32.mrf.mxu3  ;;  %v7177_v50 = vor.u32 %v8350_v39, %v7176_v38  ;;  %v7146_v38 = vld [vmem:[%s13155_s1 + $0x3f0] sm:$0xf0]  ;;  %v13261_v39 = vmax.f32 %v9895_v26, %v10713_v56  ;;  %v7112_v26 = vld [vmem:[%s13155_s1 + $0x270] sm:$0xf] }
 0x1cc   :  { %v8334_v56 = vld [vmem:[%s13155_s1 + $0x2ec] sm:$0xf0] }
 0x1cd   :  { %3928 = vmatpush.bf16.msra.mxu0 %v7209_v18  ;;  %3956 = vmatpush.bf16.msra.mxu2 %v7213_v27  ;;  %v7437_v18 = vor.u32 %v8410_v47, %v7434_v29  ;;  %v8338_v27 = vld [vmem:[%s13155_s1 + $0x374] sm:$0xf]  ;;  %v11584_v48 = vmax.f32 %v13261_v39, %v2886_v54  ;;  %v7368_v47 = vld [vmem:[%s13155_s1 + $0xa70] sm:$0xf] }
 0x1ce   :  { %v7149_v19 = vor.u32 %v8338_v27, %v7146_v38  ;;  %v7114_v54 = vld [vmem:[%s13155_s1 + $0x2f0] sm:$0xf0]  ;;  %v7080_v38 = vld [vmem:[%s13155_s1 + $0x170] sm:$0xf] }
 0x1cf   :  { %3942 = vmatpush.bf16.msra.mxu1 %v7465_v32  ;;  %3970 = vmatpush.bf16.msra.mxu3 %v7469_v46  ;;  %v8406_v32 = vld [vmem:[%s13155_s1 + $0xbec] sm:$0xf0]  ;;  %v8402_v46 = vld [vmem:[%s13155_s1 + $0xb74] sm:$0xf] }
 0x1d0   :  { %v7401_v61 = vor.u32 %v8406_v32, %v7400_v5  ;;  %v7405_v29 = vor.u32 %v8402_v46, %v7402_v55  ;;  %v8398_v5 = vld [vmem:[%s13155_s1 + $0xaec] sm:$0xf0]  ;;  %v13262_v55 = vmax.f32 %v9927_v43, %v10765_v49  ;;  %v7338_v43 = vld [vmem:[%s13155_s1 + $0x9f0] sm:$0xf0] }
 0x1d1   :  { %3929 = vmatpush.bf16.msra.mxu0 %v7177_v50  ;;  %3957 = vmatpush.bf16.msra.mxu2 %v7181_v11  ;;  %v8330_v50 = vld [vmem:[%s13155_s1 + $0x274] sm:$0xf]  ;;  %v7369_v32 = vor.u32 %v8398_v5, %v7368_v47  ;;  %v8326_v39 = vld [vmem:[%s13155_s1 + $0x1ec] sm:$0xf0] }
 0x1d2   :  { %v8394_v11 = vld [vmem:[%s13155_s1 + $0xa74] sm:$0xf]  ;;  %v7117_v27 = vor.u32 %v8330_v50, %v7114_v54  ;;  %v7336_v46 = vld [vmem:[%s13155_s1 + $0x970] sm:$0xf]  ;;  %v7081_v49 = vor.u32 %v8326_v39, %v7080_v38  ;;  %v8375_v38 = vld [vmem:[%s13155_s1 + $0x7f4] sm:$0xf0] }
 0x1d3   :  { %3943 = vmatpush.bf16.msra.mxu1 %v7433_v31  ;;  %3971 = vmatpush.bf16.msra.mxu3 %v7437_v18  ;;  %v2913_v31 = vpop.f32.mrf.mxu3  ;;  %v7113_v18 = vor.u32 %v8334_v56, %v7112_v26  ;;  %v8322_v26 = vld [vmem:[%s13155_s1 + $0x174] sm:$0xf]  ;;  %v7304_v54 = vld [vmem:[%s13155_s1 + $0x870] sm:$0xf]  ;;  %v7536_v39 = vld [vmem:[%s13155_s1 + $0xf78] sm:$0xf] }
 0x1d4   :  { %v2914_v24 = vadd.f32 %v2913_v31, %v2899_v57  ;;  %v7082_v56 = vld [vmem:[%s13155_s1 + $0x1f0] sm:$0xf0]  ;;  %v8318_v57 = vld [vmem:[%s13155_s1 + $0xec] sm:$0xf0] }
 0x1d5   :  { %3930 = vmatpush.bf16.msra.mxu0 %v7145_v60  ;;  %3958 = vmatpush.bf16.msra.mxu2 %v7149_v19  ;;  %v8390_v19 = vld [vmem:[%s13155_s1 + $0x9ec] sm:$0xf0]  ;;  %v8386_v47 = vld [vmem:[%s13155_s1 + $0x974] sm:$0xf]  ;;  %v7085_v50 = vor.u32 %v8322_v26, %v7082_v56 }
 0x1d6   :  { %v11628_v60 = vmax.f32 %v13262_v55, %v2914_v24  ;;  %v7337_v5 = vor.u32 %v8390_v19, %v7336_v46  ;;  %v8382_v31 = vld [vmem:[%s13155_s1 + $0x8ec] sm:$0xf0]  ;;  %v7050_v24 = vld [vmem:[%s13155_s1 + $0xf0] sm:$0xf0]  ;;  %v8439_v55 = vld [vmem:[%s13155_s1 + $0xff4] sm:$0xf0] }
 0x1d7   :  { %3944 = vmatpush.bf16.msra.mxu1 %v7401_v61  ;;  %3972 = vmatpush.bf16.msra.mxu3 %v7405_v29  ;;  %v7373_v61 = vor.u32 %v8394_v11, %v7370_v33  ;;  %v7048_v29 = vld [vmem:[%s13155_s1 + $0x70] sm:$0xf]  ;;  %v8314_v11 = vld [vmem:[%s13155_s1 + $0x74] sm:$0xf]  ;;  %v7341_v33 = vor.u32 %v8386_v47, %v7338_v43  ;;  %v7282_v19 = vld [vmem:[%s13155_s1 + $0x7f8] sm:$0xf0]  ;;  %v7305_v26 = vor.u32 %v8382_v31, %v7304_v54 }
 0x1d8   :  { %v7049_v46 = vor.u32 %v8318_v57, %v7048_v29  ;;  %v7053_v56 = vor.u32 %v8314_v11, %v7050_v24  ;;  %v8435_v47 = vld [vmem:[%s13155_s1 + $0xf7c] sm:$0xf]  ;;  %v7537_v57 = vor.u32 %v8439_v55, %v7536_v39  ;;  %v7504_v54 = vld [vmem:[%s13155_s1 + $0xe78] sm:$0xf] }
 0x1d9   :  { %3931 = vmatpush.bf16.msra.mxu0 %v7113_v18  ;;  %3959 = vmatpush.bf16.msra.mxu2 %v7117_v27  ;;  %v8378_v18 = vld [vmem:[%s13155_s1 + $0x874] sm:$0xf]  ;;  %v7280_v27 = vld [vmem:[%s13155_s1 + $0x778] sm:$0xf]  ;;  %v7538_v43 = vld [vmem:[%s13155_s1 + $0xff8] sm:$0xf0] }
 0x1da   :  { %v7281_v29 = vor.u32 %v8375_v38, %v7280_v27  ;;  %v7541_v31 = vor.u32 %v8435_v47, %v7538_v43  ;;  %v8431_v11 = vld [vmem:[%s13155_s1 + $0xef4] sm:$0xf0]  ;;  %v7250_v24 = vld [vmem:[%s13155_s1 + $0x6f8] sm:$0xf0]  ;;  %v11719_v38 = vpop.f32.mrf.mxu1 }
 0x1db   :  { %3945 = vmatpush.bf16.msra.mxu1 %v7369_v32  ;;  %3973 = vmatpush.bf16.msra.mxu3 %v7373_v61  ;;  %v7306_v32 = vld [vmem:[%s13155_s1 + $0x8f0] sm:$0xf0]  ;;  %v8371_v61 = vld [vmem:[%s13155_s1 + $0x77c] sm:$0xf] }
 0x1dc   :  { %v7285_v6 = vor.u32 %v8371_v61, %v7282_v19  ;;  %v7506_v27 = vld [vmem:[%s13155_s1 + $0xef8] sm:$0xf0]  ;;  %v7216_v61 = vld [vmem:[%s13155_s1 + $0x578] sm:$0xf] }
 0x1dd   :  { %3932 = vmatpush.bf16.msra.mxu0 %v7081_v49  ;;  %3960 = vmatpush.bf16.msra.mxu2 %v7085_v50  ;;  %v7309_v49 = vor.u32 %v8378_v18, %v7306_v32  ;;  %v8367_v50 = vld [vmem:[%s13155_s1 + $0x6f4] sm:$0xf0]  ;;  %v11711_v18 = vpop.f32.mrf.mxu0  ;;  %v8427_v32 = vld [vmem:[%s13155_s1 + $0xe7c] sm:$0xf] }
 0x1de   :  { %v8359_v19 = vld [vmem:[%s13155_s1 + $0x5f4] sm:$0xf0]  ;;  %v8355_v47 = vld [vmem:[%s13155_s1 + $0x57c] sm:$0xf] }
 0x1df   :  { %3946 = vmatpush.bf16.msra.mxu1 %v7337_v5  ;;  %3974 = vmatpush.bf16.msra.mxu3 %v7341_v33  ;;  %v7248_v5 = vld [vmem:[%s13155_s1 + $0x678] sm:$0xf]  ;;  %v8363_v33 = vld [vmem:[%s13155_s1 + $0x67c] sm:$0xf] }
 0x1e0   :  { %v7249_v39 = vor.u32 %v8367_v50, %v7248_v5  ;;  %v7253_v55 = vor.u32 %v8363_v33, %v7250_v24  ;;  %v7218_v43 = vld [vmem:[%s13155_s1 + $0x5f8] sm:$0xf0]  ;;  %v11758_v33 = vpop.f32.mrf.mxu2 }
 0x1e1   :  { %3933 = vmatpush.bf16.msra.mxu0 %v7049_v46  ;;  %3961 = vmatpush.bf16.msra.mxu2 %v7053_v56  ;;  %v7505_v46 = vor.u32 %v8431_v11, %v7504_v54  ;;  %v7509_v56 = vor.u32 %v8427_v32, %v7506_v27  ;;  %v7221_v50 = vor.u32 %v8355_v47, %v7218_v43  ;;  %v7184_v54 = vld [vmem:[%s13155_s1 + $0x478] sm:$0xf]  ;;  %v8347_v27 = vld [vmem:[%s13155_s1 + $0x47c] sm:$0xf] }
 0x1e2   :  { %v7440_v11 = vld [vmem:[%s13155_s1 + $0xc78] sm:$0xf]  ;;  %13263 = vst [vmem:[#allocation18_spill] sm:$0xff] %v11758_v33 }
 0x1e3   :  { %3947 = vmatpush.bf16.msra.mxu1 %v7305_v26  ;;  %3975 = vmatpush.bf16.msra.mxu3 %v7309_v49  ;;  %v7472_v26 = vld [vmem:[%s13155_s1 + $0xd78] sm:$0xf]  ;;  %v8419_v49 = vld [vmem:[%s13155_s1 + $0xd7c] sm:$0xf] }
 0x1e4   :  { %3934 = vmatmul.bf16.vlgmr.msra.gmra.mxu0 %v8856_v8  ;;  %3962 = vmatmul.bf16.vlgmr.msra.gmra.mxu2 %v8856_v8  ;;  %v8415_v32 = vld [vmem:[%s13155_s1 + $0xcf4] sm:$0xf0] }
 0x1e5   :  { %3982 = vmatpush.bf16.msrb.mxu0 %v7281_v29  ;;  %4010 = vmatpush.bf16.msrb.mxu2 %v7285_v6  ;;  %v8423_v6 = vld [vmem:[%s13155_s1 + $0xdf4] sm:$0xf0]  ;;  %v7474_v29 = vld [vmem:[%s13155_s1 + $0xdf8] sm:$0xf0]  ;;  %v7441_v47 = vor.u32 %v8415_v32, %v7440_v11 }
 0x1e6   :  { %3948 = vmatmul.bf16.vlgmr.msra.gmra.mxu1 %v8873_v15  ;;  %3976 = vmatmul.bf16.vlgmr.msra.gmra.mxu3 %v8873_v15  ;;  %v7473_v5 = vor.u32 %v8423_v6, %v7472_v26  ;;  %v7477_v24 = vor.u32 %v8419_v49, %v7474_v29  ;;  %v2941_v26 = vpop.f32.mrf.mxu1  ;;  %v7152_v49 = vld [vmem:[%s13155_s1 + $0x378] sm:$0xf]  ;;  %v7410_v32 = vld [vmem:[%s13155_s1 + $0xbf8] sm:$0xf0] }
 0x1e7   :  { %3996 = vmatpush.bf16.msrb.mxu1 %v7537_v57  ;;  %4024 = vmatpush.bf16.msrb.mxu3 %v7541_v31  ;;  %v7217_v57 = vor.u32 %v8359_v19, %v7216_v61  ;;  %v8351_v31 = vld [vmem:[%s13155_s1 + $0x4f4] sm:$0xf0]  ;;  %v8411_v61 = vld [vmem:[%s13155_s1 + $0xc7c] sm:$0xf] }
 0x1e8   :  { %v7442_v19 = vld [vmem:[%s13155_s1 + $0xcf8] sm:$0xf0]  ;;  %v8343_v29 = vld [vmem:[%s13155_s1 + $0x3f4] sm:$0xf0] }
 0x1e9   :  { %3983 = vmatpush.bf16.msrb.mxu0 %v7249_v39  ;;  %4011 = vmatpush.bf16.msrb.mxu2 %v7253_v55  ;;  %v7186_v39 = vld [vmem:[%s13155_s1 + $0x4f8] sm:$0xf0]  ;;  %v2927_v55 = vpop.f32.mrf.mxu0 }
 0x1ea   :  { %v2942_v6 = vadd.f32 %v2941_v26, %v2927_v55  ;;  %v7189_v43 = vor.u32 %v8347_v27, %v7186_v39  ;;  %v7153_v27 = vor.u32 %v8343_v29, %v7152_v49  ;;  %v2955_v26 = vpop.f32.mrf.mxu2  ;;  %v7378_v49 = vld [vmem:[%s13155_s1 + $0xaf8] sm:$0xf0] }
 0x1eb   :  { %3997 = vmatpush.bf16.msrb.mxu1 %v7505_v46  ;;  %4025 = vmatpush.bf16.msrb.mxu3 %v7509_v56  ;;  %v11769_v46 = vpop.f32.mrf.mxu3  ;;  %v7185_v56 = vor.u32 %v8351_v31, %v7184_v54  ;;  %v7154_v54 = vld [vmem:[%s13155_s1 + $0x3f8] sm:$0xf0]  ;;  %v13265_v31 = vmax.f32 %v10103_v22, %v10925_v62  ;;  %v7120_v22 = vld [vmem:[%s13155_s1 + $0x278] sm:$0xf] }
 0x1ec   :  { %13264 = vst [vmem:[#allocation19_spill] sm:$0xff] %v11769_v46  ;;  %v8335_v62 = vld [vmem:[%s13155_s1 + $0x2f4] sm:$0xf0]  ;;  %v7546_v46 = vld [vmem:[%s13157_s3 + $0x88] sm:$0xf0] }
 0x1ed   :  { %3984 = vmatpush.bf16.msrb.mxu0 %v7217_v57  ;;  %4012 = vmatpush.bf16.msrb.mxu2 %v7221_v50  ;;  %v7445_v57 = vor.u32 %v8411_v61, %v7442_v19  ;;  %v8339_v50 = vld [vmem:[%s13155_s1 + $0x37c] sm:$0xf]  ;;  %v11798_v11 = vmax.f32 %v13265_v31, %v2942_v6  ;;  %v7376_v61 = vld [vmem:[%s13155_s1 + $0xa78] sm:$0xf] }
 0x1ee   :  { %v7157_v55 = vor.u32 %v8339_v50, %v7154_v54  ;;  %v7122_v6 = vld [vmem:[%s13155_s1 + $0x2f8] sm:$0xf0]  ;;  %v7088_v54 = vld [vmem:[%s13155_s1 + $0x178] sm:$0xf] }
 0x1ef   :  { %3998 = vmatpush.bf16.msrb.mxu1 %v7473_v5  ;;  %4026 = vmatpush.bf16.msrb.mxu3 %v7477_v24  ;;  %v8407_v5 = vld [vmem:[%s13155_s1 + $0xbf4] sm:$0xf0]  ;;  %13266 = vst [vmem:[#allocation20_spill] sm:$0xff] %v11798_v11  ;;  %v8403_v24 = vld [vmem:[%s13155_s1 + $0xb7c] sm:$0xf] }
 0x1f0   :  { %v7409_v39 = vor.u32 %v8407_v5, %v7408_v30  ;;  %v7413_v19 = vor.u32 %v8403_v24, %v7410_v32  ;;  %v8399_v30 = vld [vmem:[%s13155_s1 + $0xaf4] sm:$0xf0]  ;;  %v13267_v32 = vmax.f32 %v10135_v40, %v10977_v13  ;;  %v7346_v40 = vld [vmem:[%s13155_s1 + $0x9f8] sm:$0xf0]  ;;  %v7562_v11 = vld [vmem:[%s13157_s3 + $0xa8] sm:$0xf0] }
 0x1f1   :  { %3985 = vmatpush.bf16.msrb.mxu0 %v7185_v56  ;;  %4013 = vmatpush.bf16.msrb.mxu2 %v7189_v43  ;;  %v8331_v56 = vld [vmem:[%s13155_s1 + $0x27c] sm:$0xf]  ;;  %v7377_v5 = vor.u32 %v8399_v30, %v7376_v61  ;;  %v8327_v31 = vld [vmem:[%s13155_s1 + $0x1f4] sm:$0xf0] }
 0x1f2   :  { %v8395_v43 = vld [vmem:[%s13155_s1 + $0xa7c] sm:$0xf]  ;;  %v7125_v50 = vor.u32 %v8331_v56, %v7122_v6  ;;  %v7344_v24 = vld [vmem:[%s13155_s1 + $0x978] sm:$0xf]  ;;  %v7089_v13 = vor.u32 %v8327_v31, %v7088_v54 }
 0x1f3   :  { %3999 = vmatpush.bf16.msrb.mxu1 %v7441_v47  ;;  %4027 = vmatpush.bf16.msrb.mxu3 %v7445_v57  ;;  %v2969_v47 = vpop.f32.mrf.mxu3  ;;  %v7121_v57 = vor.u32 %v8335_v62, %v7120_v22  ;;  %v8323_v22 = vld [vmem:[%s13155_s1 + $0x17c] sm:$0xf]  ;;  %v8319_v56 = vld [vmem:[%s13155_s1 + $0xf4] sm:$0xf0] }
 0x1f4   :  { %v2970_v29 = vadd.f32 %v2969_v47, %v2955_v26  ;;  %v7090_v62 = vld [vmem:[%s13155_s1 + $0x1f8] sm:$0xf0]  ;;  %v7312_v6 = vld [vmem:[%s13155_s1 + $0x878] sm:$0xf] }
 0x1f5   :  { %3986 = vmatpush.bf16.msrb.mxu0 %v7153_v27  ;;  %4014 = vmatpush.bf16.msrb.mxu2 %v7157_v55  ;;  %v8391_v55 = vld [vmem:[%s13155_s1 + $0x9f4] sm:$0xf0]  ;;  %v8387_v61 = vld [vmem:[%s13155_s1 + $0x97c] sm:$0xf]  ;;  %v7093_v30 = vor.u32 %v8323_v22, %v7090_v62 }
 0x1f6   :  { %v11842_v27 = vmax.f32 %v13267_v32, %v2970_v29  ;;  %v7345_v26 = vor.u32 %v8391_v55, %v7344_v24  ;;  %v8383_v47 = vld [vmem:[%s13155_s1 + $0x8f4] sm:$0xf0]  ;;  %v7058_v29 = vld [vmem:[%s13155_s1 + $0xf8] sm:$0xf0]  ;;  %v7664_v24 = vld [vmem:[%s13157_s3 + $0x170] sm:$0xf] }
 0x1f7   :  { %4000 = vmatpush.bf16.msrb.mxu1 %v7409_v39  ;;  %4028 = vmatpush.bf16.msrb.mxu3 %v7413_v19  ;;  %v7381_v39 = vor.u32 %v8395_v43, %v7378_v49  ;;  %v7056_v19 = vld [vmem:[%s13155_s1 + $0x78] sm:$0xf]  ;;  %v7349_v43 = vor.u32 %v8387_v61, %v7346_v40  ;;  %v8315_v49 = vld [vmem:[%s13155_s1 + $0x7c] sm:$0xf]  ;;  %v8454_v61 = vld [vmem:[%s13157_s3 + $0xf4] sm:$0xf] }
 0x1f8   :  { %13268 = vst [vmem:[#allocation21_spill] sm:$0xff] %v11842_v27  ;;  %v8455_v54 = vld [vmem:[%s13157_s3 + $0xf4] sm:$0xf0]  ;;  %v7057_v31 = vor.u32 %v8319_v56, %v7056_v19  ;;  %v7061_v55 = vor.u32 %v8315_v49, %v7058_v29  ;;  %v7602_v40 = vld [vmem:[%s13157_s3 + $0xf8] sm:$0xf0]  ;;  %v11927_v29 = vpop.f32.mrf.mxu1 }
 0x1f9   :  { %3987 = vmatpush.bf16.msrb.mxu0 %v7121_v57  ;;  %4015 = vmatpush.bf16.msrb.mxu2 %v7125_v50  ;;  %v8379_v57 = vld [vmem:[%s13155_s1 + $0x87c] sm:$0xf]  ;;  %v7600_v50 = vld [vmem:[%s13157_s3 + $0xf0] sm:$0xf]  ;;  %v8471_v32 = vld [vmem:[%s13157_s3 + $0x174] sm:$0xf0]  ;;  %v11925_v49 = vor.u32 %v8454_v61, %v7602_v40 }
 0x1fa   :  { %v11895_v62 = vor.u32 %v8455_v54, %v7600_v50  ;;  %v11906_v19 = vor.u32 %v8471_v32, %v7664_v24  ;;  %v8453_v56 = vld [vmem:[%s13157_s3 + $0xe4] sm:$0xf0]  ;;  %13272 = vst [vmem:[#allocation25_spill] sm:$0xff] %v11927_v29  ;;  %v8452_v50 = vld [vmem:[%s13157_s3 + $0xe4] sm:$0xf] }
 0x1fb   :  { %4001 = vmatpush.bf16.msrb.mxu1 %v7377_v5  ;;  %4029 = vmatpush.bf16.msrb.mxu3 %v7381_v39  ;;  %v7314_v5 = vld [vmem:[%s13155_s1 + $0x8f8] sm:$0xf0]  ;;  %v7313_v39 = vor.u32 %v8383_v47, %v7312_v6  ;;  %v7656_v6 = vld [vmem:[%s13157_s3 + $0x160] sm:$0xf]  ;;  %v8469_v47 = vld [vmem:[%s13157_s3 + $0x164] sm:$0xf0] }
 0x1fc   :  { %v7317_v22 = vor.u32 %v8379_v57, %v7314_v5  ;;  %13269 = vst [vmem:[#allocation22_spill] sm:$0xff] %v11906_v19  ;;  %v7594_v54 = vld [vmem:[%s13157_s3 + $0xe8] sm:$0xf0]  ;;  %v11945_v24 = vor.u32 %v8469_v47, %v7656_v6  ;;  %v8467_v61 = vld [vmem:[%s13157_s3 + $0x154] sm:$0xf0] }
 0x1fd   :  { %3988 = vmatpush.bf16.msrb.mxu0 %v7089_v13  ;;  %4016 = vmatpush.bf16.msrb.mxu2 %v7093_v30  ;;  %v8470_v13 = vld [vmem:[%s13157_s3 + $0x174] sm:$0xf]  ;;  %v7592_v30 = vld [vmem:[%s13157_s3 + $0xe0] sm:$0xf]  ;;  %13271 = vst [vmem:[#allocation24_spill] sm:$0xff] %v11925_v49  ;;  %v11966_v40 = vor.u32 %v8452_v50, %v7594_v54  ;;  %v11995_v54 = vpop.f32.mrf.mxu2 }
 0x1fe   :  { %v11932_v5 = vor.u32 %v8453_v56, %v7592_v30  ;;  %13274 = vst [vmem:[#allocation27_spill] sm:$0xff] %v11945_v24  ;;  %v7658_v32 = vld [vmem:[%s13157_s3 + $0x168] sm:$0xf0]  ;;  %v8466_v30 = vld [vmem:[%s13157_s3 + $0x154] sm:$0xf] }
 0x1ff   :  { %4002 = vmatpush.bf16.msrb.mxu1 %v7345_v26  ;;  %4030 = vmatpush.bf16.msrb.mxu3 %v7349_v43  ;;  %v7666_v26 = vld [vmem:[%s13157_s3 + $0x178] sm:$0xf0]  ;;  %v11923_v43 = vpop.f32.mrf.mxu0  ;;  %13275 = vst [vmem:[#allocation28_spill] sm:$0xff] %v11966_v40  ;;  %v7576_v47 = vld [vmem:[%s13157_s3 + $0xc0] sm:$0xf] }
 0x200   :  { %13270 = vst [vmem:[#allocation23_spill] sm:$0xff] %v11923_v43  ;;  %v11930_v57 = vor.u32 %v8470_v13, %v7666_v26  ;;  %v8450_v26 = vld [vmem:[%s13157_s3 + $0xd4] sm:$0xf]  ;;  %v7650_v6 = vld [vmem:[%s13157_s3 + $0x158] sm:$0xf0] }
 0x201   :  { %3989 = vmatpush.bf16.msrb.mxu0 %v7057_v31  ;;  %4017 = vmatpush.bf16.msrb.mxu2 %v7061_v55  ;;  %v8468_v31 = vld [vmem:[%s13157_s3 + $0x164] sm:$0xf]  ;;  %v8451_v55 = vld [vmem:[%s13157_s3 + $0xd4] sm:$0xf0]  ;;  %v8449_v50 = vld [vmem:[%s13157_s3 + $0xc4] sm:$0xf0]  ;;  %v12010_v29 = vor.u32 %v8466_v30, %v7650_v6 }
 0x202   :  { %13273 = vst [vmem:[#allocation26_spill] sm:$0xff] %v11930_v57  ;;  %v11970_v13 = vor.u32 %v8468_v31, %v7658_v32  ;;  %v7640_v31 = vld [vmem:[%s13157_s3 + $0x140] sm:$0xf]  ;;  %v8465_v32 = vld [vmem:[%s13157_s3 + $0x144] sm:$0xf0]  ;;  %v12012_v43 = vor.u32 %v8449_v50, %v7576_v47 }
 0x203   :  { %4003 = vmatpush.bf16.msrb.mxu1 %v7313_v39  ;;  %4031 = vmatpush.bf16.msrb.mxu3 %v7317_v22  ;;  %v7584_v39 = vld [vmem:[%s13157_s3 + $0xd0] sm:$0xf]  ;;  %13277 = vst [vmem:[#allocation30_spill] sm:$0xff] %v11995_v54  ;;  %v8448_v54 = vld [vmem:[%s13157_s3 + $0xc4] sm:$0xf]  ;;  %v12024_v21 = vor.u32 %v8465_v32, %v7640_v31  ;;  %v13282_v32 = vmax.f32 %v10302_v28, %v11137_v4 }
 0x204   :  { %3990 = vmatmul.bf16.vlgmr.msrb.gmra.mxu0 %v8856_v8  ;;  %4018 = vmatmul.bf16.vlgmr.msrb.gmra.mxu2 %v8856_v8  ;;  %v7648_v22 = vld [vmem:[%s13157_s3 + $0x150] sm:$0xf]  ;;  %v11972_v8 = vor.u32 %v8451_v55, %v7584_v39  ;;  %v12003_v39 = vpop.f32.mrf.mxu3  ;;  %13280 = vst [vmem:[#allocation33_spill] sm:$0xff] %v12010_v29  ;;  %v7642_v30 = vld [vmem:[%s13157_s3 + $0x148] sm:$0xf0] }
 0x205   :  { %4320 = vmatpush.bf16.msra.mxu0 %v11895_v62  ;;  %4348 = vmatpush.bf16.msra.mxu2 %v11925_v49  ;;  %v11984_v56 = vor.u32 %v8467_v61, %v7648_v22  ;;  %13278 = vst [vmem:[#allocation31_spill] sm:$0xff] %v12003_v39  ;;  %v2997_v61 = vpop.f32.mrf.mxu1  ;;  %v7578_v39 = vld [vmem:[%s13157_s3 + $0xc8] sm:$0xf0]  ;;  %v7568_v6 = vld [vmem:[%s13157_s3 + $0xb0] sm:$0xf] }
 0x206   :  { %4004 = vmatmul.bf16.vlgmr.msrb.gmra.mxu1 %v8873_v15  ;;  %4032 = vmatmul.bf16.vlgmr.msrb.gmra.mxu3 %v8873_v15  ;;  %v7586_v15 = vld [vmem:[%s13157_s3 + $0xd8] sm:$0xf0]  ;;  %13281 = vst [vmem:[#allocation34_spill] sm:$0xff] %v12012_v43  ;;  %v8447_v47 = vld [vmem:[%s13157_s3 + $0xb4] sm:$0xf0] }
 0x207   :  { %4334 = vmatpush.bf16.msra.mxu1 %v11906_v19  ;;  %4362 = vmatpush.bf16.msra.mxu3 %v11930_v57  ;;  %13276 = vst [vmem:[#allocation29_spill] sm:$0xff] %v11984_v56  ;;  %v2983_v55 = vpop.f32.mrf.mxu0  ;;  %v12006_v22 = vor.u32 %v8450_v26, %v7586_v15  ;;  %v8464_v26 = vld [vmem:[%s13157_s3 + $0x144] sm:$0xf]  ;;  %v7632_v50 = vld [vmem:[%s13157_s3 + $0x130] sm:$0xf]  ;;  %v12053_v16 = vor.u32 %v8447_v47, %v7568_v6 }
 0x208   :  { %v2998_v15 = vadd.f32 %v2997_v61, %v2983_v55  ;;  %v8463_v31 = vld [vmem:[%s13157_s3 + $0x134] sm:$0xf0]  ;;  %v12047_v61 = vor.u32 %v8448_v54, %v7578_v39  ;;  %v12051_v17 = vor.u32 %v8464_v26, %v7642_v30  ;;  %v7570_v28 = vld [vmem:[%s13157_s3 + $0xb8] sm:$0xf0]  ;;  %v8462_v4 = vld [vmem:[%s13157_s3 + $0x134] sm:$0xf]  ;;  %v3011_v30 = vpop.f32.mrf.mxu2 }
 0x209   :  { %4321 = vmatpush.bf16.msra.mxu0 %v11932_v5  ;;  %4349 = vmatpush.bf16.msra.mxu2 %v11966_v40  ;;  %13279 = vst [vmem:[#allocation32_spill] sm:$0xff] %v12006_v22  ;;  %v12065_v54 = vor.u32 %v8463_v31, %v7632_v50  ;;  %v7634_v39 = vld [vmem:[%s13157_s3 + $0x138] sm:$0xf0]  ;;  %v7560_v26 = vld [vmem:[%s13157_s3 + $0xa0] sm:$0xf]  ;;  %v12083_v31 = vor.u32 %v8446_v36, %v7570_v28 }
 0x20a   :  { %v12044_v55 = vmax.f32 %v13282_v32, %v2998_v15  ;;  %13284 = vst [vmem:[#allocation36_spill] sm:$0xff] %v12047_v61  ;;  %v8445_v15 = vld [vmem:[%s13157_s3 + $0xa4] sm:$0xf0]  ;;  %v7624_v6 = vld [vmem:[%s13157_s3 + $0x120] sm:$0xf] }
 0x20b   :  { %4335 = vmatpush.bf16.msra.mxu1 %v11945_v24  ;;  %4363 = vmatpush.bf16.msra.mxu3 %v11970_v13  ;;  %13285 = vst [vmem:[#allocation37_spill] sm:$0xff] %v12051_v17  ;;  %v8461_v47 = vld [vmem:[%s13157_s3 + $0x124] sm:$0xf0]  ;;  %v12089_v23 = vor.u32 %v8445_v15, %v7560_v26  ;;  %v8444_v27 = vld [vmem:[%s13157_s3 + $0xa4] sm:$0xf]  ;;  %v13288_v15 = vmax.f32 %v10343_v59, %v11189_v3 }
 0x20c   :  { %13283 = vst [vmem:[#allocation35_spill] sm:$0xff] %v12044_v55  ;;  %v3025_v50 = vpop.f32.mrf.mxu3  ;;  %v12087_v55 = vor.u32 %v8462_v4, %v7634_v39  ;;  %v8460_v36 = vld [vmem:[%s13157_s3 + $0x124] sm:$0xf]  ;;  %v12101_v28 = vor.u32 %v8461_v47, %v7624_v6  ;;  %v7626_v4 = vld [vmem:[%s13157_s3 + $0x128] sm:$0xf0] }
 0x20d   :  { %4322 = vmatpush.bf16.msra.mxu0 %v11972_v8  ;;  %4350 = vmatpush.bf16.msra.mxu2 %v12006_v22  ;;  %13286 = vst [vmem:[#allocation38_spill] sm:$0xff] %v12083_v31  ;;  %v3026_v32 = vadd.f32 %v3025_v50, %v3011_v30  ;;  %v7552_v39 = vld [vmem:[%s13157_s3 + $0x90] sm:$0xf]  ;;  %v8443_v26 = vld [vmem:[%s13157_s3 + $0x94] sm:$0xf0]  ;;  %v12124_v50 = vor.u32 %v8444_v27, %v7562_v11 }
 0x20e   :  { %13287 = vst [vmem:[#allocation39_spill] sm:$0xff] %v12087_v55  ;;  %v7616_v6 = vld [vmem:[%s13157_s3 + $0x110] sm:$0xf]  ;;  %v8459_v47 = vld [vmem:[%s13157_s3 + $0x114] sm:$0xf0]  ;;  %v12131_v59 = vor.u32 %v8460_v36, %v7626_v4  ;;  %v12133_v3 = vor.u32 %v8443_v26, %v7552_v39 }
 0x20f   :  { %4336 = vmatpush.bf16.msra.mxu1 %v11984_v56  ;;  %4364 = vmatpush.bf16.msra.mxu3 %v12010_v29  ;;  %v12115_v30 = vmax.f32 %v13288_v15, %v3026_v32  ;;  %13290 = vst [vmem:[#allocation41_spill] sm:$0xff] %v12124_v50  ;;  %v7554_v32 = vld [vmem:[%s13157_s3 + $0x98] sm:$0xf0]  ;;  %v8458_v11 = vld [vmem:[%s13157_s3 + $0x114] sm:$0xf]  ;;  %v12145_v15 = vor.u32 %v8459_v47, %v7616_v6 }
 0x210   :  { %13291 = vst [vmem:[#allocation42_spill] sm:$0xff] %v12131_v59  ;;  %v7618_v27 = vld [vmem:[%s13157_s3 + $0x118] sm:$0xf0]  ;;  %v7544_v36 = vld [vmem:[%s13157_s3 + $0x80] sm:$0xf] }
 0x211   :  { %4323 = vmatpush.bf16.msra.mxu0 %v12012_v43  ;;  %4351 = vmatpush.bf16.msra.mxu2 %v12047_v61  ;;  %13289 = vst [vmem:[#allocation40_spill] sm:$0xff] %v12115_v30  ;;  %v8441_v4 = vld [vmem:[%s13157_s3 + $0x84] sm:$0xf0]  ;;  %v7608_v39 = vld [vmem:[%s13157_s3 + $0x100] sm:$0xf] }
 0x212   :  { %v8457_v26 = vld [vmem:[%s13157_s3 + $0x104] sm:$0xf0]  ;;  %v7728_v6 = vld [vmem:[%s13157_s3 + $0x70] sm:$0xf]  ;;  %v8487_v47 = vld [vmem:[%s13157_s3 + $0x74] sm:$0xf0] }
 0x213   :  { %4337 = vmatpush.bf16.msra.mxu1 %v12024_v21  ;;  %4365 = vmatpush.bf16.msra.mxu3 %v12051_v17  ;;  %v8442_v17 = vld [vmem:[%s13157_s3 + $0x94] sm:$0xf]  ;;  %v8440_v61 = vld [vmem:[%s13157_s3 + $0x84] sm:$0xf] }
 0x214   :  { %v12166_v30 = vor.u32 %v8442_v17, %v7554_v32  ;;  %v12181_v17 = vor.u32 %v8457_v26, %v7608_v39  ;;  %v8456_v32 = vld [vmem:[%s13157_s3 + $0x104] sm:$0xf]  ;;  %v7720_v39 = vld [vmem:[%s13157_s3 + $0x60] sm:$0xf]  ;;  %v8485_v26 = vld [vmem:[%s13157_s3 + $0x64] sm:$0xf0] }
 0x215   :  { %4324 = vmatpush.bf16.msra.mxu0 %v12053_v16  ;;  %4352 = vmatpush.bf16.msra.mxu2 %v12083_v31  ;;  %v12172_v31 = vor.u32 %v8441_v4, %v7544_v36  ;;  %v8486_v36 = vld [vmem:[%s13157_s3 + $0x74] sm:$0xf]  ;;  %v7730_v4 = vld [vmem:[%s13157_s3 + $0x78] sm:$0xf0]  ;;  %v12216_v33 = vor.u32 %v8485_v26, %v7720_v39 }
 0x216   :  { %13292 = vst [vmem:[#allocation43_spill] sm:$0xff] %v12166_v30  ;;  %v8482_v26 = vld [vmem:[%s13157_s3 + $0x54] sm:$0xf] }
 0x217   :  { %4338 = vmatpush.bf16.msra.mxu1 %v12065_v54  ;;  %4366 = vmatpush.bf16.msra.mxu3 %v12087_v55  ;;  %v12170_v55 = vor.u32 %v8458_v11, %v7618_v27  ;;  %13294 = vst [vmem:[#allocation45_spill] sm:$0xff] %v12172_v31  ;;  %v7610_v11 = vld [vmem:[%s13157_s3 + $0x108] sm:$0xf0]  ;;  %v12189_v27 = vor.u32 %v8487_v47, %v7728_v6 }
 0x218   :  { %v12204_v6 = vor.u32 %v8440_v61, %v7546_v46  ;;  %v12208_v47 = vor.u32 %v8456_v32, %v7610_v11  ;;  %v8484_v46 = vld [vmem:[%s13157_s3 + $0x64] sm:$0xf]  ;;  %v12221_v61 = vpop.f32.mrf.mxu1  ;;  %v7722_v32 = vld [vmem:[%s13157_s3 + $0x68] sm:$0xf0]  ;;  %v7712_v11 = vld [vmem:[%s13157_s3 + $0x50] sm:$0xf] }
 0x219   :  { %4325 = vmatpush.bf16.msra.mxu0 %v12089_v23  ;;  %4353 = vmatpush.bf16.msra.mxu2 %v12124_v50  ;;  %13293 = vst [vmem:[#allocation44_spill] sm:$0xff] %v12170_v55  ;;  %v12214_v50 = vor.u32 %v8486_v36, %v7730_v4  ;;  %v8483_v36 = vld [vmem:[%s13157_s3 + $0x54] sm:$0xf0]  ;;  %v12238_v4 = vor.u32 %v8484_v46, %v7722_v32  ;;  %v8481_v46 = vld [vmem:[%s13157_s3 + $0x44] sm:$0xf0]  ;;  %v12255_v32 = vpop.f32.mrf.mxu2 }
 0x21a   :  { %13295 = vst [vmem:[#allocation46_spill] sm:$0xff] %v12204_v6  ;;  %v12240_v39 = vor.u32 %v8483_v36, %v7712_v11  ;;  %v12258_v11 = vpop.f32.mrf.mxu3 }
 0x21b   :  { %4339 = vmatpush.bf16.msra.mxu1 %v12101_v28  ;;  %4367 = vmatpush.bf16.msra.mxu3 %v12131_v59  ;;  %13296 = vst [vmem:[#allocation47_spill] sm:$0xff] %v12208_v47  ;;  %v12210_v59 = vpop.f32.mrf.mxu0 }
 0x21c   :  { %13297 = vst [vmem:[#allocation48_spill] sm:$0xff] %v12210_v59  ;;  %v7704_v59 = vld [vmem:[%s13157_s3 + $0x40] sm:$0xf] }
 0x21d   :  { %4326 = vmatpush.bf16.msra.mxu0 %v12133_v3  ;;  %4354 = vmatpush.bf16.msra.mxu2 %v12166_v30  ;;  %13298 = vst [vmem:[#allocation49_spill] sm:$0xff] %v12214_v50 }
 0x21e   :  { %13299 = vst [vmem:[#allocation50_spill] sm:$0xff] %v12221_v61  ;;  %v7714_v61 = vld [vmem:[%s13157_s3 + $0x58] sm:$0xf0] }
 0x21f   :  { %4340 = vmatpush.bf16.msra.mxu1 %v12145_v15  ;;  %4368 = vmatpush.bf16.msra.mxu3 %v12170_v55  ;;  %13300 = vst [vmem:[#allocation51_spill] sm:$0xff] %v12238_v4 }
 0x220   :  { %13301 = vst [vmem:[#allocation52_spill] sm:$0xff] %v12255_v32  ;;  %v7696_v32 = vld [vmem:[%s13157_s3 + $0x30] sm:$0xf] }
 0x221   :  { %4327 = vmatpush.bf16.msra.mxu0 %v12172_v31  ;;  %4355 = vmatpush.bf16.msra.mxu2 %v12204_v6  ;;  %13302 = vst [vmem:[#allocation53_spill] sm:$0xff] %v12258_v11  ;;  %v7706_v11 = vld [vmem:[%s13157_s3 + $0x48] sm:$0xf0] }
 0x223   :  { %4341 = vmatpush.bf16.msra.mxu1 %v12181_v17  ;;  %4369 = vmatpush.bf16.msra.mxu3 %v12208_v47  ;;  %v3823_v36 = vpop.f32.mrf.mxu0  ;;  %v8480_v47 = vld [vmem:[%s13157_s3 + $0x44] sm:$0xf]  ;;  %v3837_v6 = vpop.f32.mrf.mxu1 }
 0x225   :  { %4486 = vmatpush.bf16.msrb.mxu0 %v12189_v27  ;;  %4514 = vmatpush.bf16.msrb.mxu2 %v11906_v19  ;;  %v12264_v19 = vor.u32 %v8481_v46, %v7704_v59  ;;  %v8479_v59 = vld [vmem:[%s13157_s3 + $0x34] sm:$0xf0]  ;;  %v12287_v46 = vor.u32 %v8480_v47, %v7706_v11  ;;  %v8477_v47 = vld [vmem:[%s13157_s3 + $0x24] sm:$0xf0] }
 0x227   :  { %4500 = vmatpush.bf16.msrb.mxu1 %v11895_v62  ;;  %4528 = vmatpush.bf16.msrb.mxu3 %v12214_v50  ;;  %v12262_v50 = vor.u32 %v8482_v26, %v7714_v61  ;;  %13304 = vst [vmem:[#allocation55_spill] sm:$0xff] %v12264_v19  ;;  %v3838_v61 = vadd.f32 %v3837_v6, %v3823_v36  ;;  %v12283_v26 = vld [vmem:[%s13158_s2] sm:$0xff]  ;;  %v7698_v6 = vld [vmem:[%s13157_s3 + $0x38] sm:$0xf0] }
 0x228   :  { %13305 = vst [vmem:[#allocation56_spill] sm:$0xff] %v12287_v46  ;;  %v7688_v36 = vld [vmem:[%s13157_s3 + $0x20] sm:$0xf]  ;;  %v4057_v30 = vperm.slane %v12283_v26, 1 }
 0x229   :  { %4487 = vmatpush.bf16.msrb.mxu0 %v12216_v33  ;;  %4515 = vmatpush.bf16.msrb.mxu2 %v11945_v24  ;;  %13303 = vst [vmem:[#allocation54_spill] sm:$0xff] %v12262_v50  ;;  %v8478_v24 = vld [vmem:[%s13157_s3 + $0x34] sm:$0xf]  ;;  %v4038_v11 = vmax.f32 %v11370_v10, %v3838_v61  ;;  %v3865_v55 = vpop.f32.mrf.mxu3  ;;  %v2832_v10 = vadd.f32 %v11505_v0, %v11497_v51  ;;  %v7690_v61 = vld [vmem:[%s13157_s3 + $0x28] sm:$0xf0] }
 0x22a   :  { %v1852_v51 = vadd.f32 %v10705_v42, %v10694_v34  ;;  %v860_v34 = vadd.f32 %v9869_v9, %v9867_v7 }
 0x22b   :  { %4501 = vmatpush.bf16.msrb.mxu1 %v11932_v5  ;;  %4529 = vmatpush.bf16.msrb.mxu3 %v12238_v4  ;;  %v12289_v4 = vor.u32 %v8479_v59, %v7696_v32  ;;  %v1824_v32 = vadd.f32 %v10655_v63, %v10647_v58  ;;  %v4056_v59 = vperm.slane %v12283_v26, 0  ;;  %v12316_v58 = vor.u32 %v8477_v47, %v7688_v36  ;;  %v8476_v63 = vld [vmem:[%s13157_s3 + $0x24] sm:$0xf] }
 0x22c   :  { %v12339_v47 = vor.u32 %v8476_v63, %v7690_v61  ;;  %v8473_v63 = vld [vmem:[%s13157_s3 + $0x4] sm:$0xf0]  ;;  %v2031_v7 = vmax.f32 %v860_v34, %v1852_v51  ;;  %v8472_v51 = vld [vmem:[%s13157_s3 + $0x4] sm:$0xf] }
 0x22d   :  { %4488 = vmatpush.bf16.msrb.mxu0 %v12240_v39  ;;  %4516 = vmatpush.bf16.msrb.mxu2 %v11984_v56  ;;  %v832_v56 = vadd.f32 %v9828_v53, %v9826_v52  ;;  %v3839_v53 = vpop.f32.mrf.mxu1  ;;  %v4072_v0 = vadd.f32 %v4056_v59, %v4038_v11  ;;  %v7672_v11 = vld [vmem:[%s13157_s3] sm:$0xf] }
 0x22e   :  { %v12365_v61 = vor.u32 %v8473_v63, %v7672_v11 }
 0x22f   :  { %4502 = vmatpush.bf16.msrb.mxu1 %v11972_v8  ;;  %4530 = vmatpush.bf16.msrb.mxu3 %v12262_v50  ;;  %v3851_v50 = vpop.f32.mrf.mxu2  ;;  %v2030_v36 = vmax.f32 %v832_v56, %v1824_v32  ;;  %v8474_v56 = vld [vmem:[%s13157_s3 + $0x14] sm:$0xf]  ;;  %v7682_v32 = vld [vmem:[%s13157_s3 + $0x18] sm:$0xf0]  ;;  %v4088_v9 = vmax.f32 %v4072_v0, 0.0 }
 0x230   :  { %v3866_v52 = vadd.f32 %v3865_v55, %v3851_v50  ;;  %v7674_v0 = vld [vmem:[%s13157_s3 + $0x8] sm:$0xf0] }
 0x231   :  { %4489 = vmatpush.bf16.msrb.mxu0 %v12264_v19  ;;  %4517 = vmatpush.bf16.msrb.mxu2 %v12024_v21  ;;  %v12314_v19 = vor.u32 %v8478_v24, %v7698_v6  ;;  %v7680_v24 = vld [vmem:[%s13157_s3 + $0x10] sm:$0xf]  ;;  %v8475_v6 = vld [vmem:[%s13157_s3 + $0x14] sm:$0xf0]  ;;  %v3038_v42 = vmax.f32 %v2030_v36, %v2832_v10 }
 0x232   :  { %v4039_v55 = vmax.f32 %v11414_v20, %v3866_v52  ;;  %v2860_v20 = vadd.f32 %v11555_v12, %v11544_v14  ;;  %v3867_v12 = vpop.f32.mrf.mxu3 }
 0x233   :  { %4503 = vmatpush.bf16.msrb.mxu1 %v12012_v43  ;;  %v3825_v43 = vpop.f32.mrf.mxu0  ;;  %4531 = vmatpush.bf16.msrb.mxu3 %v12287_v46  ;;  %v12341_v46 = vor.u32 %v8475_v6, %v7680_v24 }
 0x234   :  { %v3840_v50 = vadd.f32 %v3839_v53, %v3825_v43  ;;  %v4073_v43 = vadd.f32 %v4057_v30, %v4039_v55  ;;  %v12363_v53 = vor.u32 %v8474_v56, %v7682_v32  ;;  %v3039_v24 = vmax.f32 %v2031_v7, %v2860_v20 }
 0x235   :  { %4490 = vmatpush.bf16.msrb.mxu0 %v12289_v4  ;;  %4518 = vmatpush.bf16.msrb.mxu2 %v12065_v54  ;;  %v12377_v56 = vor.u32 %v8472_v51, %v7674_v0 }
 0x236   :  { %v4089_v10 = vmax.f32 %v4073_v43, 0.0  ;;  %v4046_v52 = vmax.f32 %v3038_v42, %v3840_v50 }
 0x237   :  { %4504 = vmatpush.bf16.msrb.mxu1 %v12053_v16  ;;  %4532 = vmatpush.bf16.msrb.mxu3 %v12314_v19  ;;  %v3853_v14 = vpop.f32.mrf.mxu2 }
 0x238   :  { %v4104_v6 = vpack.c.bf16 %v4089_v10, %v4088_v9  ;;  %v3868_v36 = vadd.f32 %v3867_v12, %v3853_v14  ;;  %v4080_v55 = vadd.f32 %v4056_v59, %v4046_v52  ;;  %v1880_v14 = vadd.f32 %v10867_v41, %v10859_v35 }
 0x239   :  { %4491 = vmatpush.bf16.msrb.mxu0 %v12316_v58  ;;  %4519 = vmatpush.bf16.msrb.mxu2 %v12101_v28  ;;  %v2888_v35 = vadd.f32 %v11719_v38, %v11711_v18  ;;  %v916_v18 = vadd.f32 %v10077_v2, %v10075_v1 }
 0x23a   :  { %v4047_v50 = vmax.f32 %v3039_v24, %v3868_v36  ;;  %v4096_v42 = vmax.f32 %v4080_v55, 0.0  ;;  %v4152_v59 = vunpack.c.l.b16 %v4104_v6  ;;  %v4153_v32 = vunpack.c.h.b16 %v4104_v6 }
 0x23b   :  { %4505 = vmatpush.bf16.msrb.mxu1 %v12089_v23  ;;  %4533 = vmatpush.bf16.msrb.mxu3 %v12339_v47  ;;  %v4058_v24 = vperm.slane %v12283_v26, 2  ;;  %v888_v36 = vadd.f32 %v10036_v45, %v10034_v44 }
 0x23c   :  { %v4081_v34 = vadd.f32 %v4057_v30, %v4047_v50 }
 0x23d   :  { %4492 = vmatpush.bf16.msrb.mxu0 %v12341_v46  ;;  %4520 = vmatpush.bf16.msrb.mxu2 %v12145_v15  ;;  %v2032_v50 = vmax.f32 %v888_v36, %v1880_v14  ;;  %v13311_v14 = vld [vmem:[#allocation34_spill] sm:$0xff] }
 0x23e   :  { %v4097_v20 = vmax.f32 %v4081_v34, 0.0  ;;  %v1908_v34 = vadd.f32 %v10917_v37, %v10906_v25 }
 0x23f   :  { %4506 = vmatpush.bf16.msrb.mxu1 %v12133_v3  ;;  %4534 = vmatpush.bf16.msrb.mxu3 %v12363_v53  ;;  %v3040_v38 = vmax.f32 %v2032_v50, %v2888_v35  ;;  %v13313_v35 = vld [vmem:[#allocation39_spill] sm:$0xff] }
 0x240   :  { %v4108_v43 = vpack.c.bf16 %v4097_v20, %v4096_v42  ;;  %v13306_v20 = vld [vmem:[#allocation18_spill] sm:$0xff]  ;;  %v2033_v37 = vmax.f32 %v916_v18, %v1908_v34  ;;  %v13314_v34 = vld [vmem:[#allocation41_spill] sm:$0xff]  ;;  %v13317_v18 = vld [vmem:[#allocation44_spill] sm:$0xff] }
 0x241   :  { %4493 = vmatpush.bf16.msrb.mxu0 %v12365_v61  ;;  %4521 = vmatpush.bf16.msrb.mxu2 %v12181_v17  ;;  %v3879_v10 = vpop.f32.mrf.mxu0 }
 0x242   :  { %v4154_v11 = vunpack.c.l.b16 %v4108_v43  ;;  %v4155_v63 = vunpack.c.h.b16 %v4108_v43  ;;  %v13307_v43 = vld [vmem:[#allocation19_spill] sm:$0xff] }
 0x243   :  { %4507 = vmatpush.bf16.msrb.mxu1 %v12172_v31  ;;  %4535 = vmatpush.bf16.msrb.mxu3 %v12377_v56  ;;  %v3893_v52 = vpop.f32.mrf.mxu1 }
 0x244   :  { %v12382_v7 = vpack.c.b16 %v4155_v63, %v4153_v32  ;;  %v4156_v9 = vpack.c.b16 %v4154_v11, %v4152_v59  ;;  %v3894_v30 = vadd.f32 %v3893_v52, %v3879_v10  ;;  %v2916_v59 = vadd.f32 %v13307_v43, %v13306_v20  ;;  %v13308_v63 = vld [vmem:[#allocation36_spill] sm:$0xff]  ;;  %v13309_v10 = vld [vmem:[#allocation37_spill] sm:$0xff]  ;;  %v13318_v20 = vld [vmem:[#allocation46_spill] sm:$0xff] }
 0x245   :  { %v13319_v43 = vld [vmem:[#allocation47_spill] sm:$0xff] }
 0x246   :  { %4328 = vmatmul.bf16.vlgmr.msra.gmra.mxu0 %v4156_v9  ;;  %4342 = vmatmul.bf16.vlgmr.msra.gmra.mxu1 %v12382_v7  ;;  %v4040_v12 = vmax.f32 %v11584_v48, %v3894_v30  ;;  %v4059_v48 = vperm.slane %v12283_v26, 3  ;;  %v13310_v30 = vld [vmem:[#allocation55_spill] sm:$0xff]  ;;  %v3041_v1 = vmax.f32 %v2033_v37, %v2916_v59  ;;  %v13320_v37 = vld [vmem:[#allocation22_spill] sm:$0xff] }
 0x247   :  { %4356 = vmatmul.bf16.vlgmr.msra.gmra.mxu2 %v4156_v9  ;;  %4370 = vmatmul.bf16.vlgmr.msra.gmra.mxu3 %v12382_v7  ;;  %v3907_v6 = vpop.f32.mrf.mxu2 }
 0x248   :  { %4542 = vmatpush.bf16.msra.mxu0 %v11925_v49  ;;  %4556 = vmatpush.bf16.msra.mxu1 %v11930_v57  ;;  %v4074_v42 = vadd.f32 %v4058_v24, %v4040_v12 }
 0x249   :  { %4582 = vmatpush.bf16.msra.mxu2 %v12189_v27  ;;  %4596 = vmatpush.bf16.msra.mxu3 %v11895_v62  ;;  %v3921_v51 = vpop.f32.mrf.mxu3  ;;  %v3881_v0 = vpop.f32.mrf.mxu0 }
 0x24a   :  { %v3922_v41 = vadd.f32 %v3921_v51, %v3907_v6  ;;  %v4090_v32 = vmax.f32 %v4074_v42, 0.0  ;;  %v13315_v42 = vld [vmem:[#allocation42_spill] sm:$0xff] }
 0x24b   :  { %v3895_v55 = vpop.f32.mrf.mxu1 }
 0x24c   :  { %4543 = vmatpush.bf16.msra.mxu0 %v11966_v40  ;;  %4557 = vmatpush.bf16.msra.mxu1 %v11970_v13  ;;  %v4041_v44 = vmax.f32 %v11628_v60, %v3922_v41  ;;  %v3896_v45 = vadd.f32 %v3895_v55, %v3881_v0  ;;  %v13312_v0 = vld [vmem:[#allocation38_spill] sm:$0xff] }
 0x24d   :  { %4583 = vmatpush.bf16.msra.mxu2 %v12216_v33  ;;  %4597 = vmatpush.bf16.msra.mxu3 %v11932_v5 }
 0x24e   :  { %v4075_v25 = vadd.f32 %v4059_v48, %v4041_v44  ;;  %v4048_v11 = vmax.f32 %v3040_v38, %v3896_v45  ;;  %v13316_v45 = vld [vmem:[#allocation43_spill] sm:$0xff] }
 0x24f   :  { %v3909_v52 = vpop.f32.mrf.mxu2 }
 0x250   :  { %4544 = vmatpush.bf16.msra.mxu0 %v12006_v22  ;;  %4558 = vmatpush.bf16.msra.mxu1 %v12010_v29  ;;  %v4091_v60 = vmax.f32 %v4075_v25, 0.0  ;;  %v4082_v36 = vadd.f32 %v4058_v24, %v4048_v11 }
 0x251   :  { %4584 = vmatpush.bf16.msra.mxu2 %v12240_v39  ;;  %4598 = vmatpush.bf16.msra.mxu3 %v11972_v8  ;;  %v3923_v12 = vpop.f32.mrf.mxu3 }
 0x252   :  { %v12418_v2 = vpack.c.bf16 %v4091_v60, %v4090_v32  ;;  %v3924_v6 = vadd.f32 %v3923_v12, %v3909_v52  ;;  %v4098_v55 = vmax.f32 %v4082_v36, 0.0  ;;  %v13321_v32 = vld [vmem:[#allocation49_spill] sm:$0xff]  ;;  %v13322_v60 = vld [vmem:[#allocation20_spill] sm:$0xff]  ;;  %v13201_v52 = vperm.slane %v12283_v26, 4  ;;  %v13323_v12 = vld [vmem:[#allocation27_spill] sm:$0xff] }
 0x254   :  { %4545 = vmatpush.bf16.msra.mxu0 %v13308_v63  ;;  %4559 = vmatpush.bf16.msra.mxu1 %v13309_v10  ;;  %v4049_v51 = vmax.f32 %v3041_v1, %v3924_v6  ;;  %v4402_v24 = vunpack.c.l.b16 %v12418_v2  ;;  %v13324_v6 = vld [vmem:[#allocation51_spill] sm:$0xff] }
 0x255   :  { %4585 = vmatpush.bf16.msra.mxu2 %v13310_v30  ;;  %4599 = vmatpush.bf16.msra.mxu3 %v13311_v14 }
 0x256   :  { %4494 = vmatmul.bf16.vlgmr.msrb.gmra.mxu0 %v4156_v9  ;;  %4508 = vmatmul.bf16.vlgmr.msrb.gmra.mxu1 %v12382_v7  ;;  %v4083_v41 = vadd.f32 %v4059_v48, %v4049_v51 }
 0x257   :  { %4536 = vmatmul.bf16.vlgmr.msrb.gmra.mxu3 %v4156_v9 }
 0x258   :  { %4546 = vmatpush.bf16.msra.mxu0 %v13312_v0  ;;  %4560 = vmatpush.bf16.msra.mxu1 %v13313_v35  ;;  %v4099_v50 = vmax.f32 %v4083_v41, 0.0  ;;  %v13202_v41 = vperm.slane %v12283_v26, 5 }
 0x259   :  { %4586 = vmatpush.bf16.msra.mxu2 %v12289_v4  ;;  %4600 = vmatpush.bf16.msra.mxu3 %v12053_v16 }
 0x25a   :  { %v12429_v9 = vpack.c.bf16 %v4099_v50, %v4098_v55  ;;  %v13325_v50 = vld [vmem:[#allocation21_spill] sm:$0xff] }
 0x25c   :  { %4547 = vmatpush.bf16.msra.mxu0 %v13314_v34  ;;  %4561 = vmatpush.bf16.msra.mxu1 %v13315_v42  ;;  %v4403_v44 = vunpack.c.l.b16 %v12429_v9 }
 0x25d   :  { %4587 = vmatpush.bf16.msra.mxu2 %v12316_v58  ;;  %4601 = vmatpush.bf16.msra.mxu3 %v12089_v23 }
 0x25e   :  { %v12437_v48 = vpack.c.b16 %v4403_v44, %v4402_v24  ;;  %v13326_v44 = vld [vmem:[#allocation29_spill] sm:$0xff] }
 0x260   :  { %4548 = vmatpush.bf16.msra.mxu0 %v13316_v45  ;;  %4562 = vmatpush.bf16.msra.mxu1 %v13317_v18 }
 0x261   :  { %4588 = vmatpush.bf16.msra.mxu2 %v12341_v46  ;;  %4602 = vmatpush.bf16.msra.mxu3 %v12133_v3  ;;  %v3935_v38 = vpop.f32.mrf.mxu0 }
 0x262   :  { %4522 = vmatmul.bf16.vlgmr.msrb.gmra.mxu2 %v12437_v48 }
 0x263   :  { %v3949_v59 = vpop.f32.mrf.mxu1 }
 0x264   :  { %4549 = vmatpush.bf16.msra.mxu0 %v13318_v20  ;;  %4563 = vmatpush.bf16.msra.mxu1 %v13319_v43  ;;  %v3950_v25 = vadd.f32 %v3949_v59, %v3935_v38  ;;  %v13327_v38 = vld [vmem:[#allocation54_spill] sm:$0xff] }
 0x265   :  { %4589 = vmatpush.bf16.msra.mxu2 %v12365_v61  ;;  %4603 = vmatpush.bf16.msra.mxu3 %v12172_v31 }
 0x266   :  { %v4042_v11 = vmax.f32 %v13322_v60, %v3950_v25 }
 0x267   :  { %4550 = vmatmul.bf16.vlgmr.msra.gmra.mxu0 %v12382_v7  ;;  %4564 = vmatmul.bf16.vlgmr.msra.gmra.mxu1 %v12437_v48  ;;  %v3963_v1 = vpop.f32.mrf.mxu2 }
 0x268   :  { %4610 = vmatpush.bf16.msrb.mxu0 %v13320_v37  ;;  %4624 = vmatpush.bf16.msrb.mxu1 %v13321_v32  ;;  %v4076_v55 = vadd.f32 %v13201_v52, %v4042_v11 }
 0x269   :  { %4638 = vmatpush.bf16.msrb.mxu2 %v11925_v49  ;;  %4652 = vmatpush.bf16.msrb.mxu3 %v11930_v57  ;;  %v3977_v36 = vpop.f32.mrf.mxu3 }
 0x26a   :  { %4604 = vmatmul.bf16.vlgmr.msra.gmra.mxu3 %v12437_v48  ;;  %v3978_v51 = vadd.f32 %v3977_v36, %v3963_v1  ;;  %v4092_v25 = vmax.f32 %v4076_v55, 0.0  ;;  %v13328_v1 = vld [vmem:[#allocation56_spill] sm:$0xff]  ;;  %v3937_v36 = vpop.f32.mrf.mxu0 }
 0x26c   :  { %4611 = vmatpush.bf16.msrb.mxu0 %v13323_v12  ;;  %4625 = vmatpush.bf16.msrb.mxu1 %v13324_v6  ;;  %v4043_v24 = vmax.f32 %v13325_v50, %v3978_v51  ;;  %v3951_v51 = vpop.f32.mrf.mxu1  ;;  %v4579_v50 = vunpack.c.h.b16 %v12429_v9  ;;  %v13329_v9 = vld [vmem:[#allocation12_spill] sm:$0xff] }
 0x26d   :  { %4639 = vmatpush.bf16.msrb.mxu2 %v11966_v40  ;;  %4653 = vmatpush.bf16.msrb.mxu3 %v11970_v13 }
 0x26e   :  { %v4077_v59 = vadd.f32 %v13202_v41, %v4043_v24 }
 0x26f   :  { %v3965_v55 = vpop.f32.mrf.mxu2 }
 0x270   :  { %4612 = vmatpush.bf16.msrb.mxu0 %v13326_v44  ;;  %4626 = vmatpush.bf16.msrb.mxu1 %v13327_v38  ;;  %v4093_v60 = vmax.f32 %v4077_v59, 0.0 }
 0x271   :  { %4640 = vmatpush.bf16.msrb.mxu2 %v12006_v22  ;;  %4654 = vmatpush.bf16.msrb.mxu3 %v12010_v29  ;;  %v3979_v24 = vpop.f32.mrf.mxu3 }
 0x272   :  { %v12470_v11 = vpack.c.bf16 %v4093_v60, %v4092_v25  ;;  %4590 = vmatmul.bf16.vlgmr.msra.gmra.mxu2 %v12382_v7  ;;  %v4578_v60 = vunpack.c.h.b16 %v12418_v2 }
 0x274   :  { %4613 = vmatpush.bf16.msrb.mxu0 %v12024_v21  ;;  %4627 = vmatpush.bf16.msrb.mxu1 %v13328_v1  ;;  %v12491_v41 = vpack.c.b16 %v4579_v50, %v4578_v60  ;;  %v13333_v60 = vld [vmem:[#allocation5_spill] sm:$0xff]  ;;  %v13219_v50 = vperm.slane %v12283_v26, 7 }
 0x275   :  { %4641 = vmatpush.bf16.msrb.mxu2 %v13308_v63  ;;  %4655 = vmatpush.bf16.msrb.mxu3 %v13309_v10  ;;  %v3980_v10 = vadd.f32 %v3979_v24, %v3965_v55  ;;  %v13342_v63 = vperm.slane %v12283_v26, 6 }
 0x278   :  { %4614 = vmatpush.bf16.msrb.mxu0 %v12065_v54  ;;  %4628 = vmatpush.bf16.msrb.mxu1 %v12314_v19 }
 0x279   :  { %4642 = vmatpush.bf16.msrb.mxu2 %v13312_v0  ;;  %4656 = vmatpush.bf16.msrb.mxu3 %v13313_v35 }
 0x27c   :  { %4615 = vmatpush.bf16.msrb.mxu0 %v12101_v28  ;;  %4629 = vmatpush.bf16.msrb.mxu1 %v12339_v47 }
 0x27d   :  { %4643 = vmatpush.bf16.msrb.mxu2 %v13314_v34  ;;  %4657 = vmatpush.bf16.msrb.mxu3 %v13315_v42  ;;  %v13335_v42 = vld [vmem:[#allocation11_spill] sm:$0xff] }
 0x280   :  { %4616 = vmatpush.bf16.msrb.mxu0 %v12145_v15  ;;  %4630 = vmatpush.bf16.msrb.mxu1 %v12363_v53 }
 0x281   :  { %4644 = vmatpush.bf16.msrb.mxu2 %v13316_v45  ;;  %4658 = vmatpush.bf16.msrb.mxu3 %v13317_v18  ;;  %v3991_v59 = vpop.f32.mrf.mxu0  ;;  %v13330_v18 = vld [vmem:[#allocation13_spill] sm:$0xff]  ;;  %v13331_v45 = vld [vmem:[#allocation35_spill] sm:$0xff] }
 0x282   :  { %v1964_v2 = vadd.f32 %v13330_v18, %v13329_v9  ;;  %v13336_v9 = vld [vmem:[#allocation30_spill] sm:$0xff] }
 0x283   :  { %v4005_v25 = vpop.f32.mrf.mxu1 }
 0x284   :  { %4617 = vmatpush.bf16.msrb.mxu0 %v12181_v17  ;;  %4631 = vmatpush.bf16.msrb.mxu1 %v12377_v56  ;;  %v4006_v52 = vadd.f32 %v4005_v25, %v3991_v59  ;;  %v13332_v25 = vld [vmem:[#allocation4_spill] sm:$0xff] }
 0x285   :  { %4645 = vmatpush.bf16.msrb.mxu2 %v13318_v20  ;;  %4659 = vmatpush.bf16.msrb.mxu3 %v13319_v43  ;;  %v972_v43 = vadd.f32 %v13333_v60, %v13332_v25  ;;  %v13339_v25 = vld [vmem:[#allocation3_spill] sm:$0xff] }
 0x286   :  { %v4044_v20 = vmax.f32 %v13331_v45, %v4006_v52  ;;  %v13337_v45 = vld [vmem:[#allocation31_spill] sm:$0xff] }
 0x287   :  { %4618 = vmatmul.bf16.vlgmr.msrb.gmra.mxu0 %v12491_v41  ;;  %4632 = vmatmul.bf16.vlgmr.msrb.gmra.mxu1 %v12382_v7  ;;  %v4019_v59 = vpop.f32.mrf.mxu2  ;;  %v2972_v52 = vadd.f32 %v13337_v45, %v13336_v9  ;;  %v2035_v35 = vmax.f32 %v972_v43, %v1964_v2  ;;  %v13343_v45 = vld [vmem:[#allocation40_spill] sm:$0xff] }
 0x288   :  { %4680 = vmatpush.bf16.msra.mxu0 %v12189_v27  ;;  %4694 = vmatpush.bf16.msra.mxu1 %v11895_v62  ;;  %v4078_v9 = vadd.f32 %v13342_v63, %v4044_v20 }
 0x289   :  { %4708 = vmatpush.bf16.msra.mxu2 %v13320_v37  ;;  %4722 = vmatpush.bf16.msra.mxu3 %v13321_v32  ;;  %v13334_v37 = vld [vmem:[#allocation10_spill] sm:$0xff]  ;;  %v4033_v18 = vpop.f32.mrf.mxu3 }
 0x28a   :  { %4660 = vmatmul.bf16.vlgmr.msrb.gmra.mxu3 %v12491_v41  ;;  %v1936_v34 = vadd.f32 %v13335_v42, %v13334_v37  ;;  %4646 = vmatmul.bf16.vlgmr.msrb.gmra.mxu2 %v12437_v48  ;;  %v4034_v7 = vadd.f32 %v4033_v18, %v4019_v59  ;;  %v13338_v32 = vld [vmem:[#allocation2_spill] sm:$0xff]  ;;  %v13340_v42 = vld [vmem:[#allocation23_spill] sm:$0xff]  ;;  %v13341_v37 = vld [vmem:[#allocation25_spill] sm:$0xff]  ;;  %v3043_v59 = vmax.f32 %v2035_v35, %v2972_v52  ;;  %v4094_v24 = vmax.f32 %v4078_v9, 0.0 }
 0x28b   :  { %v944_v60 = vadd.f32 %v13339_v25, %v13338_v32  ;;  %v2944_v0 = vadd.f32 %v13341_v37, %v13340_v42  ;;  %v3952_v18 = vadd.f32 %v3951_v51, %v3937_v36  ;;  %v4676_v52 = vunpack.c.l.b16 %v12470_v11  ;;  %v13347_v25 = vld [vmem:[#allocation32_spill] sm:$0xff]  ;;  %v13350_v37 = vld [vmem:[#allocation37_spill] sm:$0xff]  ;;  %v13352_v9 = vld [vmem:[#allocation39_spill] sm:$0xff] }
 0x28c   :  { %4681 = vmatpush.bf16.msra.mxu0 %v12216_v33  ;;  %4695 = vmatpush.bf16.msra.mxu1 %v11932_v5  ;;  %v4045_v29 = vmax.f32 %v13343_v45, %v4034_v7  ;;  %v4051_v55 = vmax.f32 %v3043_v59, %v3980_v10  ;;  %v13349_v42 = vld [vmem:[#allocation36_spill] sm:$0xff]  ;;  %v13353_v45 = vld [vmem:[#allocation41_spill] sm:$0xff]  ;;  %v13354_v59 = vld [vmem:[#allocation42_spill] sm:$0xff] }
 0x28d   :  { %4709 = vmatpush.bf16.msra.mxu2 %v13323_v12  ;;  %4723 = vmatpush.bf16.msra.mxu3 %v13324_v6  ;;  %v2034_v22 = vmax.f32 %v944_v60, %v1936_v34  ;;  %v13348_v60 = vld [vmem:[#allocation33_spill] sm:$0xff] }
 0x28e   :  { %v4079_v32 = vadd.f32 %v13219_v50, %v4045_v29  ;;  %v13345_v29 = vperm.slane %v12283_v26, 5 }
 0x28f   :  { %v3042_v43 = vmax.f32 %v2034_v22, %v2944_v0  ;;  %v13346_v22 = vperm.slane %v12283_v26, 4 }
 0x290   :  { %4682 = vmatpush.bf16.msra.mxu0 %v12240_v39  ;;  %4696 = vmatpush.bf16.msra.mxu1 %v11972_v8  ;;  %v4095_v63 = vmax.f32 %v4079_v32, 0.0  ;;  %v4085_v35 = vadd.f32 %v13345_v29, %v4051_v55  ;;  %v12591_v32 = vpop.f32.mrf.mxu0  ;;  %v13356_v55 = vld [vmem:[#allocation44_spill] sm:$0xff]  ;;  %v13359_v29 = vld [vmem:[#allocation22_spill] sm:$0xff] }
 0x291   :  { %4710 = vmatpush.bf16.msra.mxu2 %v13326_v44  ;;  %4724 = vmatpush.bf16.msra.mxu3 %v13327_v38  ;;  %v4050_v34 = vmax.f32 %v3042_v43, %v3952_v18  ;;  %v13355_v18 = vld [vmem:[#allocation43_spill] sm:$0xff]  ;;  %v12593_v43 = vpop.f32.mrf.mxu1 }
 0x292   :  { %v12531_v20 = vpack.c.bf16 %v4095_v63, %v4094_v24  ;;  %v4101_v0 = vmax.f32 %v4085_v35, 0.0  ;;  %v4144_v24 = vld [vmem:[%s13159_s4] sm:$0x3] }
 0x293   :  { %v4084_v10 = vadd.f32 %v13346_v22, %v4050_v34  ;;  %v13357_v63 = vld [vmem:[#allocation46_spill] sm:$0xff]  ;;  %v13358_v34 = vld [vmem:[#allocation47_spill] sm:$0xff]  ;;  %v12606_v35 = vperm.slane %v4144_v24, 0  ;;  %v13360_v22 = vld [vmem:[#allocation49_spill] sm:$0xff] }
 0x294   :  { %4683 = vmatpush.bf16.msra.mxu0 %v13310_v30  ;;  %13344 = vst [vmem:[#allocation18_spill] sm:$0xff] %v12531_v20  ;;  %4697 = vmatpush.bf16.msra.mxu1 %v13311_v14 }
 0x295   :  { %4711 = vmatpush.bf16.msra.mxu2 %v12024_v21  ;;  %4725 = vmatpush.bf16.msra.mxu3 %v13328_v1  ;;  %v4100_v36 = vmax.f32 %v4084_v10, 0.0  ;;  %v12610_v10 = vpop.f32.mrf.mxu2 }
 0x297   :  { %v12548_v51 = vpack.c.bf16 %v4101_v0, %v4100_v36  ;;  %v12612_v0 = vpop.f32.mrf.mxu3 }
 0x298   :  { %4684 = vmatpush.bf16.msra.mxu0 %v12289_v4  ;;  %4698 = vmatpush.bf16.msra.mxu1 %v12053_v16 }
 0x299   :  { %4712 = vmatpush.bf16.msra.mxu2 %v12065_v54  ;;  %4726 = vmatpush.bf16.msra.mxu3 %v12314_v19  ;;  %v4677_v2 = vunpack.c.l.b16 %v12548_v51 }
 0x29b   :  { %v12561_v7 = vpack.c.b16 %v4677_v2, %v4676_v52 }
 0x29c   :  { %4685 = vmatpush.bf16.msra.mxu0 %v12316_v58  ;;  %4699 = vmatpush.bf16.msra.mxu1 %v12089_v23 }
 0x29d   :  { %4713 = vmatpush.bf16.msra.mxu2 %v12101_v28  ;;  %4727 = vmatpush.bf16.msra.mxu3 %v12339_v47 }
 0x2a0   :  { %4686 = vmatpush.bf16.msra.mxu0 %v12341_v46  ;;  %4700 = vmatpush.bf16.msra.mxu1 %v12133_v3 }
 0x2a1   :  { %4714 = vmatpush.bf16.msra.mxu2 %v12145_v15  ;;  %4728 = vmatpush.bf16.msra.mxu3 %v12363_v53 }
 0x2a4   :  { %4687 = vmatpush.bf16.msra.mxu0 %v12365_v61  ;;  %4701 = vmatpush.bf16.msra.mxu1 %v12172_v31 }
 0x2a5   :  { %4715 = vmatpush.bf16.msra.mxu2 %v12181_v17  ;;  %4729 = vmatpush.bf16.msra.mxu3 %v12377_v56 }
 0x2a7   :  { %4688 = vmatmul.bf16.vlgmr.msra.gmra.mxu0 %v12437_v48  ;;  %4702 = vmatmul.bf16.vlgmr.msra.gmra.mxu1 %v12491_v41 }
 0x2a8   :  { %4736 = vmatpush.bf16.msrb.mxu0 %v11925_v49  ;;  %4750 = vmatpush.bf16.msrb.mxu1 %v11930_v57 }
 0x2a9   :  { %4776 = vmatpush.bf16.msrb.mxu2 %v12189_v27  ;;  %4790 = vmatpush.bf16.msrb.mxu3 %v11895_v62 }
 0x2aa   :  { %4716 = vmatmul.bf16.vlgmr.msra.gmra.mxu2 %v12561_v7  ;;  %4730 = vmatmul.bf16.vlgmr.msra.gmra.mxu3 %v12437_v48  ;;  %v13351_v48 = vld [vmem:[#allocation38_spill] sm:$0xff] }
 0x2ac   :  { %4737 = vmatpush.bf16.msrb.mxu0 %v11966_v40  ;;  %4751 = vmatpush.bf16.msrb.mxu1 %v11970_v13 }
 0x2ad   :  { %4777 = vmatpush.bf16.msrb.mxu2 %v12216_v33  ;;  %4791 = vmatpush.bf16.msrb.mxu3 %v11932_v5 }
 0x2b0   :  { %4738 = vmatpush.bf16.msrb.mxu0 %v13347_v25  ;;  %4752 = vmatpush.bf16.msrb.mxu1 %v13348_v60 }
 0x2b1   :  { %4778 = vmatpush.bf16.msrb.mxu2 %v12240_v39  ;;  %4792 = vmatpush.bf16.msrb.mxu3 %v11972_v8 }
 0x2b4   :  { %4739 = vmatpush.bf16.msrb.mxu0 %v13349_v42  ;;  %4753 = vmatpush.bf16.msrb.mxu1 %v13350_v37 }
 0x2b5   :  { %4779 = vmatpush.bf16.msrb.mxu2 %v13310_v30  ;;  %4793 = vmatpush.bf16.msrb.mxu3 %v13311_v14 }
 0x2b8   :  { %4740 = vmatpush.bf16.msrb.mxu0 %v13351_v48  ;;  %4754 = vmatpush.bf16.msrb.mxu1 %v13352_v9 }
 0x2b9   :  { %4780 = vmatpush.bf16.msrb.mxu2 %v12289_v4  ;;  %4794 = vmatpush.bf16.msrb.mxu3 %v12053_v16 }
 0x2bc   :  { %4741 = vmatpush.bf16.msrb.mxu0 %v13353_v45  ;;  %4755 = vmatpush.bf16.msrb.mxu1 %v13354_v59 }
 0x2bd   :  { %4781 = vmatpush.bf16.msrb.mxu2 %v12316_v58  ;;  %4795 = vmatpush.bf16.msrb.mxu3 %v12089_v23 }
 0x2c0   :  { %4742 = vmatpush.bf16.msrb.mxu0 %v13355_v18  ;;  %4756 = vmatpush.bf16.msrb.mxu1 %v13356_v55 }
 0x2c1   :  { %4782 = vmatpush.bf16.msrb.mxu2 %v12341_v46  ;;  %4796 = vmatpush.bf16.msrb.mxu3 %v12133_v3 }
 0x2c3   :  { %v4329_v36 = vpop.f32.mrf.mxu0  ;;  %v4343_v2 = vpop.f32.mrf.mxu1 }
 0x2c4   :  { %4743 = vmatpush.bf16.msrb.mxu0 %v13357_v63  ;;  %4757 = vmatpush.bf16.msrb.mxu1 %v13358_v34  ;;  %v4330_v52 = vadd.f32 %v4329_v36, %v12606_v35 }
 0x2c5   :  { %4783 = vmatpush.bf16.msrb.mxu2 %v12365_v61  ;;  %4797 = vmatpush.bf16.msrb.mxu3 %v12172_v31 }
 0x2c6   :  { %v12624_v50 = vadd.f32 %v4343_v2, %v4330_v52 }
 0x2c7   :  { %4744 = vmatmul.bf16.vlgmr.msrb.gmra.mxu0 %v12491_v41  ;;  %4758 = vmatmul.bf16.vlgmr.msrb.gmra.mxu1 %v12561_v7 }
 0x2c8   :  { %4804 = vmatpush.bf16.msra.mxu0 %v13359_v29  ;;  %4818 = vmatpush.bf16.msra.mxu1 %v13360_v22 }
 0x2c9   :  { %4832 = vmatpush.bf16.msra.mxu2 %v11925_v49  ;;  %4846 = vmatpush.bf16.msra.mxu3 %v11930_v57  ;;  %v12626_v57 = vperm.slane %v4144_v24, 1 }
 0x2ca   :  { %4784 = vmatmul.bf16.vlgmr.msrb.gmra.mxu2 %v12491_v41  ;;  %4798 = vmatmul.bf16.vlgmr.msrb.gmra.mxu3 %v12561_v7  ;;  %v4357_v49 = vpop.f32.mrf.mxu2  ;;  %v4371_v36 = vpop.f32.mrf.mxu3 }
 0x2cb   :  { %v4358_v31 = vadd.f32 %v4357_v49, %v12626_v57  ;;  %v4331_v20 = vpop.f32.mrf.mxu0 }
 0x2cc   :  { %4805 = vmatpush.bf16.msra.mxu0 %v13323_v12  ;;  %4819 = vmatpush.bf16.msra.mxu1 %v13324_v6  ;;  %v4332_v2 = vadd.f32 %v4331_v20, %v12606_v35 }
 0x2cd   :  { %4833 = vmatpush.bf16.msra.mxu2 %v11966_v40  ;;  %4847 = vmatpush.bf16.msra.mxu3 %v11970_v13  ;;  %v4345_v40 = vpop.f32.mrf.mxu1  ;;  %v12637_v24 = vadd.f32 %v4371_v36, %v4358_v31 }
 0x2ce   :  { %v12640_v52 = vadd.f32 %v4345_v40, %v4332_v2 }
 0x2d0   :  { %4806 = vmatpush.bf16.msra.mxu0 %v13326_v44  ;;  %4820 = vmatpush.bf16.msra.mxu1 %v13327_v38 }
 0x2d1   :  { %4834 = vmatpush.bf16.msra.mxu2 %v13347_v25  ;;  %4848 = vmatpush.bf16.msra.mxu3 %v13348_v60 }
 0x2d2   :  { %v4359_v49 = vpop.f32.mrf.mxu2  ;;  %v4373_v31 = vpop.f32.mrf.mxu3 }
 0x2d3   :  { %v4360_v20 = vadd.f32 %v4359_v49, %v12626_v57  ;;  %v4495_v60 = vpop.f32.mrf.mxu0  ;;  %v4773_v49 = vunpack.c.h.b16 %v12548_v51 }
 0x2d4   :  { %4807 = vmatpush.bf16.msra.mxu0 %v12024_v21  ;;  %4821 = vmatpush.bf16.msra.mxu1 %v13328_v1  ;;  %v4496_v36 = vadd.f32 %v4495_v60, %v12606_v35 }
 0x2d5   :  { %4835 = vmatpush.bf16.msra.mxu2 %v13349_v42  ;;  %4849 = vmatpush.bf16.msra.mxu3 %v13350_v37  ;;  %v4509_v25 = vpop.f32.mrf.mxu1  ;;  %v12651_v40 = vadd.f32 %v4373_v31, %v4360_v20 }
 0x2d6   :  { %v4510_v2 = vadd.f32 %v4509_v25, %v4496_v36  ;;  %v13361_v36 = vld [vmem:[#allocation16_spill] sm:$0xff] }
 0x2d8   :  { %4808 = vmatpush.bf16.msra.mxu0 %v12065_v54  ;;  %4822 = vmatpush.bf16.msra.mxu1 %v12314_v19 }
 0x2d9   :  { %4836 = vmatpush.bf16.msra.mxu2 %v13351_v48  ;;  %4850 = vmatpush.bf16.msra.mxu3 %v13352_v9  ;;  %v4772_v9 = vunpack.c.h.b16 %v12470_v11  ;;  %v13371_v48 = vld [vmem:[#allocation48_spill] sm:$0xff] }
 0x2da   :  { %v4537_v11 = vpop.f32.mrf.mxu3 }
 0x2db   :  { %v4497_v60 = vpop.f32.mrf.mxu0  ;;  %v12664_v25 = vpack.c.b16 %v4773_v49, %v4772_v9  ;;  %v13363_v9 = vld [vmem:[#allocation8_spill] sm:$0xff]  ;;  %v13364_v49 = vld [vmem:[#allocation9_spill] sm:$0xff] }
 0x2dc   :  { %4809 = vmatpush.bf16.msra.mxu0 %v12101_v28  ;;  %4823 = vmatpush.bf16.msra.mxu1 %v12339_v47  ;;  %v4498_v20 = vadd.f32 %v4497_v60, %v12606_v35  ;;  %v13362_v60 = vld [vmem:[#allocation17_spill] sm:$0xff] }
 0x2dd   :  { %4837 = vmatpush.bf16.msra.mxu2 %v13353_v45  ;;  %4851 = vmatpush.bf16.msra.mxu3 %v13354_v59  ;;  %v4511_v31 = vpop.f32.mrf.mxu1 }
 0x2de   :  { %v12668_v51 = vadd.f32 %v4511_v31, %v4498_v20  ;;  %v1028_v20 = vadd.f32 %v13364_v49, %v13363_v9  ;;  %v13365_v31 = vld [vmem:[#allocation14_spill] sm:$0xff] }
 0x2df   :  { %v13372_v9 = vld [vmem:[#allocation50_spill] sm:$0xff] }
 0x2e0   :  { %4810 = vmatpush.bf16.msra.mxu0 %v12145_v15  ;;  %4824 = vmatpush.bf16.msra.mxu1 %v12363_v53  ;;  %v3000_v49 = vadd.f32 %v13372_v9, %v13371_v48  ;;  %v13374_v9 = vperm.slane %v12283_v26, 6 }
 0x2e1   :  { %4838 = vmatpush.bf16.msra.mxu2 %v13355_v18  ;;  %4852 = vmatpush.bf16.msra.mxu3 %v13356_v55  ;;  %v13368_v55 = vld [vmem:[#allocation53_spill] sm:$0xff] }
 0x2e4   :  { %4811 = vmatpush.bf16.msra.mxu0 %v12181_v17  ;;  %4825 = vmatpush.bf16.msra.mxu1 %v12377_v56 }
 0x2e5   :  { %4839 = vmatpush.bf16.msra.mxu2 %v13357_v63  ;;  %4853 = vmatpush.bf16.msra.mxu3 %v13358_v34  ;;  %v2020_v63 = vadd.f32 %v13362_v60, %v13361_v36  ;;  %v13369_v36 = vld [vmem:[#allocation6_spill] sm:$0xff]  ;;  %v13370_v60 = vld [vmem:[#allocation7_spill] sm:$0xff] }
 0x2e6   :  { %v1000_v59 = vadd.f32 %v13370_v60, %v13369_v36  ;;  %v4377_v36 = vmax.f32 %v12637_v24, 0.0 }
 0x2e7   :  { %4812 = vmatmul.bf16.vlgmr.msra.gmra.mxu0 %v12664_v25  ;;  %4826 = vmatmul.bf16.vlgmr.msra.gmra.mxu1 %v12491_v41  ;;  %v4538_v41 = vadd.f32 %v4537_v11, %v12626_v57  ;;  %v2037_v45 = vmax.f32 %v1028_v20, %v2020_v63  ;;  %v4008_v11 = vadd.f32 %v12593_v43, %v12591_v32 }
 0x2e8   :  { %4874 = vmatpush.bf16.msrb.mxu0 %v12189_v27  ;;  %4888 = vmatpush.bf16.msrb.mxu1 %v11895_v62 }
 0x2e9   :  { %4902 = vmatpush.bf16.msrb.mxu2 %v13359_v29  ;;  %4916 = vmatpush.bf16.msrb.mxu3 %v13360_v22  ;;  %v13366_v29 = vld [vmem:[#allocation15_spill] sm:$0xff]  ;;  %v13367_v22 = vld [vmem:[#allocation52_spill] sm:$0xff] }
 0x2ea   :  { %4840 = vmatmul.bf16.vlgmr.msra.gmra.mxu2 %v12561_v7  ;;  %4854 = vmatmul.bf16.vlgmr.msra.gmra.mxu3 %v12664_v25  ;;  %v1992_v34 = vadd.f32 %v13366_v29, %v13365_v31  ;;  %v3028_v18 = vadd.f32 %v13368_v55, %v13367_v22  ;;  %v4036_v29 = vadd.f32 %v12612_v0, %v12610_v10  ;;  %v4551_v31 = vpop.f32.mrf.mxu0  ;;  %v4565_v22 = vpop.f32.mrf.mxu1 }
 0x2eb   :  { %v4552_v55 = vadd.f32 %v4551_v31, %v4538_v41  ;;  %v4539_v10 = vpop.f32.mrf.mxu3  ;;  %v4523_v0 = vpop.f32.mrf.mxu2 }
 0x2ec   :  { %4875 = vmatpush.bf16.msrb.mxu0 %v12216_v33  ;;  %4889 = vmatpush.bf16.msrb.mxu1 %v11932_v5  ;;  %v3045_v37 = vmax.f32 %v2037_v45, %v3028_v18  ;;  %v4524_v45 = vadd.f32 %v4523_v0, %v4510_v2  ;;  %v4376_v18 = vmax.f32 %v12624_v50, 0.0  ;;  %v4540_v32 = vadd.f32 %v4539_v10, %v12626_v57 }
 0x2ed   :  { %4903 = vmatpush.bf16.msrb.mxu2 %v13323_v12  ;;  %4917 = vmatpush.bf16.msrb.mxu3 %v13324_v6  ;;  %v2036_v12 = vmax.f32 %v1000_v59, %v1992_v34  ;;  %v4566_v48 = vadd.f32 %v4565_v22, %v4552_v55  ;;  %v4379_v22 = vmax.f32 %v12651_v40, 0.0 }
 0x2ee   :  { %v4053_v20 = vmax.f32 %v3045_v37, %v4036_v29  ;;  %v13373_v37 = vperm.slane %v12283_v26, 7  ;;  %v4378_v26 = vmax.f32 %v12640_v52, 0.0 }
 0x2ef   :  { %v3044_v63 = vmax.f32 %v2036_v12, %v3000_v49  ;;  %v4571_v41 = vmax.f32 %v4566_v48, 0.0  ;;  %v4570_v12 = vmax.f32 %v4524_v45, 0.0  ;;  %v13375_v45 = vld [vmem:[#allocation18_spill] sm:$0xff] }
 0x2f0   :  { %4876 = vmatpush.bf16.msrb.mxu0 %v12240_v39  ;;  %4890 = vmatpush.bf16.msrb.mxu1 %v11972_v8  ;;  %v4087_v34 = vadd.f32 %v13373_v37, %v4053_v20 }
 0x2f1   :  { %4904 = vmatpush.bf16.msrb.mxu2 %v13326_v44  ;;  %4918 = vmatpush.bf16.msrb.mxu3 %v13327_v38  ;;  %v4052_v59 = vmax.f32 %v3044_v63, %v4008_v11  ;;  %v12708_v43 = vadd.f32 %v4571_v41, %v4377_v36  ;;  %v12713_v60 = vadd.f32 %v4570_v12, %v4376_v18  ;;  %v13376_v18 = vld [vmem:[#allocation45_spill] sm:$0xff] }
 0x2f2   :  { %v4553_v24 = vpop.f32.mrf.mxu0  ;;  %v4567_v50 = vpop.f32.mrf.mxu1  ;;  %v4103_v31 = vmax.f32 %v4087_v34, 0.0  ;;  %v13378_v34 = vld [vmem:[#allocation26_spill] sm:$0xff] }
 0x2f3   :  { %v4554_v2 = vadd.f32 %v4553_v24, %v4540_v32  ;;  %v4086_v49 = vadd.f32 %v13374_v9, %v4052_v59  ;;  %v4525_v55 = vpop.f32.mrf.mxu2  ;;  %v4870_v59 = vunpack.c.l.b16 %v13375_v45  ;;  %v13377_v32 = vld [vmem:[#allocation24_spill] sm:$0xff] }
 0x2f4   :  { %4877 = vmatpush.bf16.msrb.mxu0 %v13310_v30  ;;  %4891 = vmatpush.bf16.msrb.mxu1 %v13311_v14  ;;  %v4526_v48 = vadd.f32 %v4525_v55, %v12668_v51  ;;  %v4605_v51 = vpop.f32.mrf.mxu3  ;;  %v13379_v24 = vld [vmem:[#allocation28_spill] sm:$0xff] }
 0x2f5   :  { %4905 = vmatpush.bf16.msrb.mxu2 %v12024_v21  ;;  %4919 = vmatpush.bf16.msrb.mxu3 %v13328_v1  ;;  %v4568_v29 = vadd.f32 %v4567_v50, %v4554_v2  ;;  %v4102_v63 = vmax.f32 %v4086_v49, 0.0  ;;  %v13380_v49 = vld [vmem:[#allocation32_spill] sm:$0xff] }
 0x2f6   :  { %v4572_v10 = vmax.f32 %v4526_v48, 0.0 }
 0x2f7   :  { %v4573_v11 = vmax.f32 %v4568_v29, 0.0  ;;  %v12730_v0 = vpack.c.bf16 %v4103_v31, %v4102_v63  ;;  %v13381_v31 = vld [vmem:[#allocation33_spill] sm:$0xff]  ;;  %v13383_v63 = vld [vmem:[#allocation38_spill] sm:$0xff] }
 0x2f8   :  { %4878 = vmatpush.bf16.msrb.mxu0 %v12289_v4  ;;  %4892 = vmatpush.bf16.msrb.mxu1 %v12053_v16  ;;  %v4576_v40 = vadd.f32 %v4572_v10, %v4378_v26  ;;  %v13384_v10 = vld [vmem:[#allocation39_spill] sm:$0xff] }
 0x2f9   :  { %4906 = vmatpush.bf16.msrb.mxu2 %v12065_v54  ;;  %4920 = vmatpush.bf16.msrb.mxu3 %v12314_v19  ;;  %v12727_v20 = vadd.f32 %v4573_v11, %v4379_v22  ;;  %v4871_v36 = vunpack.c.l.b16 %v12730_v0 }
 0x2fb   :  { %v4591_v52 = vpop.f32.mrf.mxu2  ;;  %v12744_v37 = vpack.c.b16 %v4871_v36, %v4870_v59 }
 0x2fc   :  { %4879 = vmatpush.bf16.msrb.mxu0 %v12316_v58  ;;  %4893 = vmatpush.bf16.msrb.mxu1 %v12089_v23  ;;  %v4592_v41 = vadd.f32 %v4591_v52, %v12606_v35  ;;  %v4607_v9 = vpop.f32.mrf.mxu3 }
 0x2fd   :  { %4907 = vmatpush.bf16.msrb.mxu2 %v12101_v28  ;;  %4921 = vmatpush.bf16.msrb.mxu3 %v12339_v47 }
 0x2fe   :  { %v4606_v12 = vadd.f32 %v4605_v51, %v4592_v41  ;;  %v13386_v41 = vld [vmem:[#allocation42_spill] sm:$0xff] }
 0x300   :  { %4880 = vmatpush.bf16.msrb.mxu0 %v12341_v46  ;;  %4894 = vmatpush.bf16.msrb.mxu1 %v12133_v3 }
 0x301   :  { %4908 = vmatpush.bf16.msrb.mxu2 %v12145_v15  ;;  %4922 = vmatpush.bf16.msrb.mxu3 %v12363_v53 }
 0x303   :  { %v4593_v2 = vpop.f32.mrf.mxu2 }
 0x304   :  { %4881 = vmatpush.bf16.msrb.mxu0 %v12365_v61  ;;  %4895 = vmatpush.bf16.msrb.mxu1 %v13376_v18 }
 0x305   :  { %4909 = vmatpush.bf16.msrb.mxu2 %v12181_v17  ;;  %4923 = vmatpush.bf16.msrb.mxu3 %v12377_v56 }
 0x307   :  { %4882 = vmatmul.bf16.vlgmr.msrb.gmra.mxu0 %v12561_v7  ;;  %4896 = vmatmul.bf16.vlgmr.msrb.gmra.mxu1 %v12664_v25 }
 0x308   :  { %4930 = vmatpush.bf16.msra.mxu0 %v13377_v32  ;;  %4944 = vmatpush.bf16.msra.mxu1 %v13378_v34 }
 0x309   :  { %4970 = vmatpush.bf16.msra.mxu2 %v12189_v27  ;;  %4984 = vmatpush.bf16.msra.mxu3 %v11895_v62  ;;  %v4594_v62 = vadd.f32 %v4593_v2, %v12606_v35  ;;  %v4619_v27 = vpop.f32.mrf.mxu0 }
 0x30a   :  { %4910 = vmatmul.bf16.vlgmr.msrb.gmra.mxu2 %v12744_v37  ;;  %4924 = vmatmul.bf16.vlgmr.msrb.gmra.mxu3 %v12561_v7  ;;  %v4620_v50 = vadd.f32 %v4619_v27, %v4606_v12  ;;  %v4633_v7 = vpop.f32.mrf.mxu1  ;;  %v13387_v12 = vld [vmem:[#allocation43_spill] sm:$0xff]  ;;  %v13389_v27 = vld [vmem:[#allocation46_spill] sm:$0xff] }
 0x30b   :  { %v4608_v29 = vadd.f32 %v4607_v9, %v4594_v62  ;;  %v4634_v22 = vadd.f32 %v4633_v7, %v12626_v57  ;;  %v13388_v9 = vld [vmem:[#allocation44_spill] sm:$0xff] }
 0x30c   :  { %4931 = vmatpush.bf16.msra.mxu0 %v13379_v24  ;;  %4945 = vmatpush.bf16.msra.mxu1 %v11970_v13  ;;  %v4666_v55 = vmax.f32 %v4620_v50, 0.0  ;;  %v13390_v50 = vld [vmem:[#allocation47_spill] sm:$0xff] }
 0x30d   :  { %4971 = vmatpush.bf16.msra.mxu2 %v12216_v33  ;;  %4985 = vmatpush.bf16.msra.mxu3 %v11932_v5  ;;  %v13382_v5 = vld [vmem:[#allocation37_spill] sm:$0xff]  ;;  %v4661_v11 = vpop.f32.mrf.mxu3  ;;  %v4647_v48 = vpop.f32.mrf.mxu2 }
 0x30e   :  { %v12763_v33 = vadd.f32 %v4666_v55, %v12713_v60  ;;  %v7858_v55 = vld [vmem:[%s13157_s3 + $0xf8] sm:$0xf0] }
 0x310   :  { %4932 = vmatpush.bf16.msra.mxu0 %v13380_v49  ;;  %4946 = vmatpush.bf16.msra.mxu1 %v13381_v31 }
 0x311   :  { %4972 = vmatpush.bf16.msra.mxu2 %v12240_v39  ;;  %4986 = vmatpush.bf16.msra.mxu3 %v11972_v8  ;;  %v4621_v39 = vpop.f32.mrf.mxu0  ;;  %v4648_v8 = vadd.f32 %v4647_v48, %v4634_v22 }
 0x312   :  { %v4622_v26 = vadd.f32 %v4621_v39, %v4608_v29  ;;  %v13392_v29 = vld [vmem:[#allocation49_spill] sm:$0xff]  ;;  %v7784_v39 = vld [vmem:[%s13157_s3 + $0x60] sm:$0xf] }
 0x313   :  { %v4662_v60 = vadd.f32 %v4661_v11, %v4648_v8  ;;  %v4966_v8 = vunpack.c.h.b16 %v13375_v45  ;;  %v7850_v45 = vld [vmem:[%s13157_s3 + $0xe8] sm:$0xf0] }
 0x314   :  { %4933 = vmatpush.bf16.msra.mxu0 %v13349_v42  ;;  %4947 = vmatpush.bf16.msra.mxu1 %v13382_v5  ;;  %v4668_v51 = vmax.f32 %v4622_v26, 0.0 }
 0x315   :  { %4973 = vmatpush.bf16.msra.mxu2 %v13310_v30  ;;  %4987 = vmatpush.bf16.msra.mxu3 %v13311_v14  ;;  %v4635_v30 = vpop.f32.mrf.mxu1  ;;  %v4667_v36 = vmax.f32 %v4662_v60, 0.0  ;;  %v13385_v14 = vld [vmem:[#allocation41_spill] sm:$0xff]  ;;  %v8500_v60 = vld [vmem:[%s13157_s3 + $0x64] sm:$0xf] }
 0x316   :  { %v12774_v52 = vadd.f32 %v4668_v51, %v4576_v40  ;;  %v4636_v59 = vadd.f32 %v4635_v30, %v12626_v57  ;;  %v4663_v40 = vpop.f32.mrf.mxu3  ;;  %v7786_v51 = vld [vmem:[%s13157_s3 + $0x68] sm:$0xf0] }
 0x318   :  { %4934 = vmatpush.bf16.msra.mxu0 %v13383_v63  ;;  %4948 = vmatpush.bf16.msra.mxu1 %v13384_v10 }
 0x319   :  { %4974 = vmatpush.bf16.msra.mxu2 %v12289_v4  ;;  %4988 = vmatpush.bf16.msra.mxu3 %v12053_v16  ;;  %v12782_v4 = vadd.f32 %v4667_v36, %v12708_v43  ;;  %v4649_v16 = vpop.f32.mrf.mxu2 }
 0x31a   :  { %v4650_v2 = vadd.f32 %v4649_v16, %v4636_v59  ;;  %v7840_v59 = vld [vmem:[%s13157_s3 + $0xd0] sm:$0xf] }
 0x31c   :  { %4935 = vmatpush.bf16.msra.mxu0 %v13385_v14  ;;  %4949 = vmatpush.bf16.msra.mxu1 %v13386_v41  ;;  %v4664_v62 = vadd.f32 %v4663_v40, %v4650_v2  ;;  %v8498_v2 = vld [vmem:[%s13157_s3 + $0x54] sm:$0xf] }
 0x31d   :  { %4975 = vmatpush.bf16.msra.mxu2 %v12316_v58  ;;  %4989 = vmatpush.bf16.msra.mxu3 %v12089_v23  ;;  %v13391_v23 = vld [vmem:[#allocation22_spill] sm:$0xff]  ;;  %v8514_v40 = vld [vmem:[%s13157_s3 + $0xd4] sm:$0xf] }
 0x31e   :  { %v4669_v58 = vmax.f32 %v4664_v62, 0.0  ;;  %v7842_v62 = vld [vmem:[%s13157_s3 + $0xd8] sm:$0xf0] }
 0x320   :  { %4936 = vmatpush.bf16.msra.mxu0 %v13387_v12  ;;  %4950 = vmatpush.bf16.msra.mxu1 %v13388_v9  ;;  %v12794_v43 = vadd.f32 %v4669_v58, %v12727_v20 }
 0x321   :  { %4976 = vmatpush.bf16.msra.mxu2 %v12341_v46  ;;  %4990 = vmatpush.bf16.msra.mxu3 %v12133_v3  ;;  %v13393_v3 = vld [vmem:[#allocation27_spill] sm:$0xff] }
 0x324   :  { %4937 = vmatpush.bf16.msra.mxu0 %v13389_v27  ;;  %4951 = vmatpush.bf16.msra.mxu1 %v13390_v50  ;;  %v4689_v46 = vpop.f32.mrf.mxu0  ;;  %v4703_v20 = vpop.f32.mrf.mxu1 }
 0x325   :  { %4977 = vmatpush.bf16.msra.mxu2 %v12365_v61  ;;  %4991 = vmatpush.bf16.msra.mxu3 %v13376_v18  ;;  %v4690_v61 = vadd.f32 %v4689_v46, %v12606_v35  ;;  %v7845_v46 = vor.u32 %v8514_v40, %v7842_v62  ;;  %v7744_v40 = vld [vmem:[%s13157_s3 + $0x10] sm:$0xf]  ;;  %v8491_v62 = vld [vmem:[%s13157_s3 + $0x14] sm:$0xf0] }
 0x327   :  { %4938 = vmatmul.bf16.vlgmr.msra.gmra.mxu0 %v12664_v25  ;;  %4952 = vmatmul.bf16.vlgmr.msra.gmra.mxu1 %v12744_v37  ;;  %v4704_v18 = vadd.f32 %v4703_v20, %v4690_v61  ;;  %v8513_v61 = vld [vmem:[%s13157_s3 + $0xc4] sm:$0xf0]  ;;  %v8496_v20 = vld [vmem:[%s13157_s3 + $0x44] sm:$0xf] }
 0x328   :  { %4998 = vmatpush.bf16.msrb.mxu0 %v13391_v23  ;;  %5012 = vmatpush.bf16.msrb.mxu1 %v13392_v29  ;;  %v8497_v23 = vld [vmem:[%s13157_s3 + $0x44] sm:$0xf0]  ;;  %v7832_v29 = vld [vmem:[%s13157_s3 + $0xc0] sm:$0xf] }
 0x329   :  { %5026 = vmatpush.bf16.msrb.mxu2 %v13377_v32  ;;  %5040 = vmatpush.bf16.msrb.mxu3 %v13378_v34 }
 0x32a   :  { %4978 = vmatmul.bf16.vlgmr.msra.gmra.mxu2 %v12664_v25  ;;  %4992 = vmatmul.bf16.vlgmr.msra.gmra.mxu3 %v12744_v37 }
 0x32c   :  { %4999 = vmatpush.bf16.msrb.mxu0 %v13393_v3  ;;  %5013 = vmatpush.bf16.msrb.mxu1 %v13324_v6  ;;  %v4705_v34 = vpop.f32.mrf.mxu1 }
 0x32d   :  { %5027 = vmatpush.bf16.msrb.mxu2 %v13379_v24  ;;  %5041 = vmatpush.bf16.msrb.mxu3 %v11970_v13  ;;  %v4717_v13 = vpop.f32.mrf.mxu2  ;;  %v8503_v24 = vld [vmem:[%s13157_s3 + $0x74] sm:$0xf0]  ;;  %v4731_v22 = vpop.f32.mrf.mxu3 }
 0x32e   :  { %v4718_v6 = vadd.f32 %v4717_v13, %v4704_v18  ;;  %v4732_v3 = vadd.f32 %v4731_v22, %v12626_v57  ;;  %v7770_v18 = vld [vmem:[%s13157_s3 + $0x48] sm:$0xf0] }
 0x330   :  { %5000 = vmatpush.bf16.msrb.mxu0 %v13326_v44  ;;  %5014 = vmatpush.bf16.msrb.mxu1 %v13327_v38  ;;  %v4691_v44 = vpop.f32.mrf.mxu0  ;;  %v4764_v32 = vmax.f32 %v4718_v6, 0.0 }
 0x331   :  { %5028 = vmatpush.bf16.msrb.mxu2 %v13380_v49  ;;  %5042 = vmatpush.bf16.msrb.mxu3 %v13381_v31  ;;  %v4692_v38 = vadd.f32 %v4691_v44, %v12606_v35  ;;  %v8502_v49 = vld [vmem:[%s13157_s3 + $0x74] sm:$0xf]  ;;  %v7794_v31 = vld [vmem:[%s13157_s3 + $0x78] sm:$0xf0]  ;;  %v8512_v44 = vld [vmem:[%s13157_s3 + $0xc4] sm:$0xf] }
 0x332   :  { %v7797_v48 = vor.u32 %v8502_v49, %v7794_v31  ;;  %v8511_v31 = vld [vmem:[%s13157_s3 + $0xb4] sm:$0xf0] }
 0x334   :  { %5001 = vmatpush.bf16.msrb.mxu0 %v12024_v21  ;;  %5015 = vmatpush.bf16.msrb.mxu1 %v13328_v1  ;;  %v4706_v21 = vadd.f32 %v4705_v34, %v4692_v38  ;;  %v12822_v1 = vadd.f32 %v4764_v32, %v12763_v33  ;;  %v4967_v33 = vunpack.c.h.b16 %v12730_v0  ;;  %v7848_v0 = vld [vmem:[%s13157_s3 + $0xe0] sm:$0xf]  ;;  %v7834_v38 = vld [vmem:[%s13157_s3 + $0xc8] sm:$0xf0] }
 0x335   :  { %5029 = vmatpush.bf16.msrb.mxu2 %v13349_v42  ;;  %5043 = vmatpush.bf16.msrb.mxu3 %v13382_v5  ;;  %v7792_v42 = vld [vmem:[%s13157_s3 + $0x70] sm:$0xf]  ;;  %v4733_v13 = vpop.f32.mrf.mxu3  ;;  %v7837_v49 = vor.u32 %v8512_v44, %v7834_v38  ;;  %v8489_v44 = vld [vmem:[%s13157_s3 + $0x4] sm:$0xf0]  ;;  %v7800_v38 = vld [vmem:[%s13157_s3 + $0x80] sm:$0xf] }
 0x336   :  { %v7793_v5 = vor.u32 %v8503_v24, %v7792_v42  ;;  %v12888_v30 = vpack.c.b16 %v4967_v33, %v4966_v8  ;;  %v7760_v42 = vld [vmem:[%s13157_s3 + $0x30] sm:$0xf]  ;;  %v8495_v24 = vld [vmem:[%s13157_s3 + $0x34] sm:$0xf0]  ;;  %v7826_v33 = vld [vmem:[%s13157_s3 + $0xb8] sm:$0xf0]  ;;  %v4734_v8 = vadd.f32 %v4733_v13, %v12626_v57 }
 0x337   :  { %v7761_v22 = vor.u32 %v8495_v24, %v7760_v42  ;;  %v7738_v42 = vld [vmem:[%s13157_s3 + $0x8] sm:$0xf0] }
 0x338   :  { %5002 = vmatpush.bf16.msrb.mxu0 %v12065_v54  ;;  %5016 = vmatpush.bf16.msrb.mxu1 %v12314_v19  ;;  %v4719_v54 = vpop.f32.mrf.mxu2 }
 0x339   :  { %5030 = vmatpush.bf16.msrb.mxu2 %v13383_v63  ;;  %5044 = vmatpush.bf16.msrb.mxu3 %v13384_v10  ;;  %v4720_v19 = vadd.f32 %v4719_v54, %v4706_v21  ;;  %v8501_v63 = vld [vmem:[%s13157_s3 + $0x64] sm:$0xf0]  ;;  %v7833_v54 = vor.u32 %v8513_v61, %v7832_v29  ;;  %v7746_v29 = vld [vmem:[%s13157_s3 + $0x18] sm:$0xf0] }
 0x33a   :  { %v8517_v10 = vld [vmem:[%s13157_s3 + $0xe4] sm:$0xf0]  ;;  %v7785_v36 = vor.u32 %v8501_v63, %v7784_v39  ;;  %v7752_v39 = vld [vmem:[%s13157_s3 + $0x20] sm:$0xf] }
 0x33b   :  { %v4766_v7 = vmax.f32 %v4720_v19, 0.0  ;;  %v7773_v19 = vor.u32 %v8496_v20, %v7770_v18  ;;  %v8493_v63 = vld [vmem:[%s13157_s3 + $0x24] sm:$0xf0]  ;;  %v7745_v20 = vor.u32 %v8491_v62, %v7744_v40  ;;  %v8534_v40 = vld [vmem:[%s13161_s5 + $0x70] sm:$0xff] }
 0x33c   :  { %5003 = vmatpush.bf16.msrb.mxu0 %v12101_v28  ;;  %5017 = vmatpush.bf16.msrb.mxu1 %v12339_v47  ;;  %v7856_v28 = vld [vmem:[%s13157_s3 + $0xf0] sm:$0xf]  ;;  %v8519_v47 = vld [vmem:[%s13157_s3 + $0xf4] sm:$0xf0] }
 0x33d   :  { %5031 = vmatpush.bf16.msrb.mxu2 %v13385_v14  ;;  %5045 = vmatpush.bf16.msrb.mxu3 %v13386_v41  ;;  %v12858_v11 = vadd.f32 %v4766_v7, %v12774_v52  ;;  %v7849_v52 = vor.u32 %v8517_v10, %v7848_v0  ;;  %v7776_v14 = vld [vmem:[%s13157_s3 + $0x50] sm:$0xf]  ;;  %v8499_v41 = vld [vmem:[%s13157_s3 + $0x54] sm:$0xf0]  ;;  %v8494_v7 = vld [vmem:[%s13157_s3 + $0x34] sm:$0xf] }
 0x33e   :  { %v7777_v58 = vor.u32 %v8499_v41, %v7776_v14  ;;  %v7816_v0 = vld [vmem:[%s13157_s3 + $0xa0] sm:$0xf]  ;;  %v7818_v14 = vld [vmem:[%s13157_s3 + $0xa8] sm:$0xf0] }
 0x340   :  { %5004 = vmatpush.bf16.msrb.mxu0 %v12145_v15  ;;  %5018 = vmatpush.bf16.msrb.mxu1 %v12363_v53  ;;  %v8518_v15 = vld [vmem:[%s13157_s3 + $0xf4] sm:$0xf]  ;;  %v7857_v53 = vor.u32 %v8519_v47, %v7856_v28  ;;  %v7824_v28 = vld [vmem:[%s13157_s3 + $0xb0] sm:$0xf] }
 0x341   :  { %5032 = vmatpush.bf16.msrb.mxu2 %v13387_v12  ;;  %5046 = vmatpush.bf16.msrb.mxu3 %v13388_v9  ;;  %v7861_v26 = vor.u32 %v8518_v15, %v7858_v55  ;;  %v8515_v12 = vld [vmem:[%s13157_s3 + $0xd4] sm:$0xf0]  ;;  %v7778_v9 = vld [vmem:[%s13157_s3 + $0x58] sm:$0xf0]  ;;  %v8510_v55 = vld [vmem:[%s13157_s3 + $0xb4] sm:$0xf] }
 0x342   :  { %v7762_v15 = vld [vmem:[%s13157_s3 + $0x38] sm:$0xf0]  ;;  %v7829_v10 = vor.u32 %v8510_v55, %v7826_v33 }
 0x344   :  { %5005 = vmatpush.bf16.msrb.mxu0 %v12181_v17  ;;  %5019 = vmatpush.bf16.msrb.mxu1 %v12377_v56  ;;  %v8516_v17 = vld [vmem:[%s13157_s3 + $0xe4] sm:$0xf]  ;;  %v7789_v56 = vor.u32 %v8500_v60, %v7786_v51  ;;  %v4745_v6 = vpop.f32.mrf.mxu0  ;;  %v4759_v34 = vpop.f32.mrf.mxu1  ;;  %v8509_v51 = vld [vmem:[%s13157_s3 + $0xa4] sm:$0xf0] }
 0x345   :  { %5033 = vmatpush.bf16.msrb.mxu2 %v13389_v27  ;;  %5047 = vmatpush.bf16.msrb.mxu3 %v13390_v50  ;;  %v7853_v16 = vor.u32 %v8516_v17, %v7850_v45  ;;  %v7841_v27 = vor.u32 %v8515_v12, %v7840_v59  ;;  %v7781_v50 = vor.u32 %v8498_v2, %v7778_v9  ;;  %v8492_v17 = vld [vmem:[%s13157_s3 + $0x24] sm:$0xf]  ;;  %v7754_v45 = vld [vmem:[%s13157_s3 + $0x28] sm:$0xf0] }
 0x346   :  { %v4746_v32 = vadd.f32 %v4745_v6, %v4732_v3  ;;  %v7753_v59 = vor.u32 %v8493_v63, %v7752_v39  ;;  %v7817_v2 = vor.u32 %v8509_v51, %v7816_v0  ;;  %v7757_v9 = vor.u32 %v8492_v17, %v7754_v45  ;;  %v8506_v3 = vld [vmem:[%s13157_s3 + $0x94] sm:$0xf]  ;;  %v7736_v6 = vld [vmem:[%s13157_s3] sm:$0xf] }
 0x347   :  { %5006 = vmatmul.bf16.vlgmr.msrb.gmra.mxu0 %v12888_v30  ;;  %5020 = vmatmul.bf16.vlgmr.msrb.gmra.mxu1 %v12664_v25  ;;  %v7768_v25 = vld [vmem:[%s13157_s3 + $0x40] sm:$0xf] }
 0x348   :  { %5254 = vmatpush.bf16.msra.mxu0 %v7793_v5  ;;  %5268 = vmatpush.bf16.msra.mxu1 %v7857_v53  ;;  %v7769_v21 = vor.u32 %v8497_v23, %v7768_v25  ;;  %v4760_v47 = vadd.f32 %v4759_v34, %v4746_v32  ;;  %v7825_v53 = vor.u32 %v8511_v31, %v7824_v28  ;;  %v8507_v25 = vld [vmem:[%s13157_s3 + $0x94] sm:$0xf0]  ;;  %v8490_v23 = vld [vmem:[%s13157_s3 + $0x14] sm:$0xf]  ;;  %v7802_v28 = vld [vmem:[%s13157_s3 + $0x88] sm:$0xf0] }
 0x349   :  { %5282 = vmatpush.bf16.msra.mxu2 %v7797_v48  ;;  %5296 = vmatpush.bf16.msra.mxu3 %v7861_v26  ;;  %v7765_v48 = vor.u32 %v8494_v7, %v7762_v15  ;;  %v7749_v13 = vor.u32 %v8490_v23, %v7746_v29 }
 0x34a   :  { %5034 = vmatmul.bf16.vlgmr.msrb.gmra.mxu2 %v12744_v37  ;;  %5048 = vmatmul.bf16.vlgmr.msrb.gmra.mxu3 %v12888_v30  ;;  %v4765_v5 = vmax.f32 %v4760_v47, 0.0 }
 0x34c   :  { %5255 = vmatpush.bf16.msra.mxu0 %v7785_v36  ;;  %5269 = vmatpush.bf16.msra.mxu1 %v7849_v52  ;;  %v12979_v26 = vadd.f32 %v4765_v5, %v12782_v4  ;;  %v4747_v4 = vpop.f32.mrf.mxu0  ;;  %v4761_v12 = vpop.f32.mrf.mxu1 }
 0x34d   :  { %5283 = vmatpush.bf16.msra.mxu2 %v7789_v56  ;;  %5297 = vmatpush.bf16.msra.mxu3 %v7853_v16  ;;  %v4785_v60 = vpop.f32.mrf.mxu2  ;;  %v4799_v52 = vpop.f32.mrf.mxu3  ;;  %v8508_v56 = vld [vmem:[%s13157_s3 + $0xa4] sm:$0xf]  ;;  %v4748_v41 = vadd.f32 %v4747_v4, %v4734_v8 }
 0x34e   :  { %v4786_v36 = vadd.f32 %v4785_v60, %v12606_v35 }
 0x350   :  { %5256 = vmatpush.bf16.msra.mxu0 %v7777_v58  ;;  %5270 = vmatpush.bf16.msra.mxu1 %v7841_v27  ;;  %v4800_v16 = vadd.f32 %v4799_v52, %v4786_v36  ;;  %v7808_v58 = vld [vmem:[%s13157_s3 + $0x90] sm:$0xf]  ;;  %v4762_v27 = vadd.f32 %v4761_v12, %v4748_v41  ;;  %v8535_v12 = vld [vmem:[%s13161_s5 + $0x78] sm:$0xff] }
 0x351   :  { %5284 = vmatpush.bf16.msra.mxu2 %v7781_v50  ;;  %5298 = vmatpush.bf16.msra.mxu3 %v7845_v46  ;;  %v7821_v50 = vor.u32 %v8508_v56, %v7818_v14  ;;  %v7810_v46 = vld [vmem:[%s13157_s3 + $0x98] sm:$0xf0]  ;;  %v7809_v18 = vor.u32 %v8507_v25, %v7808_v58  ;;  %v8533_v25 = vld [vmem:[%s13161_s5 + $0x68] sm:$0xff] }
 0x352   :  { %v4767_v61 = vmax.f32 %v4762_v27, 0.0  ;;  %v7813_v34 = vor.u32 %v8506_v3, %v7810_v46  ;;  %v8523_v3 = vld [vmem:[%s13161_s5 + $0x18] sm:$0xff] }
 0x354   :  { %5257 = vmatpush.bf16.msra.mxu0 %v7769_v21  ;;  %5271 = vmatpush.bf16.msra.mxu1 %v7833_v54  ;;  %v13031_v32 = vadd.f32 %v4767_v61, %v12794_v43  ;;  %v8505_v54 = vld [vmem:[%s13157_s3 + $0x84] sm:$0xf0]  ;;  %v8504_v43 = vld [vmem:[%s13157_s3 + $0x84] sm:$0xf] }
 0x355   :  { %5285 = vmatpush.bf16.msra.mxu2 %v7773_v19  ;;  %5299 = vmatpush.bf16.msra.mxu3 %v7837_v49  ;;  %v4787_v21 = vpop.f32.mrf.mxu2  ;;  %v8488_v19 = vld [vmem:[%s13157_s3 + $0x4] sm:$0xf]  ;;  %v4801_v47 = vpop.f32.mrf.mxu3  ;;  %v7737_v49 = vor.u32 %v8489_v44, %v7736_v6  ;;  %v7801_v7 = vor.u32 %v8505_v54, %v7800_v38  ;;  %v7805_v55 = vor.u32 %v8504_v43, %v7802_v28  ;;  %v8521_v6 = vld [vmem:[%s13161_s5 + $0x8] sm:$0xff] }
 0x356   :  { %v4788_v24 = vadd.f32 %v4787_v21, %v12606_v35  ;;  %v7741_v15 = vor.u32 %v8488_v19, %v7738_v42  ;;  %v8532_v61 = vld [vmem:[%s13161_s5 + $0x60] sm:$0xff]  ;;  %v8530_v21 = vld [vmem:[%s13161_s5 + $0x50] sm:$0xff]  ;;  %v8529_v42 = vld [vmem:[%s13161_s5 + $0x48] sm:$0xff] }
 0x357   :  { %v8520_v19 = vld [vmem:[%s13161_s5] sm:$0xff] }
 0x358   :  { %5258 = vmatpush.bf16.msra.mxu0 %v7761_v22  ;;  %5272 = vmatpush.bf16.msra.mxu1 %v7825_v53  ;;  %v4802_v31 = vadd.f32 %v4801_v47, %v4788_v24  ;;  %v8528_v28 = vld [vmem:[%s13161_s5 + $0x40] sm:$0xff] }
 0x359   :  { %5286 = vmatpush.bf16.msra.mxu2 %v7765_v48  ;;  %5300 = vmatpush.bf16.msra.mxu3 %v7829_v10 }
 0x35c   :  { %5259 = vmatpush.bf16.msra.mxu0 %v7753_v59  ;;  %5273 = vmatpush.bf16.msra.mxu1 %v7817_v2  ;;  %v8525_v2 = vld [vmem:[%s13161_s5 + $0x28] sm:$0xff] }
 0x35d   :  { %5287 = vmatpush.bf16.msra.mxu2 %v7757_v9  ;;  %5301 = vmatpush.bf16.msra.mxu3 %v7821_v50  ;;  %v8524_v50 = vld [vmem:[%s13161_s5 + $0x20] sm:$0xff] }
 0x360   :  { %5260 = vmatpush.bf16.msra.mxu0 %v7745_v20  ;;  %5274 = vmatpush.bf16.msra.mxu1 %v7809_v18  ;;  %v8522_v18 = vld [vmem:[%s13161_s5 + $0x10] sm:$0xff] }
 0x361   :  { %5288 = vmatpush.bf16.msra.mxu2 %v7749_v13  ;;  %5302 = vmatpush.bf16.msra.mxu3 %v7813_v34  ;;  %v8531_v13 = vld [vmem:[%s13161_s5 + $0x58] sm:$0xff] }
 0x364   :  { %5261 = vmatpush.bf16.msra.mxu0 %v7737_v49  ;;  %5275 = vmatpush.bf16.msra.mxu1 %v7801_v7  ;;  %v4813_v33 = vpop.f32.mrf.mxu0  ;;  %v4827_v53 = vpop.f32.mrf.mxu1 }
 0x365   :  { %5289 = vmatpush.bf16.msra.mxu2 %v7741_v15  ;;  %5303 = vmatpush.bf16.msra.mxu3 %v7805_v55  ;;  %v4814_v5 = vadd.f32 %v4813_v33, %v4800_v16  ;;  %v4828_v39 = vadd.f32 %v4827_v53, %v12626_v57 }
 0x367   :  { %5262 = vmatmul.bf16.vlgmr.msra.gmra.mxu0 %v12744_v37  ;;  %5276 = vmatmul.bf16.vlgmr.msra.gmra.mxu1 %v12888_v30  ;;  %v4860_v22 = vmax.f32 %v4814_v5, 0.0 }
 0x368   :  { %5290 = vmatmul.bf16.vlgmr.msra.gmra.mxu2 %v12744_v37  ;;  %5304 = vmatmul.bf16.vlgmr.msra.gmra.mxu3 %v12888_v30 }
 0x369   :  { %v13054_v48 = vadd.f32 %v4860_v22, %v12822_v1  ;;  %5466 = vmatpush.bf16.msrb.mxu1 %v8535_v12 }
 0x36c   :  { %v4815_v8 = vpop.f32.mrf.mxu0  ;;  %v13063_v36 = vpop.f32.mrf.mxu1 }
 0x36d   :  { %v4841_v63 = vpop.f32.mrf.mxu2  ;;  %v4855_v10 = vpop.f32.mrf.mxu3  ;;  %v4816_v60 = vadd.f32 %v4815_v8, %v4802_v31  ;;  %5467 = vmatpush.bf16.msrb.mxu1 %v8534_v40 }
 0x36e   :  { %v4842_v0 = vadd.f32 %v4841_v63, %v4828_v39 }
 0x36f   :  { %v4862_v17 = vmax.f32 %v4816_v60, 0.0 }
 0x370   :  { %v4856_v51 = vadd.f32 %v4855_v10, %v4842_v0  ;;  %v4830_v0 = vadd.f32 %v13063_v36, %v12626_v57 }
 0x371   :  { %v13058_v37 = vadd.f32 %v4862_v17, %v12858_v11  ;;  %v8527_v11 = vld [vmem:[%s13161_s5 + $0x38] sm:$0xff]  ;;  %5468 = vmatpush.bf16.msrb.mxu1 %v8533_v25 }
 0x372   :  { %v4861_v45 = vmax.f32 %v4856_v51, 0.0  ;;  %5452 = vmatpush.bf16.msrb.mxu0 %v8527_v11 }
 0x374   :  { %v13061_v30 = vadd.f32 %v4861_v45, %v12979_v26  ;;  %v8526_v26 = vld [vmem:[%s13161_s5 + $0x30] sm:$0xff] }
 0x375   :  { %v13065_v1 = vpop.f32.mrf.mxu2  ;;  %v13067_v52 = vpop.f32.mrf.mxu3  ;;  %5469 = vmatpush.bf16.msrb.mxu1 %v8532_v61 }
 0x376   :  { %5453 = vmatpush.bf16.msrb.mxu0 %v8526_v26  ;;  %v4844_v45 = vadd.f32 %v13065_v1, %v4830_v0 }
 0x379   :  { %5470 = vmatpush.bf16.msrb.mxu1 %v8531_v13 }
 0x37a   :  { %5454 = vmatpush.bf16.msrb.mxu0 %v8525_v2 }
 0x37d   :  { %5471 = vmatpush.bf16.msrb.mxu1 %v8530_v21 }
 0x37e   :  { %5455 = vmatpush.bf16.msrb.mxu0 %v8524_v50  ;;  %v4858_v50 = vadd.f32 %v13067_v52, %v4844_v45 }
 0x381   :  { %5472 = vmatpush.bf16.msrb.mxu1 %v8529_v42 }
 0x382   :  { %5456 = vmatpush.bf16.msrb.mxu0 %v8523_v3 }
 0x384   :  { %v4883_v4 = vpop.f32.mrf.mxu0  ;;  %v4897_v56 = vpop.f32.mrf.mxu1 }
 0x385   :  { %5473 = vmatpush.bf16.msrb.mxu1 %v8528_v28  ;;  %v4884_v31 = vadd.f32 %v4883_v4, %v12606_v35 }
 0x386   :  { %5457 = vmatpush.bf16.msrb.mxu0 %v8522_v18 }
 0x387   :  { %v4898_v5 = vadd.f32 %v4897_v56, %v4884_v31 }
 0x38a   :  { %5458 = vmatpush.bf16.msrb.mxu0 %v8521_v6 }
 0x38c   :  { %v4885_v59 = vpop.f32.mrf.mxu0  ;;  %v4899_v16 = vpop.f32.mrf.mxu1 }
 0x38d   :  { %v13069_v14 = vpop.f32.mrf.mxu2  ;;  %v13071_v41 = vpop.f32.mrf.mxu3  ;;  %v4886_v7 = vadd.f32 %v4885_v59, %v12606_v35 }
 0x38e   :  { %5459 = vmatpush.bf16.msrb.mxu0 %v8520_v19  ;;  %v4912_v8 = vadd.f32 %v13069_v14, %v4898_v5  ;;  %v4926_v4 = vadd.f32 %v13071_v41, %v12626_v57 }
 0x38f   :  { %v4900_v39 = vadd.f32 %v4899_v16, %v4886_v7 }
 0x390   :  { %v4958_v12 = vmax.f32 %v4912_v8, 0.0 }
 0x392   :  { %v4962_v13 = vadd.f32 %v4958_v12, %v13054_v48 }
 0x395   :  { %v4913_v9 = vpop.f32.mrf.mxu2  ;;  %v4927_v62 = vpop.f32.mrf.mxu3 }
 0x396   :  { %v4914_v10 = vadd.f32 %v4913_v9, %v4900_v39  ;;  %v4928_v56 = vadd.f32 %v4927_v62, %v12626_v57 }
 0x398   :  { %v4960_v2 = vmax.f32 %v4914_v10, 0.0 }
 0x39a   :  { %v4964_v6 = vadd.f32 %v4960_v2, %v13058_v37 }
 0x3a4   :  { %v4939_v58 = vpop.f32.mrf.mxu0  ;;  %v13088_v27 = vpop.f32.mrf.mxu1 }
 0x3a5   :  { %v4940_v16 = vadd.f32 %v4939_v58, %v4926_v4 }
 0x3a7   :  { %v4954_v58 = vadd.f32 %v13088_v27, %v4940_v16 }
 0x3ac   :  { %v4941_v46 = vpop.f32.mrf.mxu0  ;;  %v4955_v20 = vpop.f32.mrf.mxu1 }
 0x3ad   :  { %v4979_v23 = vpop.f32.mrf.mxu2  ;;  %v4993_v29 = vpop.f32.mrf.mxu3  ;;  %v4942_v26 = vadd.f32 %v4941_v46, %v4928_v56 }
 0x3ae   :  { %v4980_v15 = vadd.f32 %v4979_v23, %v12606_v35 }
 0x3af   :  { %v4956_v46 = vadd.f32 %v4955_v20, %v4942_v26 }
 0x3b0   :  { %v4994_v60 = vadd.f32 %v4993_v29, %v4980_v15 }
 0x3b5   :  { %v4981_v44 = vpop.f32.mrf.mxu2  ;;  %v4995_v38 = vpop.f32.mrf.mxu3 }
 0x3b6   :  { %v4982_v55 = vadd.f32 %v4981_v44, %v12606_v35 }
 0x3b8   :  { %v4996_v51 = vadd.f32 %v4995_v38, %v4982_v55  ;;  %v4863_v38 = vmax.f32 %v4858_v50, 0.0 }
 0x3c4   :  { %v5007_v34 = vpop.f32.mrf.mxu0  ;;  %v5021_v54 = vpop.f32.mrf.mxu1 }
 0x3c5   :  { %v5008_v59 = vadd.f32 %v5007_v34, %v4994_v60  ;;  %v5022_v36 = vadd.f32 %v5021_v54, %v12626_v57 }
 0x3c7   :  { %v5054_v29 = vmax.f32 %v5008_v59, 0.0 }
 0x3c9   :  { %v5058_v54 = vadd.f32 %v5054_v29, %v4962_v13 }
 0x3cc   :  { %v5009_v47 = vpop.f32.mrf.mxu0  ;;  %v5023_v49 = vpop.f32.mrf.mxu1 }
 0x3cd   :  { %v5035_v24 = vpop.f32.mrf.mxu2  ;;  %v5049_v43 = vpop.f32.mrf.mxu3  ;;  %v5010_v11 = vadd.f32 %v5009_v47, %v4996_v51  ;;  %v5024_v14 = vadd.f32 %v5023_v49, %v12626_v57  ;;  %v4867_v49 = vadd.f32 %v4863_v38, %v13031_v32 }
 0x3ce   :  { %v5036_v1 = vadd.f32 %v5035_v24, %v5022_v36  ;;  %v4959_v24 = vmax.f32 %v4954_v58, 0.0 }
 0x3cf   :  { %v5056_v62 = vmax.f32 %v5010_v11, 0.0 }
 0x3d0   :  { %v5050_v34 = vadd.f32 %v5049_v43, %v5036_v1  ;;  %v4963_v43 = vadd.f32 %v4959_v24, %v13061_v30 }
 0x3d1   :  { %v5060_v19 = vadd.f32 %v5056_v62, %v4964_v6 }
 0x3d2   :  { %v5055_v31 = vmax.f32 %v5050_v34, 0.0 }
 0x3d5   :  { %v5037_v33 = vpop.f32.mrf.mxu2  ;;  %v5051_v22 = vpop.f32.mrf.mxu3 }
 0x3d6   :  { %v5038_v25 = vadd.f32 %v5037_v33, %v5024_v14 }
 0x3d8   :  { %v5052_v21 = vadd.f32 %v5051_v22, %v5038_v25  ;;  %v5059_v22 = vadd.f32 %v5055_v31, %v4963_v43 }
 0x3da   :  { %v5057_v48 = vmax.f32 %v5052_v21, 0.0 }
 0x3e4   :  { %v5263_v53 = vpop.f32.mrf.mxu0  ;;  %v5277_v63 = vpop.f32.mrf.mxu1 }
 0x3e5   :  { %v5264_v17 = vadd.f32 %v5263_v53, %v12606_v35 }
 0x3e7   :  { %v5278_v9 = vadd.f32 %v5277_v63, %v5264_v17 }
 0x3e9   :  { %v5310_v44 = vmax.f32 %v5278_v9, 0.0 }
 0x3eb   :  { %v5291_v40 = vpop.f32.mrf.mxu2  ;;  %v5305_v23 = vpop.f32.mrf.mxu3  ;;  %v5314_v27 = vadd.f32 %v5310_v44, %v5058_v54 }
 0x3ec   :  { %v5265_v41 = vpop.f32.mrf.mxu0  ;;  %v5292_v61 = vadd.f32 %v5291_v40, %v12626_v57  ;;  %v5279_v18 = vpop.f32.mrf.mxu1 }
 0x3ed   :  { %v5266_v3 = vadd.f32 %v5265_v41, %v12606_v35  ;;  %v4961_v35 = vmax.f32 %v4956_v46, 0.0 }
 0x3ee   :  { %v5306_v28 = vadd.f32 %v5305_v23, %v5292_v61 }
 0x3ef   :  { %v5280_v52 = vadd.f32 %v5279_v18, %v5266_v3  ;;  %v4965_v55 = vadd.f32 %v4961_v35, %v4867_v49 }
 0x3f0   :  { %v5311_v33 = vmax.f32 %v5306_v28, 0.0 }
 0x3f1   :  { %v5312_v42 = vmax.f32 %v5280_v52, 0.0  ;;  %v5061_v53 = vadd.f32 %v5057_v48, %v4965_v55 }
 0x3f2   :  { %v5315_v63 = vadd.f32 %v5311_v33, %v5059_v22 }
 0x3f3   :  { %v5316_v20 = vadd.f32 %v5312_v42, %v5060_v19  ;;  %v5293_v47 = vpop.f32.mrf.mxu2  ;;  %v5307_v15 = vpop.f32.mrf.mxu3 }
 0x3f4   :  { %v5294_v37 = vadd.f32 %v5293_v47, %v12626_v57  ;;  %v8536_v57 = vld [vmem:[%s13160_s6] ss:$0 sm:$0xff] }
 0x3f5   :  { %v5318_v7 = vpack.c.bf16 %v5316_v20, %v5314_v27 }
 0x3f6   :  { %v5308_v5 = vadd.f32 %v5307_v15, %v5294_v37 }
 0x3f7   :  { %5460 = vmatmul.bf16.vlgmr.msrb.gmra.mxu0 %v5318_v7 }
 0x3f8   :  { %v5313_v39 = vmax.f32 %v5308_v5, 0.0 }
 0x3fa   :  { %v5317_v0 = vadd.f32 %v5313_v39, %v5061_v53 }
 0x3fc   :  { %v5319_v8 = vpack.c.bf16 %v5317_v0, %v5315_v63 }
 0x3fe   :  { %5474 = vmatmul.bf16.vlgmr.msrb.gmra.mxu1 %v5319_v8 }
 0x474   :  { %v5461_v32 = vpop.f32.mrf.mxu0 }
 0x475   :  { %v5462_v10 = vadd.f32 %v8536_v57, %v5461_v32 }
 0x47b   :  { %v5475_v60 = vpop.f32.mrf.mxu1 }
 0x47c   :  { %v5476_v51 = vadd.f32 %v5475_v60, %v5462_v10  ;;  %v5463_v30 = vpop.f32.mrf.mxu0 }
 0x47d   :  { %v5464_v17 = vadd.f32 %v8536_v57, %v5463_v30 }
 0x47e   :  { %5480 = vst [vmem:[%s13162_s7] sm:$0xff] %v5476_v51 }
 0x483   :  { %v5477_v45 = vpop.f32.mrf.mxu1 }
 0x484   :  { %v5478_v4 = vadd.f32 %v5477_v45, %v5464_v17 }
 0x486   :  { %5481 = vst [vmem:[%s13162_s7 + $0x8] sm:$0xff] %v5478_v4 }

</bundles_post_ra>
